<compile_context>
chip_gen: v6e
topology: v6e:2x2x1
jax: 0.10.0
libtpu: 0.0.40
codegen_flags: <defaults>
</compile_context>

<pallas_src>
import functools
import math

import jax
import jax.numpy as jnp
from jax.experimental import pallas as pl
from jax.experimental.pallas import tpu as pltpu


# ----------------------------- fused Pallas kernel ---------------------------

def _fused_transformer_kernel(
    src_ref, pe_ref, enc_w_ref, enc_b_ref,
    wq_ref, bq_ref, wk_ref, bk_ref, wv_ref, bv_ref,
    wo_ref, bo_ref, n1g_ref, n1b_ref,
    w1_ref, b1_ref, w2_ref, b2_ref, n2g_ref, n2b_ref,
    dec_w_ref, dec_b_ref,
    out_ref,
    *, batch, seq, nhead, nlayers, enc_scale, eps):
  M = batch * seq
  E = enc_w_ref.shape[1]
  Dh = E // nhead
  sm_scale = 1.0 / math.sqrt(Dh)

  def layernorm(x, g, b):
    mu = jnp.mean(x, axis=-1, keepdims=True)
    xc = x - mu
    var = jnp.mean(xc * xc, axis=-1, keepdims=True)
    return xc * jax.lax.rsqrt(var + eps) * g + b

  # encoder linear * sqrt(num_actions), then + positional encoding (dropout=id)
  x = jnp.dot(src_ref[...], enc_w_ref[...], preferred_element_type=jnp.float32)
  x = (x + enc_b_ref[...]) * enc_scale + pe_ref[...]

  for li in range(nlayers):
    # ------------------- multi-head self-attention (post-norm) --------------
    q = jnp.dot(x, wq_ref[li], preferred_element_type=jnp.float32) + bq_ref[li]
    k = jnp.dot(x, wk_ref[li], preferred_element_type=jnp.float32) + bk_ref[li]
    v = jnp.dot(x, wv_ref[li], preferred_element_type=jnp.float32) + bv_ref[li]
    wo = wo_ref[li]
    attn = bo_ref[li]                            # [1, E] broadcasts over rows
    for h in range(nhead):
      lo, hi = h * Dh, (h + 1) * Dh
      qh = q[:, lo:hi].reshape(batch, seq, Dh)
      kh = k[:, lo:hi].reshape(batch, seq, Dh)
      vh = v[:, lo:hi].reshape(batch, seq, Dh)
      s = jnp.einsum('bqd,bkd->bqk', qh, kh,
                     preferred_element_type=jnp.float32) * sm_scale
      s = s - jnp.max(s, axis=-1, keepdims=True)
      p = jnp.exp(s)
      p = p / jnp.sum(p, axis=-1, keepdims=True)
      oh = jnp.einsum('bqk,bkd->bqd', p, vh,
                      preferred_element_type=jnp.float32)
      # fold out-projection per head: concat(heads) @ Wo == sum_h oh @ Wo[hDh:(h+1)Dh]
      attn = attn + jnp.dot(oh.reshape(M, Dh), wo[lo:hi, :],
                            preferred_element_type=jnp.float32)
    x = layernorm(x + attn, n1g_ref[li], n1b_ref[li])

    # ------------------- feed-forward (hidden never leaves VMEM) ------------
    h1 = jnp.dot(x.astype(w1_ref.dtype), w1_ref[li],
                 preferred_element_type=jnp.float32) + b1_ref[li]
    h1 = jnp.maximum(h1, 0.0)
    ff = jnp.dot(h1.astype(w2_ref.dtype), w2_ref[li],
                 preferred_element_type=jnp.float32) + b2_ref[li]
    x = layernorm(x + ff, n2g_ref[li], n2b_ref[li])

  # decoder + torch.softmax(dim=-1), fused (f32 exact softmax)
  logits = jnp.dot(x, dec_w_ref[...], preferred_element_type=jnp.float32) + dec_b_ref[...]
  logits = logits - jnp.max(logits, axis=-1, keepdims=True)
  e = jnp.exp(logits)
  out_ref[...] = (e / jnp.sum(e, axis=-1, keepdims=True)).astype(out_ref.dtype)


# ----------------------------- parameters & buffers --------------------------

def make_positional_encoding(d_model, max_len=5000):
  # Same construction as PositionalEncoding.__init__ (pe buffer), [max_len, d_model].
  position = jnp.arange(max_len, dtype=jnp.float32)[:, None]
  div_term = jnp.exp(jnp.arange(0, d_model, 2, dtype=jnp.float32)
                     * (-math.log(10000.0) / d_model))
  pe = jnp.zeros((max_len, d_model), jnp.float32)
  pe = pe.at[:, 0::2].set(jnp.sin(position * div_term))
  pe = pe.at[:, 1::2].set(jnp.cos(position * div_term))
  return pe


def init_params(key, input_size, num_actions, hidden_size=64, nhead=4,
                nlayers=2, dim_feedforward=2048):
  # Deterministic synthetic init following the PyTorch module's parameter shapes
  # (nn.Linear convention: weight is [out, in]).
  initrange = 0.1
  keys = jax.random.split(key, 4 + nlayers)
  E, F = hidden_size, dim_feedforward
  params = {
      "encoder_w": jax.random.uniform(keys[0], (E, input_size), jnp.float32,
                                      -initrange, initrange),
      "encoder_b": jax.random.uniform(keys[1], (E,), jnp.float32,
                                      -1.0 / math.sqrt(input_size),
                                      1.0 / math.sqrt(input_size)),
      "decoder_w": jax.random.uniform(keys[2], (num_actions, E), jnp.float32,
                                      -initrange, initrange),
      "decoder_b": jnp.zeros((num_actions,), jnp.float32),
      "layers": [],
  }
  for li in range(nlayers):
    lk = jax.random.split(keys[4 + li], 4)
    params["layers"].append({
        "in_proj_w": jax.random.uniform(lk[0], (3 * E, E), jnp.float32, -0.1, 0.1),
        "in_proj_b": jnp.zeros((3 * E,), jnp.float32),
        "out_proj_w": jax.random.uniform(lk[1], (E, E), jnp.float32, -0.1, 0.1),
        "out_proj_b": jnp.zeros((E,), jnp.float32),
        "linear1_w": jax.random.uniform(lk[2], (F, E), jnp.float32, -0.05, 0.05),
        "linear1_b": jnp.zeros((F,), jnp.float32),
        "linear2_w": jax.random.uniform(lk[3], (E, F), jnp.float32, -0.05, 0.05),
        "linear2_b": jnp.zeros((E,), jnp.float32),
        "norm1_w": jnp.ones((E,), jnp.float32),
        "norm1_b": jnp.zeros((E,), jnp.float32),
        "norm2_w": jnp.ones((E,), jnp.float32),
        "norm2_b": jnp.zeros((E,), jnp.float32),
    })
  return params


def prepare_bundle(params, seq, batch, ffn_dtype=jnp.bfloat16):
  """One-time prep: transpose weights to [in,out], split Wqkv, stack per-layer
  params with a leading layer axis, cast the big FFN matrices to bf16 for the
  MXU, and pre-tile the positional-encoding constant for batch-major rows."""
  E = params["encoder_w"].shape[0]
  A = params["decoder_w"].shape[0]
  pe = make_positional_encoding(E)[:seq]                   # [S, E]
  layers = params["layers"]

  def stack(fn):
    return jnp.stack([fn(l) for l in layers])

  bundle = {
      "pe": jnp.tile(pe, (batch, 1)),                      # [B*S, E] constant
      "enc_w": params["encoder_w"].T,                      # [I, E]
      "enc_b": params["encoder_b"].reshape(1, E),
      "dec_w": params["decoder_w"].T,                      # [E, A]
      "dec_b": params["decoder_b"].reshape(1, A),
      "wq": stack(lambda l: l["in_proj_w"][:E, :].T),          # [L, E, E]
      "wk": stack(lambda l: l["in_proj_w"][E:2 * E, :].T),
      "wv": stack(lambda l: l["in_proj_w"][2 * E:, :].T),
      "bq": stack(lambda l: l["in_proj_b"][:E].reshape(1, E)),  # [L, 1, E]
      "bk": stack(lambda l: l["in_proj_b"][E:2 * E].reshape(1, E)),
      "bv": stack(lambda l: l["in_proj_b"][2 * E:].reshape(1, E)),
      "wo": stack(lambda l: l["out_proj_w"].T),
      "bo": stack(lambda l: l["out_proj_b"].reshape(1, E)),
      "n1g": stack(lambda l: l["norm1_w"].reshape(1, E)),
      "n1b": stack(lambda l: l["norm1_b"].reshape(1, E)),
      "w1": stack(lambda l: l["linear1_w"].T).astype(ffn_dtype),  # [L, E, F] bf16
      "b1": stack(lambda l: l["linear1_b"].reshape(1, -1)),
      "w2": stack(lambda l: l["linear2_w"].T).astype(ffn_dtype),  # [L, F, E] bf16
      "b2": stack(lambda l: l["linear2_b"].reshape(1, E)),
      "n2g": stack(lambda l: l["norm2_w"].reshape(1, E)),
      "n2b": stack(lambda l: l["norm2_b"].reshape(1, E)),
  }
  return bundle


# ----------------------------- forward pass ----------------------------------

_ARG_ORDER = ("pe", "enc_w", "enc_b",
              "wq", "bq", "wk", "bk", "wv", "bv",
              "wo", "bo", "n1g", "n1b",
              "w1", "b1", "w2", "b2", "n2g", "n2b",
              "dec_w", "dec_b")


def transformer_forward(bundle, src, *, num_actions, nhead, nlayers):
  S, B, input_size = src.shape
  M = S * B
  # batch-major rows so each batch's sequence is contiguous for attention
  x2d = src.transpose(1, 0, 2).reshape(M, input_size)
  args = [x2d] + [bundle[k] for k in _ARG_ORDER]

  def full_spec(a):
    return pl.BlockSpec(a.shape, lambda i, _n=a.ndim: (0,) * _n)

  kern = functools.partial(
      _fused_transformer_kernel,
      batch=B, seq=S, nhead=nhead, nlayers=nlayers,
      enc_scale=math.sqrt(num_actions), eps=1e-5)

  probs = pl.pallas_call(
      kern,
      grid=(1,),
      out_shape=jax.ShapeDtypeStruct((M, num_actions), jnp.float32),
      in_specs=[full_spec(a) for a in args],
      out_specs=pl.BlockSpec((M, num_actions), lambda i: (0, 0)),
      compiler_params=pltpu.CompilerParams(dimension_semantics=("arbitrary",)),
  )(*args)

  return probs.reshape(B, S, num_actions).transpose(1, 0, 2)   # [S, B, A]


# ----------------------------- main -------------------------------------------

if __name__ == "__main__":
  S, B = 8, 2
  input_size = 16       # 4x4 2048 board, flattened
  num_actions = 4
  hidden_size = 64
  nhead = 4
  nlayers = 2

  key = jax.random.PRNGKey(0)
  pkey, xkey = jax.random.split(key)
  params = init_params(pkey, input_size, num_actions, hidden_size, nhead, nlayers)
  bundle = prepare_bundle(params, S, B)
  src = jax.random.normal(xkey, (S, B, input_size), jnp.float32)

  out = transformer_forward(bundle, src, num_actions=num_actions,
                            nhead=nhead, nlayers=nlayers)
  out = jax.block_until_ready(out)

  assert out.shape == (S, B, num_actions)
  assert bool(jnp.all(jnp.isfinite(out)))
  assert bool(jnp.allclose(jnp.sum(out, axis=-1), 1.0, atol=1e-4))
  print("KERNEL_OK")
</pallas_src>

<mosaic_0001>
module attributes {stable_mosaic.version = 11 : i64} {
  func.func @_fused_transformer_kernel(%arg0: i32, %arg1: memref<16x16xf32, #tpu.memory_space<vmem>>, %arg2: memref<16x64xf32, #tpu.memory_space<vmem>>, %arg3: memref<16x64xf32, #tpu.memory_space<vmem>>, %arg4: memref<1x64xf32, #tpu.memory_space<vmem>>, %arg5: memref<2x64x64xf32, #tpu.memory_space<vmem>>, %arg6: memref<2x1x64xf32, #tpu.memory_space<vmem>>, %arg7: memref<2x64x64xf32, #tpu.memory_space<vmem>>, %arg8: memref<2x1x64xf32, #tpu.memory_space<vmem>>, %arg9: memref<2x64x64xf32, #tpu.memory_space<vmem>>, %arg10: memref<2x1x64xf32, #tpu.memory_space<vmem>>, %arg11: memref<2x64x64xf32, #tpu.memory_space<vmem>>, %arg12: memref<2x1x64xf32, #tpu.memory_space<vmem>>, %arg13: memref<2x1x64xf32, #tpu.memory_space<vmem>>, %arg14: memref<2x1x64xf32, #tpu.memory_space<vmem>>, %arg15: memref<2x64x2048xbf16, #tpu.memory_space<vmem>>, %arg16: memref<2x1x2048xf32, #tpu.memory_space<vmem>>, %arg17: memref<2x2048x64xbf16, #tpu.memory_space<vmem>>, %arg18: memref<2x1x64xf32, #tpu.memory_space<vmem>>, %arg19: memref<2x1x64xf32, #tpu.memory_space<vmem>>, %arg20: memref<2x1x64xf32, #tpu.memory_space<vmem>>, %arg21: memref<64x4xf32, #tpu.memory_space<vmem>>, %arg22: memref<1x4xf32, #tpu.memory_space<vmem>>, %arg23: memref<16x4xf32, #tpu.memory_space<vmem>>) attributes {dimension_semantics = [#tpu.dimension_semantics<arbitrary>], iteration_bounds = array<i64: 1>, scalar_prefetch = 0 : i64, scratch_operands = 0 : i64, tpu.core_type = #tpu.core_type<tc>, window_params = [{pipeline_mode = #tpu.pipeline_mode<synchronous>, transform_indices = @transform_0, window_bounds = array<i64: 16, 16>}, {pipeline_mode = #tpu.pipeline_mode<synchronous>, transform_indices = @transform_1, window_bounds = array<i64: 16, 64>}, {pipeline_mode = #tpu.pipeline_mode<synchronous>, transform_indices = @transform_2, window_bounds = array<i64: 16, 64>}, {pipeline_mode = #tpu.pipeline_mode<synchronous>, transform_indices = @transform_3, window_bounds = array<i64: 1, 64>}, {pipeline_mode = #tpu.pipeline_mode<synchronous>, transform_indices = @transform_4, window_bounds = array<i64: 2, 64, 64>}, {pipeline_mode = #tpu.pipeline_mode<synchronous>, transform_indices = @transform_5, window_bounds = array<i64: 2, 1, 64>}, {pipeline_mode = #tpu.pipeline_mode<synchronous>, transform_indices = @transform_6, window_bounds = array<i64: 2, 64, 64>}, {pipeline_mode = #tpu.pipeline_mode<synchronous>, transform_indices = @transform_7, window_bounds = array<i64: 2, 1, 64>}, {pipeline_mode = #tpu.pipeline_mode<synchronous>, transform_indices = @transform_8, window_bounds = array<i64: 2, 64, 64>}, {pipeline_mode = #tpu.pipeline_mode<synchronous>, transform_indices = @transform_9, window_bounds = array<i64: 2, 1, 64>}, {pipeline_mode = #tpu.pipeline_mode<synchronous>, transform_indices = @transform_10, window_bounds = array<i64: 2, 64, 64>}, {pipeline_mode = #tpu.pipeline_mode<synchronous>, transform_indices = @transform_11, window_bounds = array<i64: 2, 1, 64>}, {pipeline_mode = #tpu.pipeline_mode<synchronous>, transform_indices = @transform_12, window_bounds = array<i64: 2, 1, 64>}, {pipeline_mode = #tpu.pipeline_mode<synchronous>, transform_indices = @transform_13, window_bounds = array<i64: 2, 1, 64>}, {pipeline_mode = #tpu.pipeline_mode<synchronous>, transform_indices = @transform_14, window_bounds = array<i64: 2, 64, 2048>}, {pipeline_mode = #tpu.pipeline_mode<synchronous>, transform_indices = @transform_15, window_bounds = array<i64: 2, 1, 2048>}, {pipeline_mode = #tpu.pipeline_mode<synchronous>, transform_indices = @transform_16, window_bounds = array<i64: 2, 2048, 64>}, {pipeline_mode = #tpu.pipeline_mode<synchronous>, transform_indices = @transform_17, window_bounds = array<i64: 2, 1, 64>}, {pipeline_mode = #tpu.pipeline_mode<synchronous>, transform_indices = @transform_18, window_bounds = array<i64: 2, 1, 64>}, {pipeline_mode = #tpu.pipeline_mode<synchronous>, transform_indices = @transform_19, window_bounds = array<i64: 2, 1, 64>}, {pipeline_mode = #tpu.pipeline_mode<synchronous>, transform_indices = @transform_20, window_bounds = array<i64: 64, 4>}, {pipeline_mode = #tpu.pipeline_mode<synchronous>, transform_indices = @transform_21, window_bounds = array<i64: 1, 4>}, {pipeline_mode = #tpu.pipeline_mode<synchronous>, transform_indices = @transform_22, window_bounds = array<i64: 16, 4>}]} {
    %c0 = arith.constant 0 : index
    %c0_0 = arith.constant 0 : index
    %0 = vector.load %arg1[%c0, %c0_0] : memref<16x16xf32, #tpu.memory_space<vmem>>, vector<16x16xf32>
    %c0_1 = arith.constant 0 : index
    %c0_2 = arith.constant 0 : index
    %1 = vector.load %arg3[%c0_1, %c0_2] : memref<16x64xf32, #tpu.memory_space<vmem>>, vector<16x64xf32>
    %cst = arith.constant dense<0.000000e+00> : vector<16x64xf32>
    %2 = tpu.matmul %0, %1, %cst {dimension_numbers = #tpu.dot_dimension_numbers<[1], [0], [0], [1], [0, 0, 1, 1], [], []>} : vector<16x16xf32>, vector<16x64xf32>, vector<16x64xf32> -> vector<16x64xf32>
    %c0_3 = arith.constant 0 : index
    %c0_4 = arith.constant 0 : index
    %3 = vector.load %arg4[%c0_3, %c0_4] : memref<1x64xf32, #tpu.memory_space<vmem>>, vector<1x64xf32>
    %4 = vector.broadcast %3 : vector<1x64xf32> to vector<16x64xf32>
    %5 = arith.addf %2, %4 : vector<16x64xf32>
    %cst_5 = arith.constant 2.000000e+00 : f32
    %6 = vector.broadcast %cst_5 : f32 to vector<16x64xf32>
    %7 = arith.mulf %5, %6 : vector<16x64xf32>
    %c0_6 = arith.constant 0 : index
    %c0_7 = arith.constant 0 : index
    %8 = vector.load %arg2[%c0_6, %c0_7] : memref<16x64xf32, #tpu.memory_space<vmem>>, vector<16x64xf32>
    %9 = arith.addf %7, %8 : vector<16x64xf32>
    %c0_8 = arith.constant 0 : index
    %c0_9 = arith.constant 0 : index
    %c0_10 = arith.constant 0 : index
    %10 = vector.load %arg5[%c0_8, %c0_9, %c0_10] : memref<2x64x64xf32, #tpu.memory_space<vmem>>, vector<1x64x64xf32>
    %11 = vector.shape_cast %10 : vector<1x64x64xf32> to vector<64x64xf32>
    %cst_11 = arith.constant dense<0.000000e+00> : vector<16x64xf32>
    %12 = tpu.matmul %9, %11, %cst_11 {dimension_numbers = #tpu.dot_dimension_numbers<[1], [0], [0], [1], [0, 0, 1, 1], [], []>} : vector<16x64xf32>, vector<64x64xf32>, vector<16x64xf32> -> vector<16x64xf32>
    %c0_12 = arith.constant 0 : index
    %c0_13 = arith.constant 0 : index
    %c0_14 = arith.constant 0 : index
    %13 = vector.load %arg6[%c0_12, %c0_13, %c0_14] : memref<2x1x64xf32, #tpu.memory_space<vmem>>, vector<1x1x64xf32>
    %14 = vector.shape_cast %13 : vector<1x1x64xf32> to vector<1x64xf32>
    %15 = vector.broadcast %14 : vector<1x64xf32> to vector<16x64xf32>
    %16 = arith.addf %12, %15 : vector<16x64xf32>
    %c0_15 = arith.constant 0 : index
    %c0_16 = arith.constant 0 : index
    %c0_17 = arith.constant 0 : index
    %17 = vector.load %arg7[%c0_15, %c0_16, %c0_17] : memref<2x64x64xf32, #tpu.memory_space<vmem>>, vector<1x64x64xf32>
    %18 = vector.shape_cast %17 : vector<1x64x64xf32> to vector<64x64xf32>
    %cst_18 = arith.constant dense<0.000000e+00> : vector<16x64xf32>
    %19 = tpu.matmul %9, %18, %cst_18 {dimension_numbers = #tpu.dot_dimension_numbers<[1], [0], [0], [1], [0, 0, 1, 1], [], []>} : vector<16x64xf32>, vector<64x64xf32>, vector<16x64xf32> -> vector<16x64xf32>
    %c0_19 = arith.constant 0 : index
    %c0_20 = arith.constant 0 : index
    %c0_21 = arith.constant 0 : index
    %20 = vector.load %arg8[%c0_19, %c0_20, %c0_21] : memref<2x1x64xf32, #tpu.memory_space<vmem>>, vector<1x1x64xf32>
    %21 = vector.shape_cast %20 : vector<1x1x64xf32> to vector<1x64xf32>
    %22 = vector.broadcast %21 : vector<1x64xf32> to vector<16x64xf32>
    %23 = arith.addf %19, %22 : vector<16x64xf32>
    %c0_22 = arith.constant 0 : index
    %c0_23 = arith.constant 0 : index
    %c0_24 = arith.constant 0 : index
    %24 = vector.load %arg9[%c0_22, %c0_23, %c0_24] : memref<2x64x64xf32, #tpu.memory_space<vmem>>, vector<1x64x64xf32>
    %25 = vector.shape_cast %24 : vector<1x64x64xf32> to vector<64x64xf32>
    %cst_25 = arith.constant dense<0.000000e+00> : vector<16x64xf32>
    %26 = tpu.matmul %9, %25, %cst_25 {dimension_numbers = #tpu.dot_dimension_numbers<[1], [0], [0], [1], [0, 0, 1, 1], [], []>} : vector<16x64xf32>, vector<64x64xf32>, vector<16x64xf32> -> vector<16x64xf32>
    %c0_26 = arith.constant 0 : index
    %c0_27 = arith.constant 0 : index
    %c0_28 = arith.constant 0 : index
    %27 = vector.load %arg10[%c0_26, %c0_27, %c0_28] : memref<2x1x64xf32, #tpu.memory_space<vmem>>, vector<1x1x64xf32>
    %28 = vector.shape_cast %27 : vector<1x1x64xf32> to vector<1x64xf32>
    %29 = vector.broadcast %28 : vector<1x64xf32> to vector<16x64xf32>
    %30 = arith.addf %26, %29 : vector<16x64xf32>
    %c0_29 = arith.constant 0 : index
    %c0_30 = arith.constant 0 : index
    %c0_31 = arith.constant 0 : index
    %31 = vector.load %arg11[%c0_29, %c0_30, %c0_31] : memref<2x64x64xf32, #tpu.memory_space<vmem>>, vector<1x64x64xf32>
    %32 = vector.shape_cast %31 : vector<1x64x64xf32> to vector<64x64xf32>
    %c0_32 = arith.constant 0 : index
    %c0_33 = arith.constant 0 : index
    %c0_34 = arith.constant 0 : index
    %33 = vector.load %arg12[%c0_32, %c0_33, %c0_34] : memref<2x1x64xf32, #tpu.memory_space<vmem>>, vector<1x1x64xf32>
    %34 = vector.shape_cast %33 : vector<1x1x64xf32> to vector<1x64xf32>
    %35 = vector.extract_strided_slice %16 {offsets = [0, 0], sizes = [16, 16], strides = [1, 1]} : vector<16x64xf32> to vector<16x16xf32>
    %36 = vector.shape_cast %35 : vector<16x16xf32> to vector<2x8x16xf32>
    %37 = vector.extract_strided_slice %23 {offsets = [0, 0], sizes = [16, 16], strides = [1, 1]} : vector<16x64xf32> to vector<16x16xf32>
    %38 = vector.shape_cast %37 : vector<16x16xf32> to vector<2x8x16xf32>
    %39 = vector.extract_strided_slice %30 {offsets = [0, 0], sizes = [16, 16], strides = [1, 1]} : vector<16x64xf32> to vector<16x16xf32>
    %40 = vector.shape_cast %39 : vector<16x16xf32> to vector<2x8x16xf32>
    "tpu.trace_start"() <{level = 10 : i32, message = "bqd,bkd->bqk"}> : () -> ()
    %cst_35 = arith.constant dense<0.000000e+00> : vector<2x8x8xf32>
    %41 = tpu.matmul %36, %38, %cst_35 {dimension_numbers = #tpu.dot_dimension_numbers<[2], [2], [1], [1], [0, 0, 0, 1, 1, 1], [0], [0]>} : vector<2x8x16xf32>, vector<2x8x16xf32>, vector<2x8x8xf32> -> vector<2x8x8xf32>
    "tpu.trace_stop"() : () -> ()
    %cst_36 = arith.constant 2.500000e-01 : f32
    %42 = vector.broadcast %cst_36 : f32 to vector<2x8x8xf32>
    %43 = arith.mulf %41, %42 : vector<2x8x8xf32>
    %cst_37 = arith.constant dense<0xFF800000> : vector<2x8xf32>
    %44 = vector.multi_reduction <maximumf>, %43, %cst_37 [2] : vector<2x8x8xf32> to vector<2x8xf32>
    %45 = vector.shape_cast %44 : vector<2x8xf32> to vector<2x8x1xf32>
    %46 = vector.broadcast %45 : vector<2x8x1xf32> to vector<2x8x8xf32>
    %47 = arith.subf %43, %46 : vector<2x8x8xf32>
    %48 = math.exp %47 : vector<2x8x8xf32>
    %cst_38 = arith.constant dense<0.000000e+00> : vector<2x8xf32>
    %49 = vector.multi_reduction <add>, %48, %cst_38 [2] : vector<2x8x8xf32> to vector<2x8xf32>
    %50 = vector.shape_cast %49 : vector<2x8xf32> to vector<2x8x1xf32>
    %51 = vector.broadcast %50 : vector<2x8x1xf32> to vector<2x8x8xf32>
    %52 = arith.divf %48, %51 : vector<2x8x8xf32>
    "tpu.trace_start"() <{level = 10 : i32, message = "bqk,bkd->bqd"}> : () -> ()
    %cst_39 = arith.constant dense<0.000000e+00> : vector<2x8x16xf32>
    %53 = tpu.matmul %52, %40, %cst_39 {dimension_numbers = #tpu.dot_dimension_numbers<[2], [1], [1], [2], [0, 0, 0, 1, 1, 2], [0], [0]>} : vector<2x8x8xf32>, vector<2x8x16xf32>, vector<2x8x16xf32> -> vector<2x8x16xf32>
    "tpu.trace_stop"() : () -> ()
    %54 = vector.shape_cast %53 : vector<2x8x16xf32> to vector<16x16xf32>
    %55 = vector.extract_strided_slice %32 {offsets = [0, 0], sizes = [16, 64], strides = [1, 1]} : vector<64x64xf32> to vector<16x64xf32>
    %cst_40 = arith.constant dense<0.000000e+00> : vector<16x64xf32>
    %56 = tpu.matmul %54, %55, %cst_40 {dimension_numbers = #tpu.dot_dimension_numbers<[1], [0], [0], [1], [0, 0, 1, 1], [], []>} : vector<16x16xf32>, vector<16x64xf32>, vector<16x64xf32> -> vector<16x64xf32>
    %57 = vector.broadcast %34 : vector<1x64xf32> to vector<16x64xf32>
    %58 = arith.addf %57, %56 : vector<16x64xf32>
    %59 = vector.extract_strided_slice %16 {offsets = [0, 16], sizes = [16, 16], strides = [1, 1]} : vector<16x64xf32> to vector<16x16xf32>
    %60 = vector.shape_cast %59 : vector<16x16xf32> to vector<2x8x16xf32>
    %61 = vector.extract_strided_slice %23 {offsets = [0, 16], sizes = [16, 16], strides = [1, 1]} : vector<16x64xf32> to vector<16x16xf32>
    %62 = vector.shape_cast %61 : vector<16x16xf32> to vector<2x8x16xf32>
    %63 = vector.extract_strided_slice %30 {offsets = [0, 16], sizes = [16, 16], strides = [1, 1]} : vector<16x64xf32> to vector<16x16xf32>
    %64 = vector.shape_cast %63 : vector<16x16xf32> to vector<2x8x16xf32>
    "tpu.trace_start"() <{level = 10 : i32, message = "bqd,bkd->bqk"}> : () -> ()
    %cst_41 = arith.constant dense<0.000000e+00> : vector<2x8x8xf32>
    %65 = tpu.matmul %60, %62, %cst_41 {dimension_numbers = #tpu.dot_dimension_numbers<[2], [2], [1], [1], [0, 0, 0, 1, 1, 1], [0], [0]>} : vector<2x8x16xf32>, vector<2x8x16xf32>, vector<2x8x8xf32> -> vector<2x8x8xf32>
    "tpu.trace_stop"() : () -> ()
    %cst_42 = arith.constant 2.500000e-01 : f32
    %66 = vector.broadcast %cst_42 : f32 to vector<2x8x8xf32>
    %67 = arith.mulf %65, %66 : vector<2x8x8xf32>
    %cst_43 = arith.constant dense<0xFF800000> : vector<2x8xf32>
    %68 = vector.multi_reduction <maximumf>, %67, %cst_43 [2] : vector<2x8x8xf32> to vector<2x8xf32>
    %69 = vector.shape_cast %68 : vector<2x8xf32> to vector<2x8x1xf32>
    %70 = vector.broadcast %69 : vector<2x8x1xf32> to vector<2x8x8xf32>
    %71 = arith.subf %67, %70 : vector<2x8x8xf32>
    %72 = math.exp %71 : vector<2x8x8xf32>
    %cst_44 = arith.constant dense<0.000000e+00> : vector<2x8xf32>
    %73 = vector.multi_reduction <add>, %72, %cst_44 [2] : vector<2x8x8xf32> to vector<2x8xf32>
    %74 = vector.shape_cast %73 : vector<2x8xf32> to vector<2x8x1xf32>
    %75 = vector.broadcast %74 : vector<2x8x1xf32> to vector<2x8x8xf32>
    %76 = arith.divf %72, %75 : vector<2x8x8xf32>
    "tpu.trace_start"() <{level = 10 : i32, message = "bqk,bkd->bqd"}> : () -> ()
    %cst_45 = arith.constant dense<0.000000e+00> : vector<2x8x16xf32>
    %77 = tpu.matmul %76, %64, %cst_45 {dimension_numbers = #tpu.dot_dimension_numbers<[2], [1], [1], [2], [0, 0, 0, 1, 1, 2], [0], [0]>} : vector<2x8x8xf32>, vector<2x8x16xf32>, vector<2x8x16xf32> -> vector<2x8x16xf32>
    "tpu.trace_stop"() : () -> ()
    %78 = vector.shape_cast %77 : vector<2x8x16xf32> to vector<16x16xf32>
    %79 = vector.extract_strided_slice %32 {offsets = [16, 0], sizes = [16, 64], strides = [1, 1]} : vector<64x64xf32> to vector<16x64xf32>
    %cst_46 = arith.constant dense<0.000000e+00> : vector<16x64xf32>
    %80 = tpu.matmul %78, %79, %cst_46 {dimension_numbers = #tpu.dot_dimension_numbers<[1], [0], [0], [1], [0, 0, 1, 1], [], []>} : vector<16x16xf32>, vector<16x64xf32>, vector<16x64xf32> -> vector<16x64xf32>
    %81 = arith.addf %58, %80 : vector<16x64xf32>
    %82 = vector.extract_strided_slice %16 {offsets = [0, 32], sizes = [16, 16], strides = [1, 1]} : vector<16x64xf32> to vector<16x16xf32>
    %83 = vector.shape_cast %82 : vector<16x16xf32> to vector<2x8x16xf32>
    %84 = vector.extract_strided_slice %23 {offsets = [0, 32], sizes = [16, 16], strides = [1, 1]} : vector<16x64xf32> to vector<16x16xf32>
    %85 = vector.shape_cast %84 : vector<16x16xf32> to vector<2x8x16xf32>
    %86 = vector.extract_strided_slice %30 {offsets = [0, 32], sizes = [16, 16], strides = [1, 1]} : vector<16x64xf32> to vector<16x16xf32>
    %87 = vector.shape_cast %86 : vector<16x16xf32> to vector<2x8x16xf32>
    "tpu.trace_start"() <{level = 10 : i32, message = "bqd,bkd->bqk"}> : () -> ()
    %cst_47 = arith.constant dense<0.000000e+00> : vector<2x8x8xf32>
    %88 = tpu.matmul %83, %85, %cst_47 {dimension_numbers = #tpu.dot_dimension_numbers<[2], [2], [1], [1], [0, 0, 0, 1, 1, 1], [0], [0]>} : vector<2x8x16xf32>, vector<2x8x16xf32>, vector<2x8x8xf32> -> vector<2x8x8xf32>
    "tpu.trace_stop"() : () -> ()
    %cst_48 = arith.constant 2.500000e-01 : f32
    %89 = vector.broadcast %cst_48 : f32 to vector<2x8x8xf32>
    %90 = arith.mulf %88, %89 : vector<2x8x8xf32>
    %cst_49 = arith.constant dense<0xFF800000> : vector<2x8xf32>
    %91 = vector.multi_reduction <maximumf>, %90, %cst_49 [2] : vector<2x8x8xf32> to vector<2x8xf32>
    %92 = vector.shape_cast %91 : vector<2x8xf32> to vector<2x8x1xf32>
    %93 = vector.broadcast %92 : vector<2x8x1xf32> to vector<2x8x8xf32>
    %94 = arith.subf %90, %93 : vector<2x8x8xf32>
    %95 = math.exp %94 : vector<2x8x8xf32>
    %cst_50 = arith.constant dense<0.000000e+00> : vector<2x8xf32>
    %96 = vector.multi_reduction <add>, %95, %cst_50 [2] : vector<2x8x8xf32> to vector<2x8xf32>
    %97 = vector.shape_cast %96 : vector<2x8xf32> to vector<2x8x1xf32>
    %98 = vector.broadcast %97 : vector<2x8x1xf32> to vector<2x8x8xf32>
    %99 = arith.divf %95, %98 : vector<2x8x8xf32>
    "tpu.trace_start"() <{level = 10 : i32, message = "bqk,bkd->bqd"}> : () -> ()
    %cst_51 = arith.constant dense<0.000000e+00> : vector<2x8x16xf32>
    %100 = tpu.matmul %99, %87, %cst_51 {dimension_numbers = #tpu.dot_dimension_numbers<[2], [1], [1], [2], [0, 0, 0, 1, 1, 2], [0], [0]>} : vector<2x8x8xf32>, vector<2x8x16xf32>, vector<2x8x16xf32> -> vector<2x8x16xf32>
    "tpu.trace_stop"() : () -> ()
    %101 = vector.shape_cast %100 : vector<2x8x16xf32> to vector<16x16xf32>
    %102 = vector.extract_strided_slice %32 {offsets = [32, 0], sizes = [16, 64], strides = [1, 1]} : vector<64x64xf32> to vector<16x64xf32>
    %cst_52 = arith.constant dense<0.000000e+00> : vector<16x64xf32>
    %103 = tpu.matmul %101, %102, %cst_52 {dimension_numbers = #tpu.dot_dimension_numbers<[1], [0], [0], [1], [0, 0, 1, 1], [], []>} : vector<16x16xf32>, vector<16x64xf32>, vector<16x64xf32> -> vector<16x64xf32>
    %104 = arith.addf %81, %103 : vector<16x64xf32>
    %105 = vector.extract_strided_slice %16 {offsets = [0, 48], sizes = [16, 16], strides = [1, 1]} : vector<16x64xf32> to vector<16x16xf32>
    %106 = vector.shape_cast %105 : vector<16x16xf32> to vector<2x8x16xf32>
    %107 = vector.extract_strided_slice %23 {offsets = [0, 48], sizes = [16, 16], strides = [1, 1]} : vector<16x64xf32> to vector<16x16xf32>
    %108 = vector.shape_cast %107 : vector<16x16xf32> to vector<2x8x16xf32>
    %109 = vector.extract_strided_slice %30 {offsets = [0, 48], sizes = [16, 16], strides = [1, 1]} : vector<16x64xf32> to vector<16x16xf32>
    %110 = vector.shape_cast %109 : vector<16x16xf32> to vector<2x8x16xf32>
    "tpu.trace_start"() <{level = 10 : i32, message = "bqd,bkd->bqk"}> : () -> ()
    %cst_53 = arith.constant dense<0.000000e+00> : vector<2x8x8xf32>
    %111 = tpu.matmul %106, %108, %cst_53 {dimension_numbers = #tpu.dot_dimension_numbers<[2], [2], [1], [1], [0, 0, 0, 1, 1, 1], [0], [0]>} : vector<2x8x16xf32>, vector<2x8x16xf32>, vector<2x8x8xf32> -> vector<2x8x8xf32>
    "tpu.trace_stop"() : () -> ()
    %cst_54 = arith.constant 2.500000e-01 : f32
    %112 = vector.broadcast %cst_54 : f32 to vector<2x8x8xf32>
    %113 = arith.mulf %111, %112 : vector<2x8x8xf32>
    %cst_55 = arith.constant dense<0xFF800000> : vector<2x8xf32>
    %114 = vector.multi_reduction <maximumf>, %113, %cst_55 [2] : vector<2x8x8xf32> to vector<2x8xf32>
    %115 = vector.shape_cast %114 : vector<2x8xf32> to vector<2x8x1xf32>
    %116 = vector.broadcast %115 : vector<2x8x1xf32> to vector<2x8x8xf32>
    %117 = arith.subf %113, %116 : vector<2x8x8xf32>
    %118 = math.exp %117 : vector<2x8x8xf32>
    %cst_56 = arith.constant dense<0.000000e+00> : vector<2x8xf32>
    %119 = vector.multi_reduction <add>, %118, %cst_56 [2] : vector<2x8x8xf32> to vector<2x8xf32>
    %120 = vector.shape_cast %119 : vector<2x8xf32> to vector<2x8x1xf32>
    %121 = vector.broadcast %120 : vector<2x8x1xf32> to vector<2x8x8xf32>
    %122 = arith.divf %118, %121 : vector<2x8x8xf32>
    "tpu.trace_start"() <{level = 10 : i32, message = "bqk,bkd->bqd"}> : () -> ()
    %cst_57 = arith.constant dense<0.000000e+00> : vector<2x8x16xf32>
    %123 = tpu.matmul %122, %110, %cst_57 {dimension_numbers = #tpu.dot_dimension_numbers<[2], [1], [1], [2], [0, 0, 0, 1, 1, 2], [0], [0]>} : vector<2x8x8xf32>, vector<2x8x16xf32>, vector<2x8x16xf32> -> vector<2x8x16xf32>
    "tpu.trace_stop"() : () -> ()
    %124 = vector.shape_cast %123 : vector<2x8x16xf32> to vector<16x16xf32>
    %125 = vector.extract_strided_slice %32 {offsets = [48, 0], sizes = [16, 64], strides = [1, 1]} : vector<64x64xf32> to vector<16x64xf32>
    %cst_58 = arith.constant dense<0.000000e+00> : vector<16x64xf32>
    %126 = tpu.matmul %124, %125, %cst_58 {dimension_numbers = #tpu.dot_dimension_numbers<[1], [0], [0], [1], [0, 0, 1, 1], [], []>} : vector<16x16xf32>, vector<16x64xf32>, vector<16x64xf32> -> vector<16x64xf32>
    %127 = arith.addf %104, %126 : vector<16x64xf32>
    %128 = arith.addf %9, %127 : vector<16x64xf32>
    %c0_59 = arith.constant 0 : index
    %c0_60 = arith.constant 0 : index
    %c0_61 = arith.constant 0 : index
    %129 = vector.load %arg13[%c0_59, %c0_60, %c0_61] : memref<2x1x64xf32, #tpu.memory_space<vmem>>, vector<1x1x64xf32>
    %130 = vector.shape_cast %129 : vector<1x1x64xf32> to vector<1x64xf32>
    %c0_62 = arith.constant 0 : index
    %c0_63 = arith.constant 0 : index
    %c0_64 = arith.constant 0 : index
    %131 = vector.load %arg14[%c0_62, %c0_63, %c0_64] : memref<2x1x64xf32, #tpu.memory_space<vmem>>, vector<1x1x64xf32>
    %132 = vector.shape_cast %131 : vector<1x1x64xf32> to vector<1x64xf32>
    %cst_65 = arith.constant dense<0.000000e+00> : vector<16xf32>
    %133 = vector.multi_reduction <add>, %128, %cst_65 [1] : vector<16x64xf32> to vector<16xf32>
    %134 = vector.shape_cast %133 : vector<16xf32> to vector<16x1xf32>
    %cst_66 = arith.constant 6.400000e+01 : f32
    %135 = vector.broadcast %cst_66 : f32 to vector<16x1xf32>
    %136 = arith.divf %134, %135 : vector<16x1xf32>
    %137 = vector.broadcast %136 : vector<16x1xf32> to vector<16x64xf32>
    %138 = arith.subf %128, %137 : vector<16x64xf32>
    %139 = arith.mulf %138, %138 : vector<16x64xf32>
    %cst_67 = arith.constant dense<0.000000e+00> : vector<16xf32>
    %140 = vector.multi_reduction <add>, %139, %cst_67 [1] : vector<16x64xf32> to vector<16xf32>
    %141 = vector.shape_cast %140 : vector<16xf32> to vector<16x1xf32>
    %cst_68 = arith.constant 6.400000e+01 : f32
    %142 = vector.broadcast %cst_68 : f32 to vector<16x1xf32>
    %143 = arith.divf %141, %142 : vector<16x1xf32>
    %cst_69 = arith.constant 9.99999974E-6 : f32
    %144 = vector.broadcast %cst_69 : f32 to vector<16x1xf32>
    %145 = arith.addf %143, %144 : vector<16x1xf32>
    %146 = math.rsqrt %145 : vector<16x1xf32>
    %147 = vector.broadcast %146 : vector<16x1xf32> to vector<16x64xf32>
    %148 = arith.mulf %138, %147 : vector<16x64xf32>
    %149 = vector.broadcast %130 : vector<1x64xf32> to vector<16x64xf32>
    %150 = arith.mulf %148, %149 : vector<16x64xf32>
    %151 = vector.broadcast %132 : vector<1x64xf32> to vector<16x64xf32>
    %152 = arith.addf %150, %151 : vector<16x64xf32>
    %153 = arith.truncf %152 : vector<16x64xf32> to vector<16x64xbf16>
    %c0_70 = arith.constant 0 : index
    %c0_71 = arith.constant 0 : index
    %c0_72 = arith.constant 0 : index
    %154 = vector.load %arg15[%c0_70, %c0_71, %c0_72] : memref<2x64x2048xbf16, #tpu.memory_space<vmem>>, vector<1x64x2048xbf16>
    %155 = vector.shape_cast %154 : vector<1x64x2048xbf16> to vector<64x2048xbf16>
    %cst_73 = arith.constant dense<0.000000e+00> : vector<16x2048xf32>
    %156 = tpu.matmul %153, %155, %cst_73 {dimension_numbers = #tpu.dot_dimension_numbers<[1], [0], [0], [1], [0, 0, 1, 1], [], []>} : vector<16x64xbf16>, vector<64x2048xbf16>, vector<16x2048xf32> -> vector<16x2048xf32>
    %c0_74 = arith.constant 0 : index
    %c0_75 = arith.constant 0 : index
    %c0_76 = arith.constant 0 : index
    %157 = vector.load %arg16[%c0_74, %c0_75, %c0_76] : memref<2x1x2048xf32, #tpu.memory_space<vmem>>, vector<1x1x2048xf32>
    %158 = vector.shape_cast %157 : vector<1x1x2048xf32> to vector<1x2048xf32>
    %159 = vector.broadcast %158 : vector<1x2048xf32> to vector<16x2048xf32>
    %160 = arith.addf %156, %159 : vector<16x2048xf32>
    %cst_77 = arith.constant 0.000000e+00 : f32
    %161 = vector.broadcast %cst_77 : f32 to vector<16x2048xf32>
    %162 = arith.maximumf %160, %161 : vector<16x2048xf32>
    %163 = arith.truncf %162 : vector<16x2048xf32> to vector<16x2048xbf16>
    %c0_78 = arith.constant 0 : index
    %c0_79 = arith.constant 0 : index
    %c0_80 = arith.constant 0 : index
    %164 = vector.load %arg17[%c0_78, %c0_79, %c0_80] : memref<2x2048x64xbf16, #tpu.memory_space<vmem>>, vector<1x2048x64xbf16>
    %165 = vector.shape_cast %164 : vector<1x2048x64xbf16> to vector<2048x64xbf16>
    %cst_81 = arith.constant dense<0.000000e+00> : vector<16x64xf32>
    %166 = tpu.matmul %163, %165, %cst_81 {dimension_numbers = #tpu.dot_dimension_numbers<[1], [0], [0], [1], [0, 0, 1, 1], [], []>} : vector<16x2048xbf16>, vector<2048x64xbf16>, vector<16x64xf32> -> vector<16x64xf32>
    %c0_82 = arith.constant 0 : index
    %c0_83 = arith.constant 0 : index
    %c0_84 = arith.constant 0 : index
    %167 = vector.load %arg18[%c0_82, %c0_83, %c0_84] : memref<2x1x64xf32, #tpu.memory_space<vmem>>, vector<1x1x64xf32>
    %168 = vector.shape_cast %167 : vector<1x1x64xf32> to vector<1x64xf32>
    %169 = vector.broadcast %168 : vector<1x64xf32> to vector<16x64xf32>
    %170 = arith.addf %166, %169 : vector<16x64xf32>
    %171 = arith.addf %152, %170 : vector<16x64xf32>
    %c0_85 = arith.constant 0 : index
    %c0_86 = arith.constant 0 : index
    %c0_87 = arith.constant 0 : index
    %172 = vector.load %arg19[%c0_85, %c0_86, %c0_87] : memref<2x1x64xf32, #tpu.memory_space<vmem>>, vector<1x1x64xf32>
    %173 = vector.shape_cast %172 : vector<1x1x64xf32> to vector<1x64xf32>
    %c0_88 = arith.constant 0 : index
    %c0_89 = arith.constant 0 : index
    %c0_90 = arith.constant 0 : index
    %174 = vector.load %arg20[%c0_88, %c0_89, %c0_90] : memref<2x1x64xf32, #tpu.memory_space<vmem>>, vector<1x1x64xf32>
    %175 = vector.shape_cast %174 : vector<1x1x64xf32> to vector<1x64xf32>
    %cst_91 = arith.constant dense<0.000000e+00> : vector<16xf32>
    %176 = vector.multi_reduction <add>, %171, %cst_91 [1] : vector<16x64xf32> to vector<16xf32>
    %177 = vector.shape_cast %176 : vector<16xf32> to vector<16x1xf32>
    %cst_92 = arith.constant 6.400000e+01 : f32
    %178 = vector.broadcast %cst_92 : f32 to vector<16x1xf32>
    %179 = arith.divf %177, %178 : vector<16x1xf32>
    %180 = vector.broadcast %179 : vector<16x1xf32> to vector<16x64xf32>
    %181 = arith.subf %171, %180 : vector<16x64xf32>
    %182 = arith.mulf %181, %181 : vector<16x64xf32>
    %cst_93 = arith.constant dense<0.000000e+00> : vector<16xf32>
    %183 = vector.multi_reduction <add>, %182, %cst_93 [1] : vector<16x64xf32> to vector<16xf32>
    %184 = vector.shape_cast %183 : vector<16xf32> to vector<16x1xf32>
    %cst_94 = arith.constant 6.400000e+01 : f32
    %185 = vector.broadcast %cst_94 : f32 to vector<16x1xf32>
    %186 = arith.divf %184, %185 : vector<16x1xf32>
    %cst_95 = arith.constant 9.99999974E-6 : f32
    %187 = vector.broadcast %cst_95 : f32 to vector<16x1xf32>
    %188 = arith.addf %186, %187 : vector<16x1xf32>
    %189 = math.rsqrt %188 : vector<16x1xf32>
    %190 = vector.broadcast %189 : vector<16x1xf32> to vector<16x64xf32>
    %191 = arith.mulf %181, %190 : vector<16x64xf32>
    %192 = vector.broadcast %173 : vector<1x64xf32> to vector<16x64xf32>
    %193 = arith.mulf %191, %192 : vector<16x64xf32>
    %194 = vector.broadcast %175 : vector<1x64xf32> to vector<16x64xf32>
    %195 = arith.addf %193, %194 : vector<16x64xf32>
    %c1 = arith.constant 1 : index
    %c0_96 = arith.constant 0 : index
    %c0_97 = arith.constant 0 : index
    %196 = vector.load %arg5[%c1, %c0_96, %c0_97] : memref<2x64x64xf32, #tpu.memory_space<vmem>>, vector<1x64x64xf32>
    %197 = vector.shape_cast %196 : vector<1x64x64xf32> to vector<64x64xf32>
    %cst_98 = arith.constant dense<0.000000e+00> : vector<16x64xf32>
    %198 = tpu.matmul %195, %197, %cst_98 {dimension_numbers = #tpu.dot_dimension_numbers<[1], [0], [0], [1], [0, 0, 1, 1], [], []>} : vector<16x64xf32>, vector<64x64xf32>, vector<16x64xf32> -> vector<16x64xf32>
    %c1_99 = arith.constant 1 : index
    %c0_100 = arith.constant 0 : index
    %c0_101 = arith.constant 0 : index
    %199 = vector.load %arg6[%c1_99, %c0_100, %c0_101] : memref<2x1x64xf32, #tpu.memory_space<vmem>>, vector<1x1x64xf32>
    %200 = vector.shape_cast %199 : vector<1x1x64xf32> to vector<1x64xf32>
    %201 = vector.broadcast %200 : vector<1x64xf32> to vector<16x64xf32>
    %202 = arith.addf %198, %201 : vector<16x64xf32>
    %c1_102 = arith.constant 1 : index
    %c0_103 = arith.constant 0 : index
    %c0_104 = arith.constant 0 : index
    %203 = vector.load %arg7[%c1_102, %c0_103, %c0_104] : memref<2x64x64xf32, #tpu.memory_space<vmem>>, vector<1x64x64xf32>
    %204 = vector.shape_cast %203 : vector<1x64x64xf32> to vector<64x64xf32>
    %cst_105 = arith.constant dense<0.000000e+00> : vector<16x64xf32>
    %205 = tpu.matmul %195, %204, %cst_105 {dimension_numbers = #tpu.dot_dimension_numbers<[1], [0], [0], [1], [0, 0, 1, 1], [], []>} : vector<16x64xf32>, vector<64x64xf32>, vector<16x64xf32> -> vector<16x64xf32>
    %c1_106 = arith.constant 1 : index
    %c0_107 = arith.constant 0 : index
    %c0_108 = arith.constant 0 : index
    %206 = vector.load %arg8[%c1_106, %c0_107, %c0_108] : memref<2x1x64xf32, #tpu.memory_space<vmem>>, vector<1x1x64xf32>
    %207 = vector.shape_cast %206 : vector<1x1x64xf32> to vector<1x64xf32>
    %208 = vector.broadcast %207 : vector<1x64xf32> to vector<16x64xf32>
    %209 = arith.addf %205, %208 : vector<16x64xf32>
    %c1_109 = arith.constant 1 : index
    %c0_110 = arith.constant 0 : index
    %c0_111 = arith.constant 0 : index
    %210 = vector.load %arg9[%c1_109, %c0_110, %c0_111] : memref<2x64x64xf32, #tpu.memory_space<vmem>>, vector<1x64x64xf32>
    %211 = vector.shape_cast %210 : vector<1x64x64xf32> to vector<64x64xf32>
    %cst_112 = arith.constant dense<0.000000e+00> : vector<16x64xf32>
    %212 = tpu.matmul %195, %211, %cst_112 {dimension_numbers = #tpu.dot_dimension_numbers<[1], [0], [0], [1], [0, 0, 1, 1], [], []>} : vector<16x64xf32>, vector<64x64xf32>, vector<16x64xf32> -> vector<16x64xf32>
    %c1_113 = arith.constant 1 : index
    %c0_114 = arith.constant 0 : index
    %c0_115 = arith.constant 0 : index
    %213 = vector.load %arg10[%c1_113, %c0_114, %c0_115] : memref<2x1x64xf32, #tpu.memory_space<vmem>>, vector<1x1x64xf32>
    %214 = vector.shape_cast %213 : vector<1x1x64xf32> to vector<1x64xf32>
    %215 = vector.broadcast %214 : vector<1x64xf32> to vector<16x64xf32>
    %216 = arith.addf %212, %215 : vector<16x64xf32>
    %c1_116 = arith.constant 1 : index
    %c0_117 = arith.constant 0 : index
    %c0_118 = arith.constant 0 : index
    %217 = vector.load %arg11[%c1_116, %c0_117, %c0_118] : memref<2x64x64xf32, #tpu.memory_space<vmem>>, vector<1x64x64xf32>
    %218 = vector.shape_cast %217 : vector<1x64x64xf32> to vector<64x64xf32>
    %c1_119 = arith.constant 1 : index
    %c0_120 = arith.constant 0 : index
    %c0_121 = arith.constant 0 : index
    %219 = vector.load %arg12[%c1_119, %c0_120, %c0_121] : memref<2x1x64xf32, #tpu.memory_space<vmem>>, vector<1x1x64xf32>
    %220 = vector.shape_cast %219 : vector<1x1x64xf32> to vector<1x64xf32>
    %221 = vector.extract_strided_slice %202 {offsets = [0, 0], sizes = [16, 16], strides = [1, 1]} : vector<16x64xf32> to vector<16x16xf32>
    %222 = vector.shape_cast %221 : vector<16x16xf32> to vector<2x8x16xf32>
    %223 = vector.extract_strided_slice %209 {offsets = [0, 0], sizes = [16, 16], strides = [1, 1]} : vector<16x64xf32> to vector<16x16xf32>
    %224 = vector.shape_cast %223 : vector<16x16xf32> to vector<2x8x16xf32>
    %225 = vector.extract_strided_slice %216 {offsets = [0, 0], sizes = [16, 16], strides = [1, 1]} : vector<16x64xf32> to vector<16x16xf32>
    %226 = vector.shape_cast %225 : vector<16x16xf32> to vector<2x8x16xf32>
    "tpu.trace_start"() <{level = 10 : i32, message = "bqd,bkd->bqk"}> : () -> ()
    %cst_122 = arith.constant dense<0.000000e+00> : vector<2x8x8xf32>
    %227 = tpu.matmul %222, %224, %cst_122 {dimension_numbers = #tpu.dot_dimension_numbers<[2], [2], [1], [1], [0, 0, 0, 1, 1, 1], [0], [0]>} : vector<2x8x16xf32>, vector<2x8x16xf32>, vector<2x8x8xf32> -> vector<2x8x8xf32>
    "tpu.trace_stop"() : () -> ()
    %cst_123 = arith.constant 2.500000e-01 : f32
    %228 = vector.broadcast %cst_123 : f32 to vector<2x8x8xf32>
    %229 = arith.mulf %227, %228 : vector<2x8x8xf32>
    %cst_124 = arith.constant dense<0xFF800000> : vector<2x8xf32>
    %230 = vector.multi_reduction <maximumf>, %229, %cst_124 [2] : vector<2x8x8xf32> to vector<2x8xf32>
    %231 = vector.shape_cast %230 : vector<2x8xf32> to vector<2x8x1xf32>
    %232 = vector.broadcast %231 : vector<2x8x1xf32> to vector<2x8x8xf32>
    %233 = arith.subf %229, %232 : vector<2x8x8xf32>
    %234 = math.exp %233 : vector<2x8x8xf32>
    %cst_125 = arith.constant dense<0.000000e+00> : vector<2x8xf32>
    %235 = vector.multi_reduction <add>, %234, %cst_125 [2] : vector<2x8x8xf32> to vector<2x8xf32>
    %236 = vector.shape_cast %235 : vector<2x8xf32> to vector<2x8x1xf32>
    %237 = vector.broadcast %236 : vector<2x8x1xf32> to vector<2x8x8xf32>
    %238 = arith.divf %234, %237 : vector<2x8x8xf32>
    "tpu.trace_start"() <{level = 10 : i32, message = "bqk,bkd->bqd"}> : () -> ()
    %cst_126 = arith.constant dense<0.000000e+00> : vector<2x8x16xf32>
    %239 = tpu.matmul %238, %226, %cst_126 {dimension_numbers = #tpu.dot_dimension_numbers<[2], [1], [1], [2], [0, 0, 0, 1, 1, 2], [0], [0]>} : vector<2x8x8xf32>, vector<2x8x16xf32>, vector<2x8x16xf32> -> vector<2x8x16xf32>
    "tpu.trace_stop"() : () -> ()
    %240 = vector.shape_cast %239 : vector<2x8x16xf32> to vector<16x16xf32>
    %241 = vector.extract_strided_slice %218 {offsets = [0, 0], sizes = [16, 64], strides = [1, 1]} : vector<64x64xf32> to vector<16x64xf32>
    %cst_127 = arith.constant dense<0.000000e+00> : vector<16x64xf32>
    %242 = tpu.matmul %240, %241, %cst_127 {dimension_numbers = #tpu.dot_dimension_numbers<[1], [0], [0], [1], [0, 0, 1, 1], [], []>} : vector<16x16xf32>, vector<16x64xf32>, vector<16x64xf32> -> vector<16x64xf32>
    %243 = vector.broadcast %220 : vector<1x64xf32> to vector<16x64xf32>
    %244 = arith.addf %243, %242 : vector<16x64xf32>
    %245 = vector.extract_strided_slice %202 {offsets = [0, 16], sizes = [16, 16], strides = [1, 1]} : vector<16x64xf32> to vector<16x16xf32>
    %246 = vector.shape_cast %245 : vector<16x16xf32> to vector<2x8x16xf32>
    %247 = vector.extract_strided_slice %209 {offsets = [0, 16], sizes = [16, 16], strides = [1, 1]} : vector<16x64xf32> to vector<16x16xf32>
    %248 = vector.shape_cast %247 : vector<16x16xf32> to vector<2x8x16xf32>
    %249 = vector.extract_strided_slice %216 {offsets = [0, 16], sizes = [16, 16], strides = [1, 1]} : vector<16x64xf32> to vector<16x16xf32>
    %250 = vector.shape_cast %249 : vector<16x16xf32> to vector<2x8x16xf32>
    "tpu.trace_start"() <{level = 10 : i32, message = "bqd,bkd->bqk"}> : () -> ()
    %cst_128 = arith.constant dense<0.000000e+00> : vector<2x8x8xf32>
    %251 = tpu.matmul %246, %248, %cst_128 {dimension_numbers = #tpu.dot_dimension_numbers<[2], [2], [1], [1], [0, 0, 0, 1, 1, 1], [0], [0]>} : vector<2x8x16xf32>, vector<2x8x16xf32>, vector<2x8x8xf32> -> vector<2x8x8xf32>
    "tpu.trace_stop"() : () -> ()
    %cst_129 = arith.constant 2.500000e-01 : f32
    %252 = vector.broadcast %cst_129 : f32 to vector<2x8x8xf32>
    %253 = arith.mulf %251, %252 : vector<2x8x8xf32>
    %cst_130 = arith.constant dense<0xFF800000> : vector<2x8xf32>
    %254 = vector.multi_reduction <maximumf>, %253, %cst_130 [2] : vector<2x8x8xf32> to vector<2x8xf32>
    %255 = vector.shape_cast %254 : vector<2x8xf32> to vector<2x8x1xf32>
    %256 = vector.broadcast %255 : vector<2x8x1xf32> to vector<2x8x8xf32>
    %257 = arith.subf %253, %256 : vector<2x8x8xf32>
    %258 = math.exp %257 : vector<2x8x8xf32>
    %cst_131 = arith.constant dense<0.000000e+00> : vector<2x8xf32>
    %259 = vector.multi_reduction <add>, %258, %cst_131 [2] : vector<2x8x8xf32> to vector<2x8xf32>
    %260 = vector.shape_cast %259 : vector<2x8xf32> to vector<2x8x1xf32>
    %261 = vector.broadcast %260 : vector<2x8x1xf32> to vector<2x8x8xf32>
    %262 = arith.divf %258, %261 : vector<2x8x8xf32>
    "tpu.trace_start"() <{level = 10 : i32, message = "bqk,bkd->bqd"}> : () -> ()
    %cst_132 = arith.constant dense<0.000000e+00> : vector<2x8x16xf32>
    %263 = tpu.matmul %262, %250, %cst_132 {dimension_numbers = #tpu.dot_dimension_numbers<[2], [1], [1], [2], [0, 0, 0, 1, 1, 2], [0], [0]>} : vector<2x8x8xf32>, vector<2x8x16xf32>, vector<2x8x16xf32> -> vector<2x8x16xf32>
    "tpu.trace_stop"() : () -> ()
    %264 = vector.shape_cast %263 : vector<2x8x16xf32> to vector<16x16xf32>
    %265 = vector.extract_strided_slice %218 {offsets = [16, 0], sizes = [16, 64], strides = [1, 1]} : vector<64x64xf32> to vector<16x64xf32>
    %cst_133 = arith.constant dense<0.000000e+00> : vector<16x64xf32>
    %266 = tpu.matmul %264, %265, %cst_133 {dimension_numbers = #tpu.dot_dimension_numbers<[1], [0], [0], [1], [0, 0, 1, 1], [], []>} : vector<16x16xf32>, vector<16x64xf32>, vector<16x64xf32> -> vector<16x64xf32>
    %267 = arith.addf %244, %266 : vector<16x64xf32>
    %268 = vector.extract_strided_slice %202 {offsets = [0, 32], sizes = [16, 16], strides = [1, 1]} : vector<16x64xf32> to vector<16x16xf32>
    %269 = vector.shape_cast %268 : vector<16x16xf32> to vector<2x8x16xf32>
    %270 = vector.extract_strided_slice %209 {offsets = [0, 32], sizes = [16, 16], strides = [1, 1]} : vector<16x64xf32> to vector<16x16xf32>
    %271 = vector.shape_cast %270 : vector<16x16xf32> to vector<2x8x16xf32>
    %272 = vector.extract_strided_slice %216 {offsets = [0, 32], sizes = [16, 16], strides = [1, 1]} : vector<16x64xf32> to vector<16x16xf32>
    %273 = vector.shape_cast %272 : vector<16x16xf32> to vector<2x8x16xf32>
    "tpu.trace_start"() <{level = 10 : i32, message = "bqd,bkd->bqk"}> : () -> ()
    %cst_134 = arith.constant dense<0.000000e+00> : vector<2x8x8xf32>
    %274 = tpu.matmul %269, %271, %cst_134 {dimension_numbers = #tpu.dot_dimension_numbers<[2], [2], [1], [1], [0, 0, 0, 1, 1, 1], [0], [0]>} : vector<2x8x16xf32>, vector<2x8x16xf32>, vector<2x8x8xf32> -> vector<2x8x8xf32>
    "tpu.trace_stop"() : () -> ()
    %cst_135 = arith.constant 2.500000e-01 : f32
    %275 = vector.broadcast %cst_135 : f32 to vector<2x8x8xf32>
    %276 = arith.mulf %274, %275 : vector<2x8x8xf32>
    %cst_136 = arith.constant dense<0xFF800000> : vector<2x8xf32>
    %277 = vector.multi_reduction <maximumf>, %276, %cst_136 [2] : vector<2x8x8xf32> to vector<2x8xf32>
    %278 = vector.shape_cast %277 : vector<2x8xf32> to vector<2x8x1xf32>
    %279 = vector.broadcast %278 : vector<2x8x1xf32> to vector<2x8x8xf32>
    %280 = arith.subf %276, %279 : vector<2x8x8xf32>
    %281 = math.exp %280 : vector<2x8x8xf32>
    %cst_137 = arith.constant dense<0.000000e+00> : vector<2x8xf32>
    %282 = vector.multi_reduction <add>, %281, %cst_137 [2] : vector<2x8x8xf32> to vector<2x8xf32>
    %283 = vector.shape_cast %282 : vector<2x8xf32> to vector<2x8x1xf32>
    %284 = vector.broadcast %283 : vector<2x8x1xf32> to vector<2x8x8xf32>
    %285 = arith.divf %281, %284 : vector<2x8x8xf32>
    "tpu.trace_start"() <{level = 10 : i32, message = "bqk,bkd->bqd"}> : () -> ()
    %cst_138 = arith.constant dense<0.000000e+00> : vector<2x8x16xf32>
    %286 = tpu.matmul %285, %273, %cst_138 {dimension_numbers = #tpu.dot_dimension_numbers<[2], [1], [1], [2], [0, 0, 0, 1, 1, 2], [0], [0]>} : vector<2x8x8xf32>, vector<2x8x16xf32>, vector<2x8x16xf32> -> vector<2x8x16xf32>
    "tpu.trace_stop"() : () -> ()
    %287 = vector.shape_cast %286 : vector<2x8x16xf32> to vector<16x16xf32>
    %288 = vector.extract_strided_slice %218 {offsets = [32, 0], sizes = [16, 64], strides = [1, 1]} : vector<64x64xf32> to vector<16x64xf32>
    %cst_139 = arith.constant dense<0.000000e+00> : vector<16x64xf32>
    %289 = tpu.matmul %287, %288, %cst_139 {dimension_numbers = #tpu.dot_dimension_numbers<[1], [0], [0], [1], [0, 0, 1, 1], [], []>} : vector<16x16xf32>, vector<16x64xf32>, vector<16x64xf32> -> vector<16x64xf32>
    %290 = arith.addf %267, %289 : vector<16x64xf32>
    %291 = vector.extract_strided_slice %202 {offsets = [0, 48], sizes = [16, 16], strides = [1, 1]} : vector<16x64xf32> to vector<16x16xf32>
    %292 = vector.shape_cast %291 : vector<16x16xf32> to vector<2x8x16xf32>
    %293 = vector.extract_strided_slice %209 {offsets = [0, 48], sizes = [16, 16], strides = [1, 1]} : vector<16x64xf32> to vector<16x16xf32>
    %294 = vector.shape_cast %293 : vector<16x16xf32> to vector<2x8x16xf32>
    %295 = vector.extract_strided_slice %216 {offsets = [0, 48], sizes = [16, 16], strides = [1, 1]} : vector<16x64xf32> to vector<16x16xf32>
    %296 = vector.shape_cast %295 : vector<16x16xf32> to vector<2x8x16xf32>
    "tpu.trace_start"() <{level = 10 : i32, message = "bqd,bkd->bqk"}> : () -> ()
    %cst_140 = arith.constant dense<0.000000e+00> : vector<2x8x8xf32>
    %297 = tpu.matmul %292, %294, %cst_140 {dimension_numbers = #tpu.dot_dimension_numbers<[2], [2], [1], [1], [0, 0, 0, 1, 1, 1], [0], [0]>} : vector<2x8x16xf32>, vector<2x8x16xf32>, vector<2x8x8xf32> -> vector<2x8x8xf32>
    "tpu.trace_stop"() : () -> ()
    %cst_141 = arith.constant 2.500000e-01 : f32
    %298 = vector.broadcast %cst_141 : f32 to vector<2x8x8xf32>
    %299 = arith.mulf %297, %298 : vector<2x8x8xf32>
    %cst_142 = arith.constant dense<0xFF800000> : vector<2x8xf32>
    %300 = vector.multi_reduction <maximumf>, %299, %cst_142 [2] : vector<2x8x8xf32> to vector<2x8xf32>
    %301 = vector.shape_cast %300 : vector<2x8xf32> to vector<2x8x1xf32>
    %302 = vector.broadcast %301 : vector<2x8x1xf32> to vector<2x8x8xf32>
    %303 = arith.subf %299, %302 : vector<2x8x8xf32>
    %304 = math.exp %303 : vector<2x8x8xf32>
    %cst_143 = arith.constant dense<0.000000e+00> : vector<2x8xf32>
    %305 = vector.multi_reduction <add>, %304, %cst_143 [2] : vector<2x8x8xf32> to vector<2x8xf32>
    %306 = vector.shape_cast %305 : vector<2x8xf32> to vector<2x8x1xf32>
    %307 = vector.broadcast %306 : vector<2x8x1xf32> to vector<2x8x8xf32>
    %308 = arith.divf %304, %307 : vector<2x8x8xf32>
    "tpu.trace_start"() <{level = 10 : i32, message = "bqk,bkd->bqd"}> : () -> ()
    %cst_144 = arith.constant dense<0.000000e+00> : vector<2x8x16xf32>
    %309 = tpu.matmul %308, %296, %cst_144 {dimension_numbers = #tpu.dot_dimension_numbers<[2], [1], [1], [2], [0, 0, 0, 1, 1, 2], [0], [0]>} : vector<2x8x8xf32>, vector<2x8x16xf32>, vector<2x8x16xf32> -> vector<2x8x16xf32>
    "tpu.trace_stop"() : () -> ()
    %310 = vector.shape_cast %309 : vector<2x8x16xf32> to vector<16x16xf32>
    %311 = vector.extract_strided_slice %218 {offsets = [48, 0], sizes = [16, 64], strides = [1, 1]} : vector<64x64xf32> to vector<16x64xf32>
    %cst_145 = arith.constant dense<0.000000e+00> : vector<16x64xf32>
    %312 = tpu.matmul %310, %311, %cst_145 {dimension_numbers = #tpu.dot_dimension_numbers<[1], [0], [0], [1], [0, 0, 1, 1], [], []>} : vector<16x16xf32>, vector<16x64xf32>, vector<16x64xf32> -> vector<16x64xf32>
    %313 = arith.addf %290, %312 : vector<16x64xf32>
    %314 = arith.addf %195, %313 : vector<16x64xf32>
    %c1_146 = arith.constant 1 : index
    %c0_147 = arith.constant 0 : index
    %c0_148 = arith.constant 0 : index
    %315 = vector.load %arg13[%c1_146, %c0_147, %c0_148] : memref<2x1x64xf32, #tpu.memory_space<vmem>>, vector<1x1x64xf32>
    %316 = vector.shape_cast %315 : vector<1x1x64xf32> to vector<1x64xf32>
    %c1_149 = arith.constant 1 : index
    %c0_150 = arith.constant 0 : index
    %c0_151 = arith.constant 0 : index
    %317 = vector.load %arg14[%c1_149, %c0_150, %c0_151] : memref<2x1x64xf32, #tpu.memory_space<vmem>>, vector<1x1x64xf32>
    %318 = vector.shape_cast %317 : vector<1x1x64xf32> to vector<1x64xf32>
    %cst_152 = arith.constant dense<0.000000e+00> : vector<16xf32>
    %319 = vector.multi_reduction <add>, %314, %cst_152 [1] : vector<16x64xf32> to vector<16xf32>
    %320 = vector.shape_cast %319 : vector<16xf32> to vector<16x1xf32>
    %cst_153 = arith.constant 6.400000e+01 : f32
    %321 = vector.broadcast %cst_153 : f32 to vector<16x1xf32>
    %322 = arith.divf %320, %321 : vector<16x1xf32>
    %323 = vector.broadcast %322 : vector<16x1xf32> to vector<16x64xf32>
    %324 = arith.subf %314, %323 : vector<16x64xf32>
    %325 = arith.mulf %324, %324 : vector<16x64xf32>
    %cst_154 = arith.constant dense<0.000000e+00> : vector<16xf32>
    %326 = vector.multi_reduction <add>, %325, %cst_154 [1] : vector<16x64xf32> to vector<16xf32>
    %327 = vector.shape_cast %326 : vector<16xf32> to vector<16x1xf32>
    %cst_155 = arith.constant 6.400000e+01 : f32
    %328 = vector.broadcast %cst_155 : f32 to vector<16x1xf32>
    %329 = arith.divf %327, %328 : vector<16x1xf32>
    %cst_156 = arith.constant 9.99999974E-6 : f32
    %330 = vector.broadcast %cst_156 : f32 to vector<16x1xf32>
    %331 = arith.addf %329, %330 : vector<16x1xf32>
    %332 = math.rsqrt %331 : vector<16x1xf32>
    %333 = vector.broadcast %332 : vector<16x1xf32> to vector<16x64xf32>
    %334 = arith.mulf %324, %333 : vector<16x64xf32>
    %335 = vector.broadcast %316 : vector<1x64xf32> to vector<16x64xf32>
    %336 = arith.mulf %334, %335 : vector<16x64xf32>
    %337 = vector.broadcast %318 : vector<1x64xf32> to vector<16x64xf32>
    %338 = arith.addf %336, %337 : vector<16x64xf32>
    %339 = arith.truncf %338 : vector<16x64xf32> to vector<16x64xbf16>
    %c1_157 = arith.constant 1 : index
    %c0_158 = arith.constant 0 : index
    %c0_159 = arith.constant 0 : index
    %340 = vector.load %arg15[%c1_157, %c0_158, %c0_159] : memref<2x64x2048xbf16, #tpu.memory_space<vmem>>, vector<1x64x2048xbf16>
    %341 = vector.shape_cast %340 : vector<1x64x2048xbf16> to vector<64x2048xbf16>
    %cst_160 = arith.constant dense<0.000000e+00> : vector<16x2048xf32>
    %342 = tpu.matmul %339, %341, %cst_160 {dimension_numbers = #tpu.dot_dimension_numbers<[1], [0], [0], [1], [0, 0, 1, 1], [], []>} : vector<16x64xbf16>, vector<64x2048xbf16>, vector<16x2048xf32> -> vector<16x2048xf32>
    %c1_161 = arith.constant 1 : index
    %c0_162 = arith.constant 0 : index
    %c0_163 = arith.constant 0 : index
    %343 = vector.load %arg16[%c1_161, %c0_162, %c0_163] : memref<2x1x2048xf32, #tpu.memory_space<vmem>>, vector<1x1x2048xf32>
    %344 = vector.shape_cast %343 : vector<1x1x2048xf32> to vector<1x2048xf32>
    %345 = vector.broadcast %344 : vector<1x2048xf32> to vector<16x2048xf32>
    %346 = arith.addf %342, %345 : vector<16x2048xf32>
    %cst_164 = arith.constant 0.000000e+00 : f32
    %347 = vector.broadcast %cst_164 : f32 to vector<16x2048xf32>
    %348 = arith.maximumf %346, %347 : vector<16x2048xf32>
    %349 = arith.truncf %348 : vector<16x2048xf32> to vector<16x2048xbf16>
    %c1_165 = arith.constant 1 : index
    %c0_166 = arith.constant 0 : index
    %c0_167 = arith.constant 0 : index
    %350 = vector.load %arg17[%c1_165, %c0_166, %c0_167] : memref<2x2048x64xbf16, #tpu.memory_space<vmem>>, vector<1x2048x64xbf16>
    %351 = vector.shape_cast %350 : vector<1x2048x64xbf16> to vector<2048x64xbf16>
    %cst_168 = arith.constant dense<0.000000e+00> : vector<16x64xf32>
    %352 = tpu.matmul %349, %351, %cst_168 {dimension_numbers = #tpu.dot_dimension_numbers<[1], [0], [0], [1], [0, 0, 1, 1], [], []>} : vector<16x2048xbf16>, vector<2048x64xbf16>, vector<16x64xf32> -> vector<16x64xf32>
    %c1_169 = arith.constant 1 : index
    %c0_170 = arith.constant 0 : index
    %c0_171 = arith.constant 0 : index
    %353 = vector.load %arg18[%c1_169, %c0_170, %c0_171] : memref<2x1x64xf32, #tpu.memory_space<vmem>>, vector<1x1x64xf32>
    %354 = vector.shape_cast %353 : vector<1x1x64xf32> to vector<1x64xf32>
    %355 = vector.broadcast %354 : vector<1x64xf32> to vector<16x64xf32>
    %356 = arith.addf %352, %355 : vector<16x64xf32>
    %357 = arith.addf %338, %356 : vector<16x64xf32>
    %c1_172 = arith.constant 1 : index
    %c0_173 = arith.constant 0 : index
    %c0_174 = arith.constant 0 : index
    %358 = vector.load %arg19[%c1_172, %c0_173, %c0_174] : memref<2x1x64xf32, #tpu.memory_space<vmem>>, vector<1x1x64xf32>
    %359 = vector.shape_cast %358 : vector<1x1x64xf32> to vector<1x64xf32>
    %c1_175 = arith.constant 1 : index
    %c0_176 = arith.constant 0 : index
    %c0_177 = arith.constant 0 : index
    %360 = vector.load %arg20[%c1_175, %c0_176, %c0_177] : memref<2x1x64xf32, #tpu.memory_space<vmem>>, vector<1x1x64xf32>
    %361 = vector.shape_cast %360 : vector<1x1x64xf32> to vector<1x64xf32>
    %cst_178 = arith.constant dense<0.000000e+00> : vector<16xf32>
    %362 = vector.multi_reduction <add>, %357, %cst_178 [1] : vector<16x64xf32> to vector<16xf32>
    %363 = vector.shape_cast %362 : vector<16xf32> to vector<16x1xf32>
    %cst_179 = arith.constant 6.400000e+01 : f32
    %364 = vector.broadcast %cst_179 : f32 to vector<16x1xf32>
    %365 = arith.divf %363, %364 : vector<16x1xf32>
    %366 = vector.broadcast %365 : vector<16x1xf32> to vector<16x64xf32>
    %367 = arith.subf %357, %366 : vector<16x64xf32>
    %368 = arith.mulf %367, %367 : vector<16x64xf32>
    %cst_180 = arith.constant dense<0.000000e+00> : vector<16xf32>
    %369 = vector.multi_reduction <add>, %368, %cst_180 [1] : vector<16x64xf32> to vector<16xf32>
    %370 = vector.shape_cast %369 : vector<16xf32> to vector<16x1xf32>
    %cst_181 = arith.constant 6.400000e+01 : f32
    %371 = vector.broadcast %cst_181 : f32 to vector<16x1xf32>
    %372 = arith.divf %370, %371 : vector<16x1xf32>
    %cst_182 = arith.constant 9.99999974E-6 : f32
    %373 = vector.broadcast %cst_182 : f32 to vector<16x1xf32>
    %374 = arith.addf %372, %373 : vector<16x1xf32>
    %375 = math.rsqrt %374 : vector<16x1xf32>
    %376 = vector.broadcast %375 : vector<16x1xf32> to vector<16x64xf32>
    %377 = arith.mulf %367, %376 : vector<16x64xf32>
    %378 = vector.broadcast %359 : vector<1x64xf32> to vector<16x64xf32>
    %379 = arith.mulf %377, %378 : vector<16x64xf32>
    %380 = vector.broadcast %361 : vector<1x64xf32> to vector<16x64xf32>
    %381 = arith.addf %379, %380 : vector<16x64xf32>
    %c0_183 = arith.constant 0 : index
    %c0_184 = arith.constant 0 : index
    %382 = vector.load %arg21[%c0_183, %c0_184] : memref<64x4xf32, #tpu.memory_space<vmem>>, vector<64x4xf32>
    %cst_185 = arith.constant dense<0.000000e+00> : vector<16x4xf32>
    %383 = tpu.matmul %381, %382, %cst_185 {dimension_numbers = #tpu.dot_dimension_numbers<[1], [0], [0], [1], [0, 0, 1, 1], [], []>} : vector<16x64xf32>, vector<64x4xf32>, vector<16x4xf32> -> vector<16x4xf32>
    %c0_186 = arith.constant 0 : index
    %c0_187 = arith.constant 0 : index
    %384 = vector.load %arg22[%c0_186, %c0_187] : memref<1x4xf32, #tpu.memory_space<vmem>>, vector<1x4xf32>
    %385 = vector.broadcast %384 : vector<1x4xf32> to vector<16x4xf32>
    %386 = arith.addf %383, %385 : vector<16x4xf32>
    %cst_188 = arith.constant dense<0xFF800000> : vector<16xf32>
    %387 = vector.multi_reduction <maximumf>, %386, %cst_188 [1] : vector<16x4xf32> to vector<16xf32>
    %388 = vector.shape_cast %387 : vector<16xf32> to vector<16x1xf32>
    %389 = vector.broadcast %388 : vector<16x1xf32> to vector<16x4xf32>
    %390 = arith.subf %386, %389 : vector<16x4xf32>
    %391 = math.exp %390 : vector<16x4xf32>
    %cst_189 = arith.constant dense<0.000000e+00> : vector<16xf32>
    %392 = vector.multi_reduction <add>, %391, %cst_189 [1] : vector<16x4xf32> to vector<16xf32>
    %393 = vector.shape_cast %392 : vector<16xf32> to vector<16x1xf32>
    %394 = vector.broadcast %393 : vector<16x1xf32> to vector<16x4xf32>
    %395 = arith.divf %391, %394 : vector<16x4xf32>
    %c0_190 = arith.constant 0 : index
    %c0_191 = arith.constant 0 : index
    %396 = vector.load %arg23[%c0_190, %c0_191] : memref<16x4xf32, #tpu.memory_space<vmem>>, vector<16x4xf32>
    tpu.vector_store %arg23[%c0_190, %c0_191], %395 {strides = array<i32>} : memref<16x4xf32, #tpu.memory_space<vmem>>, vector<16x4xf32>,
    return
  }
  func.func @transform_0(%arg0: i32) -> (i32, i32) {
    %c0_i32 = arith.constant 0 : i32
    %c0_i32_0 = arith.constant 0 : i32
    %c0_i32_1 = arith.constant 0 : i32
    return %c0_i32, %c0_i32_0 : i32, i32
  }
  func.func @transform_1(%arg0: i32) -> (i32, i32) {
    %c0_i32 = arith.constant 0 : i32
    %c0_i32_0 = arith.constant 0 : i32
    %c0_i32_1 = arith.constant 0 : i32
    return %c0_i32, %c0_i32_0 : i32, i32
  }
  func.func @transform_2(%arg0: i32) -> (i32, i32) {
    %c0_i32 = arith.constant 0 : i32
    %c0_i32_0 = arith.constant 0 : i32
    %c0_i32_1 = arith.constant 0 : i32
    return %c0_i32, %c0_i32_0 : i32, i32
  }
  func.func @transform_3(%arg0: i32) -> (i32, i32) {
    %c0_i32 = arith.constant 0 : i32
    %c0_i32_0 = arith.constant 0 : i32
    %c0_i32_1 = arith.constant 0 : i32
    return %c0_i32, %c0_i32_0 : i32, i32
  }
  func.func @transform_4(%arg0: i32) -> (i32, i32, i32) {
    %c0_i32 = arith.constant 0 : i32
    %c0_i32_0 = arith.constant 0 : i32
    %c0_i32_1 = arith.constant 0 : i32
    %c0_i32_2 = arith.constant 0 : i32
    return %c0_i32, %c0_i32_0, %c0_i32_1 : i32, i32, i32
  }
  func.func @transform_5(%arg0: i32) -> (i32, i32, i32) {
    %c0_i32 = arith.constant 0 : i32
    %c0_i32_0 = arith.constant 0 : i32
    %c0_i32_1 = arith.constant 0 : i32
    %c0_i32_2 = arith.constant 0 : i32
    return %c0_i32, %c0_i32_0, %c0_i32_1 : i32, i32, i32
  }
  func.func @transform_6(%arg0: i32) -> (i32, i32, i32) {
    %c0_i32 = arith.constant 0 : i32
    %c0_i32_0 = arith.constant 0 : i32
    %c0_i32_1 = arith.constant 0 : i32
    %c0_i32_2 = arith.constant 0 : i32
    return %c0_i32, %c0_i32_0, %c0_i32_1 : i32, i32, i32
  }
  func.func @transform_7(%arg0: i32) -> (i32, i32, i32) {
    %c0_i32 = arith.constant 0 : i32
    %c0_i32_0 = arith.constant 0 : i32
    %c0_i32_1 = arith.constant 0 : i32
    %c0_i32_2 = arith.constant 0 : i32
    return %c0_i32, %c0_i32_0, %c0_i32_1 : i32, i32, i32
  }
  func.func @transform_8(%arg0: i32) -> (i32, i32, i32) {
    %c0_i32 = arith.constant 0 : i32
    %c0_i32_0 = arith.constant 0 : i32
    %c0_i32_1 = arith.constant 0 : i32
    %c0_i32_2 = arith.constant 0 : i32
    return %c0_i32, %c0_i32_0, %c0_i32_1 : i32, i32, i32
  }
  func.func @transform_9(%arg0: i32) -> (i32, i32, i32) {
    %c0_i32 = arith.constant 0 : i32
    %c0_i32_0 = arith.constant 0 : i32
    %c0_i32_1 = arith.constant 0 : i32
    %c0_i32_2 = arith.constant 0 : i32
    return %c0_i32, %c0_i32_0, %c0_i32_1 : i32, i32, i32
  }
  func.func @transform_10(%arg0: i32) -> (i32, i32, i32) {
    %c0_i32 = arith.constant 0 : i32
    %c0_i32_0 = arith.constant 0 : i32
    %c0_i32_1 = arith.constant 0 : i32
    %c0_i32_2 = arith.constant 0 : i32
    return %c0_i32, %c0_i32_0, %c0_i32_1 : i32, i32, i32
  }
  func.func @transform_11(%arg0: i32) -> (i32, i32, i32) {
    %c0_i32 = arith.constant 0 : i32
    %c0_i32_0 = arith.constant 0 : i32
    %c0_i32_1 = arith.constant 0 : i32
    %c0_i32_2 = arith.constant 0 : i32
    return %c0_i32, %c0_i32_0, %c0_i32_1 : i32, i32, i32
  }
  func.func @transform_12(%arg0: i32) -> (i32, i32, i32) {
    %c0_i32 = arith.constant 0 : i32
    %c0_i32_0 = arith.constant 0 : i32
    %c0_i32_1 = arith.constant 0 : i32
    %c0_i32_2 = arith.constant 0 : i32
    return %c0_i32, %c0_i32_0, %c0_i32_1 : i32, i32, i32
  }
  func.func @transform_13(%arg0: i32) -> (i32, i32, i32) {
    %c0_i32 = arith.constant 0 : i32
    %c0_i32_0 = arith.constant 0 : i32
    %c0_i32_1 = arith.constant 0 : i32
    %c0_i32_2 = arith.constant 0 : i32
    return %c0_i32, %c0_i32_0, %c0_i32_1 : i32, i32, i32
  }
  func.func @transform_14(%arg0: i32) -> (i32, i32, i32) {
    %c0_i32 = arith.constant 0 : i32
    %c0_i32_0 = arith.constant 0 : i32
    %c0_i32_1 = arith.constant 0 : i32
    %c0_i32_2 = arith.constant 0 : i32
    return %c0_i32, %c0_i32_0, %c0_i32_1 : i32, i32, i32
  }
  func.func @transform_15(%arg0: i32) -> (i32, i32, i32) {
    %c0_i32 = arith.constant 0 : i32
    %c0_i32_0 = arith.constant 0 : i32
    %c0_i32_1 = arith.constant 0 : i32
    %c0_i32_2 = arith.constant 0 : i32
    return %c0_i32, %c0_i32_0, %c0_i32_1 : i32, i32, i32
  }
  func.func @transform_16(%arg0: i32) -> (i32, i32, i32) {
    %c0_i32 = arith.constant 0 : i32
    %c0_i32_0 = arith.constant 0 : i32
    %c0_i32_1 = arith.constant 0 : i32
    %c0_i32_2 = arith.constant 0 : i32
    return %c0_i32, %c0_i32_0, %c0_i32_1 : i32, i32, i32
  }
  func.func @transform_17(%arg0: i32) -> (i32, i32, i32) {
    %c0_i32 = arith.constant 0 : i32
    %c0_i32_0 = arith.constant 0 : i32
    %c0_i32_1 = arith.constant 0 : i32
    %c0_i32_2 = arith.constant 0 : i32
    return %c0_i32, %c0_i32_0, %c0_i32_1 : i32, i32, i32
  }
  func.func @transform_18(%arg0: i32) -> (i32, i32, i32) {
    %c0_i32 = arith.constant 0 : i32
    %c0_i32_0 = arith.constant 0 : i32
    %c0_i32_1 = arith.constant 0 : i32
    %c0_i32_2 = arith.constant 0 : i32
    return %c0_i32, %c0_i32_0, %c0_i32_1 : i32, i32, i32
  }
  func.func @transform_19(%arg0: i32) -> (i32, i32, i32) {
    %c0_i32 = arith.constant 0 : i32
    %c0_i32_0 = arith.constant 0 : i32
    %c0_i32_1 = arith.constant 0 : i32
    %c0_i32_2 = arith.constant 0 : i32
    return %c0_i32, %c0_i32_0, %c0_i32_1 : i32, i32, i32
  }
  func.func @transform_20(%arg0: i32) -> (i32, i32) {
    %c0_i32 = arith.constant 0 : i32
    %c0_i32_0 = arith.constant 0 : i32
    %c0_i32_1 = arith.constant 0 : i32
    return %c0_i32, %c0_i32_0 : i32, i32
  }
  func.func @transform_21(%arg0: i32) -> (i32, i32) {
    %c0_i32 = arith.constant 0 : i32
    %c0_i32_0 = arith.constant 0 : i32
    %c0_i32_1 = arith.constant 0 : i32
    return %c0_i32, %c0_i32_0 : i32, i32
  }
  func.func @transform_22(%arg0: i32) -> (i32, i32) {
    %c0_i32 = arith.constant 0 : i32
    %c0_i32_0 = arith.constant 0 : i32
    %c0_i32_1 = arith.constant 0 : i32
    return %c0_i32, %c0_i32_0 : i32, i32
  }
}

</mosaic_0001>

<bundles_post_ra>
// kernel: tpu_custom_call.1
= control target key start
LH: loop header
LB: loop body
LE: loop exit
PB: predicated region body
PF: predicated region fallthrough
CT: control target
= control target key end

     0   :  { %vm83_vm0 = vcmask 130048   ;;  %vm186_vm1 = vcmask 523264   ;;  %v10922_v39 = vmov 0.0   ;;  %vm10923_vm2 = vmmov 0   ;;  %s10924_s25 = smov 112   ;;  %s13149_s2 = inlined_call_operand.vmem [shape: f32[16,64], index: 2, kind: input, shape index: {}]   ;;  %s13150_s0 = inlined_call_operand.vmem [shape: f32[16,16], index: 0, kind: input, shape index: {}]   ;;  %s13151_s4 = inlined_call_operand.vmem [shape: f32[2,64,64], index: 4, kind: input, shape index: {}]   ;;  %s13152_s6 = inlined_call_operand.vmem [shape: f32[2,64,64], index: 6, kind: input, shape index: {}]   ;;  %s13153_s8 = inlined_call_operand.vmem [shape: f32[2,64,64], index: 8, kind: input, shape index: {}]   ;;  %s13154_s3 = inlined_call_operand.vmem [shape: f32[1,64], index: 3, kind: input, shape index: {}]   ;;  %s13155_s1 = inlined_call_operand.vmem [shape: f32[16,64], index: 1, kind: input, shape index: {}]   ;;  %s13156_s7 = inlined_call_operand.vmem [shape: f32[2,1,64], index: 7, kind: input, shape index: {}]   ;;  %s13157_s5 = inlined_call_operand.vmem [shape: f32[2,1,64], index: 5, kind: input, shape index: {}]   ;;  %s13158_s9 = inlined_call_operand.vmem [shape: f32[2,1,64], index: 9, kind: input, shape index: {}]   ;;  %s13159_s10 = inlined_call_operand.vmem [shape: f32[2,64,64], index: 10, kind: input, shape index: {}]   ;;  %s13160_s11 = inlined_call_operand.vmem [shape: f32[2,1,64], index: 11, kind: input, shape index: {}]   ;;  %s13161_s14 = inlined_call_operand.vmem [shape: bf16[2,64,2048], index: 14, kind: input, shape index: {}]   ;;  %s13162_s16 = inlined_call_operand.vmem [shape: bf16[2,2048,64], index: 16, kind: input, shape index: {}]   ;;  %s13163_s12 = inlined_call_operand.vmem [shape: f32[2,1,64], index: 12, kind: input, shape index: {}]   ;;  %s13164_s13 = inlined_call_operand.vmem [shape: f32[2,1,64], index: 13, kind: input, shape index: {}]   ;;  %s13165_s15 = inlined_call_operand.vmem [shape: f32[2,1,2048], index: 15, kind: input, shape index: {}]   ;;  %s13166_s17 = inlined_call_operand.vmem [shape: f32[2,1,64], index: 17, kind: input, shape index: {}]   ;;  %s13167_s18 = inlined_call_operand.vmem [shape: f32[2,1,64], index: 18, kind: input, shape index: {}]   ;;  %s13168_s19 = inlined_call_operand.vmem [shape: f32[2,1,64], index: 19, kind: input, shape index: {}]   ;;  %s13169_s20 = inlined_call_operand.vmem [shape: f32[64,4], index: 20, kind: input, shape index: {}]   ;;  %s13170_s21 = inlined_call_operand.vmem [shape: f32[1,4], index: 21, kind: input, shape index: {}]   ;;  %s13171_s22 = inlined_call_operand.vmem [shape: f32[16,4], index: 22, kind: output, shape index: {}]  }
   0x1   :  { %13180 = sst [smem:[#allocation2_spill]] %s13149_s2  ;;  %v8837_v42 = vld [vmem:[%s13156_s7] ss:$0 sm:$0xff]  ;;  %vm611_vm3 = vcmask 64512   ;;  %vm8802_vm4 = vcmask 31744  }
   0x2   :  { %13181 = sst [smem:[#allocation3_spill]] %s13150_s0  ;;  %v8834_v46 = vld [vmem:[%s13157_s5] ss:$0 sm:$0xff] }
   0x3   :  { %13182 = sst [smem:[#allocation4_spill]] %s13151_s4  ;;  %v8840_v50 = vld [vmem:[%s13158_s9] ss:$0 sm:$0xff] }
   0x4   :  { %13183 = sst [smem:[#allocation5_spill]] %s13152_s6 }
   0x5   :  { %13184 = sst [smem:[#allocation6_spill]] %s13153_s8 }
   0x6   :  { %13185 = sst [smem:[#allocation7_spill]] %s13154_s3 }
   0x7   :  { %13186 = sst [smem:[#allocation8_spill]] %s13155_s1 }
   0x8   :  { %s13187_s29 = sld [smem:[#allocation2_spill]] }
   0x9   :  { %s13188_s0 = sld [smem:[#allocation3_spill]] }
   0xa   :  { %s13189_s1 = sld [smem:[#allocation4_spill]] }
   0xb   :  { %s13190_s6 = sld [smem:[#allocation5_spill]] }
   0xc   :  { %s13191_s2 = sld [smem:[#allocation6_spill]] }
   0xd   :  { %s13192_s3 = sld [smem:[#allocation7_spill]] }
   0xe   :  { %v75_v0 = vld [vmem:[%s13187_s29 + $0x8] sm:$0xff]  ;;  %v74_v1 = vld [vmem:[%s13187_s29] sm:$0xff]  ;;  %s13193_s26 = sld [smem:[#allocation8_spill]]  ;;  %s10925_s29 = smov 96  }
   0xf   :  { %v72_v2 = vld [vmem:[%s13188_s0] sm:$0xff]  ;;  %10216 = vmatprep.subr.mxu0 %v75_v0  ;;  %v73_v4 = vld [vmem:[%s13188_s0 + $0x8] sm:$0xff] }
  0x10   :  { %10220 = vmatprep.mubr.msk.f32.mxu0 %vm83_vm0, %v72_v2  ;;  %v178_v3 = vld [vmem:[%s13189_s1 + $0x38] sm:$0xff]  ;;  %10217 = vmatpush3.msra.mxu0 %v75_v0  ;;  %v177_v6 = vld [vmem:[%s13189_s1 + $0x30] sm:$0xff]  ;;  %v176_v8 = vld [vmem:[%s13189_s1 + $0x28] sm:$0xff] }
  0x11   :  { %10223 = vmatprep.subr.mxu1 %v178_v3  ;;  %v275_v5 = vld [vmem:[%s13190_s6 + $0x38] sm:$0xff]  ;;  %10218 = vmatprep.subr.mxu0 %v74_v1  ;;  %v274_v7 = vld [vmem:[%s13190_s6 + $0x30] sm:$0xff]  ;;  %v273_v9 = vld [vmem:[%s13190_s6 + $0x28] sm:$0xff] }
  0x12   :  { %10224 = vmatpush3.msra.mxu1 %v178_v3  ;;  %10219 = vmatpush3.msra.mxu0 %v74_v1  ;;  %v175_v10 = vld [vmem:[%s13189_s1 + $0x20] sm:$0xff]  ;;  %v174_v12 = vld [vmem:[%s13189_s1 + $0x18] sm:$0xff]  ;;  %v173_v14 = vld [vmem:[%s13189_s1 + $0x10] sm:$0xff] }
  0x13   :  { %10225 = vmatprep.subr.mxu1 %v177_v6  ;;  %10221 = vmatmul.mubr.msk.f32.vlgmr.msra.gmra.mxu0 %vm83_vm0, %v73_v4  ;;  %v272_v11 = vld [vmem:[%s13190_s6 + $0x20] sm:$0xff]  ;;  %v271_v13 = vld [vmem:[%s13190_s6 + $0x18] sm:$0xff]  ;;  %v270_v15 = vld [vmem:[%s13190_s6 + $0x10] sm:$0xff] }
  0x14   :  { %10242 = vmatprep.subr.mxu0 %v275_v5  ;;  %10226 = vmatpush3.msra.mxu1 %v177_v6  ;;  %v172_v16 = vld [vmem:[%s13189_s1 + $0x8] sm:$0xff]  ;;  %v171_v18 = vld [vmem:[%s13189_s1] sm:$0xff]  ;;  %v365_v20 = vld [vmem:[%s13191_s2 + $0x38] sm:$0xff] }
  0x15   :  { %10243 = vmatpush3.msra.mxu0 %v275_v5  ;;  %10227 = vmatprep.subr.mxu1 %v176_v8  ;;  %v269_v17 = vld [vmem:[%s13190_s6 + $0x8] sm:$0xff]  ;;  %v268_v19 = vld [vmem:[%s13190_s6] sm:$0xff]  ;;  %v364_v32 = vld [vmem:[%s13191_s2 + $0x30] sm:$0xff] }
  0x16   :  { %10244 = vmatprep.subr.mxu0 %v274_v7  ;;  %10228 = vmatpush3.msra.mxu1 %v176_v8  ;;  %v8831_v21 = vld [vmem:[%s13192_s3] ss:$0 sm:$0xff]  ;;  %v168_v28 = vld [vmem:[%s13193_s26 + $0x8] sm:$0xff]  ;;  %v361_v35 = vld [vmem:[%s13191_s2 + $0x18] sm:$0xff] }
  0x17   :  { %10245 = vmatpush3.msra.mxu0 %v274_v7  ;;  %10229 = vmatprep.subr.mxu1 %v175_v10  ;;  %v167_v27 = vld [vmem:[%s13193_s26] sm:$0xff]  ;;  %v363_v33 = vld [vmem:[%s13191_s2 + $0x28] sm:$0xff]  ;;  %v360_v36 = vld [vmem:[%s13191_s2 + $0x10] sm:$0xff]  ;;  %s13178_s26 = smov 80  }
  0x18   :  { %10246 = vmatprep.subr.mxu0 %v273_v9  ;;  %10230 = vmatpush3.msra.mxu1 %v175_v10  ;;  %v362_v34 = vld [vmem:[%s13191_s2 + $0x20] sm:$0xff]  ;;  %v359_v37 = vld [vmem:[%s13191_s2 + $0x8] sm:$0xff] }
  0x19   :  { %10247 = vmatpush3.msra.mxu0 %v273_v9  ;;  %10231 = vmatprep.subr.mxu1 %v174_v12  ;;  %v358_v38 = vld [vmem:[%s13191_s2] sm:$0xff] }
  0x1a   :  { %10248 = vmatprep.subr.mxu0 %v272_v11  ;;  %10232 = vmatpush3.msra.mxu1 %v174_v12 }
  0x1b   :  { %10249 = vmatpush3.msra.mxu0 %v272_v11  ;;  %10233 = vmatprep.subr.mxu1 %v173_v14 }
  0x1c   :  { %10250 = vmatprep.subr.mxu0 %v271_v13  ;;  %10234 = vmatpush3.msra.mxu1 %v173_v14 }
  0x1d   :  { %10251 = vmatpush3.msra.mxu0 %v271_v13  ;;  %10235 = vmatprep.subr.mxu1 %v172_v16 }
  0x1e   :  { %10252 = vmatprep.subr.mxu0 %v270_v15  ;;  %10236 = vmatpush3.msra.mxu1 %v172_v16 }
  0x1f   :  { %10253 = vmatpush3.msra.mxu0 %v270_v15  ;;  %10237 = vmatprep.subr.mxu1 %v171_v18 }
  0x20   :  { %10254 = vmatprep.subr.mxu0 %v269_v17  ;;  %10238 = vmatpush3.msra.mxu1 %v171_v18  ;;  %v449_v18 = vld [vmem:[%s13159_s10 + $0x8] sm:$0xff] }
  0x21   :  { %10255 = vmatpush3.msra.mxu0 %v269_v17  ;;  %10261 = vmatprep.subr.mxu1 %v365_v20 }
  0x22   :  { %10256 = vmatprep.subr.mxu0 %v268_v19 }
  0x23   :  { %10257 = vmatpush3.msra.mxu0 %v268_v19  ;;  %v448_v19 = vld [vmem:[%s13159_s10] sm:$0xff] }
  0x24   :  { %10280 = vmatprep.subr.mxu0 %v10922_v39 }
  0xd3   :  { %v10222_v22 = vpop.f32.mrf.mxu0 }
  0xd4   :  { %v162_v23 = vadd.f32 %v10222_v22, %v8831_v21 }
  0xd5   :  { %v156_v24 = vpop.f32.mrf.mxu0 }
  0xd6   :  { %v157_v25 = vadd.f32 %v8831_v21, %v156_v24  ;;  %v166_v26 = vmul.f32 2.0, %v162_v23 }
  0xd8   :  { %v165_v29 = vmul.f32 2.0, %v157_v25  ;;  %v11119_v31 = vadd.f32 %v168_v28, %v166_v26 }
  0xda   :  { %v11117_v30 = vadd.f32 %v167_v27, %v165_v29 }
  0xdc   :  { %10239 = vmatprep.mubr.msk.f32.mxu1 %vm186_vm1, %v11117_v30  ;;  %10258 = vmatprep.mubr.msk.f32.mxu0 %vm186_vm1, %v11117_v30 }
  0xdd   :  { %10240 = vmatmul.mubr.msk.f32.vlgmr.msra.gmra.mxu1 %vm186_vm1, %v11119_v31  ;;  %10259 = vmatmul.mubr.msk.f32.vlgmr.msra.gmra.mxu0 %vm186_vm1, %v11119_v31 }
  0xde   :  { %10262 = vmatpush3.msra.mxu1 %v365_v20  ;;  %10277 = vmatprep.mubr.msk.f32.mxu1 %vm186_vm1, %v11117_v30 }
  0xdf   :  { %10263 = vmatprep.subr.mxu1 %v364_v32  ;;  %10282 = vmatprep.mubr.msk.f32.mxu0 %vm10923_vm2, %v10922_v39 }
  0xe0   :  { %10264 = vmatpush3.msra.mxu1 %v364_v32 }
  0xe1   :  { %10265 = vmatprep.subr.mxu1 %v363_v33 }
  0xe2   :  { %10266 = vmatpush3.msra.mxu1 %v363_v33 }
  0xe3   :  { %10267 = vmatprep.subr.mxu1 %v362_v34 }
  0xe4   :  { %10268 = vmatpush3.msra.mxu1 %v362_v34 }
  0xe5   :  { %10269 = vmatprep.subr.mxu1 %v361_v35 }
  0xe6   :  { %10270 = vmatpush3.msra.mxu1 %v361_v35 }
  0xe7   :  { %10271 = vmatprep.subr.mxu1 %v360_v36 }
  0xe8   :  { %10272 = vmatpush3.msra.mxu1 %v360_v36 }
  0xe9   :  { %10273 = vmatprep.subr.mxu1 %v359_v37 }
  0xea   :  { %10274 = vmatpush3.msra.mxu1 %v359_v37 }
  0xeb   :  { %10275 = vmatprep.subr.mxu1 %v358_v38 }
  0xec   :  { %10276 = vmatpush3.msra.mxu1 %v358_v38 }
  0xed   :  { %10278 = vmatmul.mubr.msk.f32.vlgmr.msra.gmra.mxu1 %vm186_vm1, %v11119_v31  ;;  %10312 = vmatprep.subr.mxu1 %v10922_v39 }
  0xee   :  { %10314 = vmatprep.mubr.msk.f32.mxu1 %vm10923_vm2, %v10922_v39 }
 0x19d   :  { %v10241_v40 = vpop.f32.mrf.mxu1  ;;  %v10260_v41 = vpop.f32.mrf.mxu0 }
 0x19e   :  { %v11173_v48 = vadd.f32 %v10260_v41, %v8837_v42  ;;  %v11181_v49 = vadd.f32 %v10241_v40, %v8834_v46 }
 0x19f   :  { %v349_v43 = vpop.f32.mrf.mxu0  ;;  %v259_v44 = vpop.f32.mrf.mxu1 }
 0x1a0   :  { %v11163_v45 = vadd.f32 %v8837_v42, %v349_v43  ;;  %v11170_v47 = vadd.f32 %v8834_v46, %v259_v44 }
 0x1a2   :  { %10281 = vmatpush3.xpose.msk.msra.mxu0 %vm83_vm0, %v11163_v45 }
 0x1a3   :  { %10285 = vmatprep.subr.mxu0 %v10922_v39 }
 0x1a5   :  { %10283 = vmatmul.mubr.msk.f32.vlgmr.msra.gmra.mxu0 %vm83_vm0, %v11170_v47 }
 0x1a6   :  { %10286 = vmatpush3.xpose.msk.msra.mxu0 %vm83_vm0, %v11173_v48  ;;  %10287 = vmatprep.mubr.msk.f32.mxu0 %vm10923_vm2, %v10922_v39 }
 0x1a7   :  { %10290 = vmatprep.subr.mxu0 %v10922_v39 }
 0x1a9   :  { %10288 = vmatmul.mubr.msk.f32.vlgmr.msra.gmra.mxu0 %vm83_vm0, %v11181_v49 }
 0x1aa   :  { %10292 = vmatprep.mubr.msk.f32.mxu0 %vm10923_vm2, %v10922_v39 }
 0x1ad   :  { %v10279_v51 = vpop.f32.mrf.mxu1 }
 0x1ae   :  { %v11191_v52 = vadd.f32 %v10279_v51, %v8840_v50 }
 0x1af   :  { %v439_v53 = vpop.f32.mrf.mxu1 }
 0x1b0   :  { %v11193_v54 = vadd.f32 %v8840_v50, %v439_v53 }
 0x1b2   :  { %10291 = vmatpush3.msra.mxu0 %v11193_v54 }
 0x1b3   :  { %10295 = vmatprep.subr.mxu0 %v10922_v39 }
 0x265   :  { %v529_v55 = vpop.f32.mrf.mxu0 }
 0x266   :  { %v609_v56 = vmul.f32 0.25, %v529_v55 }
 0x267   :  { %v10284_v57 = vpop.f32.mrf.mxu0 }
 0x268   :  { %v612_v58 = vsel %vm611_vm3, %v609_v56, -inf }
 0x269   :  { %613 = vmax.xlane.f32.xlu0 %v612_v58  ;;  %v605_v59 = vpop.f32.mrf.mxu0 }
 0x26a   :  { %v610_v60 = vmul.f32 0.25, %v605_v59 }
 0x26b   :  { %v10289_v61 = vpop.f32.mrf.mxu0 }
 0x26c   :  { %v615_v62 = vsel %vm611_vm3, %v610_v60, -inf }
 0x26d   :  { %616 = vmax.xlane.f32.xlu0 %v615_v62 }
 0x283   :  { %871 = vrot.lane.b32.xlu0 %v11163_v45, %s10924_s25 }
 0x2f2   :  { %v614_v63 = vpop.xlane.xlu0 %613 }
 0x2f3   :  { %v618_v0 = vsub.f32 %v609_v56, %v614_v63 }
 0x2f5   :  { %v620_v1 = vmul.f32 1.442695, %v618_v0 }
 0x2f6   :  { %v617_v2 = vpop.xlane.xlu0 %616 }
 0x2f7   :  { %10834 = vpow2.f32 %v620_v1  ;;  %v619_v3 = vsub.f32 %v610_v60, %v617_v2  ;;  %v451_v2 = vld [vmem:[%s13159_s10 + $0x18] sm:$0xff] }
 0x2f9   :  { %v622_v4 = vmul.f32 1.442695, %v619_v3  ;;  %v450_v3 = vld [vmem:[%s13159_s10 + $0x10] sm:$0xff] }
 0x2fa   :  { %v872_v27 = vpop.permute.xlu0 %871 }
 0x2fb   :  { %10836 = vpow2.f32 %v622_v4 }
 0x304   :  { %v10835_v5 = vpop.eup %10834 }
 0x305   :  { %v624_v6 = vsel %vm611_vm3, %v10835_v5, 0.0 }
 0x306   :  { %625 = vadd.xlane.f32.xlu1 %v624_v6 }
 0x308   :  { %v10837_v7 = vpop.eup %10836 }
 0x309   :  { %v627_v8 = vsel %vm611_vm3, %v10837_v7, 0.0 }
 0x30a   :  { %628 = vadd.xlane.f32.xlu1 %v627_v8 }
 0x31b   :  { %949 = vrot.lane.b32.xlu1 %v11173_v48, %s10924_s25 }
 0x31f   :  { %869 = vrot.lane.b32.xlu1 %v11170_v47, %s10924_s25 }
 0x323   :  { %947 = vrot.lane.b32.xlu1 %v11181_v49, %s10924_s25 }
 0x38f   :  { %v626_v9 = vpop.xlane.xlu1 %625 }
 0x390   :  { %10838 = vrcp.f32 %v626_v9 }
 0x393   :  { %v629_v10 = vpop.xlane.xlu1 %628 }
 0x394   :  { %10840 = vrcp.f32 %v629_v10 }
 0x397   :  { %v950_v11 = vpop.permute.xlu1 %949 }
 0x398   :  { %10313 = vmatpush3.xpose.msk.msra.mxu1 %vm83_vm0, %v950_v11 }
 0x399   :  { %10322 = vmatprep.subr.mxu1 %v10922_v39 }
 0x39b   :  { %v870_v12 = vpop.permute.xlu1 %869 }
 0x39d   :  { %v10839_v13 = vpop.eup %10838 }
 0x39e   :  { %v631_v14 = vmul.f32 %v10839_v13, %v10835_v5 }
 0x39f   :  { %v948_v15 = vpop.permute.xlu1 %947 }
 0x3a0   :  { %10293 = vmatmul.mubr.msk.f32.vlgmr.msra.gmra.mxu0 %vm611_vm3, %v631_v14  ;;  %10315 = vmatmul.mubr.msk.f32.vlgmr.msra.gmra.mxu1 %vm83_vm0, %v948_v15 }
 0x3a1   :  { %v10841_v16 = vpop.eup %10840  ;;  %10296 = vmatpush3.msra.mxu0 %v11191_v52  ;;  %10297 = vmatprep.mubr.msk.f32.mxu0 %vm10923_vm2, %v10922_v39 }
 0x3a2   :  { %v633_v17 = vmul.f32 %v10841_v16, %v10837_v7  ;;  %10324 = vmatprep.mubr.msk.f32.mxu1 %vm10923_vm2, %v10922_v39  ;;  %10300 = vmatprep.subr.mxu0 %v449_v18 }
 0x3a4   :  { %10298 = vmatmul.mubr.msk.f32.vlgmr.msra.gmra.mxu0 %vm611_vm3, %v633_v17  ;;  %v8851_v17 = vld [vmem:[%s13160_s11] ss:$0 sm:$0xff] }
 0x3a5   :  { %10301 = vmatpush3.msra.mxu0 %v449_v18 }
 0x3a6   :  { %10302 = vmatprep.subr.mxu0 %v448_v19 }
 0x3a7   :  { %10303 = vmatpush3.msra.mxu0 %v448_v19 }
 0x3a8   :  { %10307 = vmatprep.subr.mxu0 %v10922_v39 }
 0x460   :  { %v703_v20 = vpop.f32.mrf.mxu0  ;;  %v1021_v21 = vpop.f32.mrf.mxu1 }
 0x461   :  { %v1026_v22 = vmul.f32 0.25, %v1021_v21  ;;  %10304 = vmatprep.mubr.msk.f32.mxu0 %vm83_vm0, %v703_v20 }
 0x462   :  { %v10294_v23 = vpop.f32.mrf.mxu0  ;;  %v10316_v24 = vpop.f32.mrf.mxu1 }
 0x463   :  { %v1030_v25 = vsel %vm611_vm3, %v1026_v22, -inf }
 0x464   :  { %1031 = vmax.xlane.f32.xlu1 %v1030_v25  ;;  %v776_v26 = vpop.f32.mrf.mxu0 }
 0x465   :  { %10305 = vmatmul.mubr.msk.f32.vlgmr.msra.gmra.mxu0 %vm83_vm0, %v776_v26 }
 0x466   :  { %10308 = vmatpush3.xpose.msk.msra.mxu0 %vm83_vm0, %v872_v27  ;;  %v10299_v28 = vpop.f32.mrf.mxu0  ;;  %10309 = vmatprep.mubr.msk.f32.mxu0 %vm10923_vm2, %v10922_v39 }
 0x467   :  { %10317 = vmatprep.subr.mxu0 %v10922_v39 }
 0x469   :  { %10310 = vmatmul.mubr.msk.f32.vlgmr.msra.gmra.mxu0 %vm83_vm0, %v870_v12 }
 0x46a   :  { %10319 = vmatprep.mubr.msk.f32.mxu0 %vm10923_vm2, %v10922_v39 }
 0x475   :  { %1127 = vrot.lane.b32.xlu1 %v11191_v52, %s10924_s25 }
 0x479   :  { %1288 = vrot.lane.b32.xlu1 %v11163_v45, %s10925_s29 }
 0x47d   :  { %1366 = vrot.lane.b32.xlu1 %v11173_v48, %s10925_s29 }
 0x481   :  { %1364 = vrot.lane.b32.xlu1 %v11181_v49, %s10925_s29 }
 0x4ed   :  { %v1032_v29 = vpop.xlane.xlu1 %1031 }
 0x4ee   :  { %v1034_v33 = vsub.f32 %v1026_v22, %v1032_v29 }
 0x4f0   :  { %v1037_v34 = vmul.f32 1.442695, %v1034_v33 }
 0x4f1   :  { %v1128_v32 = vpop.permute.xlu1 %1127 }
 0x4f2   :  { %10323 = vmatpush3.msra.mxu1 %v1128_v32  ;;  %10842 = vpow2.f32 %v1037_v34 }
 0x4f3   :  { %10334 = vmatprep.subr.mxu1 %v10922_v39 }
 0x4f5   :  { %v1289_v58 = vpop.permute.xlu1 %1288 }
 0x4f9   :  { %v1367_v8 = vpop.permute.xlu1 %1366 }
 0x4fd   :  { %v1365_v11 = vpop.permute.xlu1 %1364 }
 0x4ff   :  { %v10843_v42 = vpop.eup %10842 }
 0x500   :  { %v1042_v43 = vsel %vm611_vm3, %v10843_v42, 0.0 }
 0x525   :  { %v11245_v35 = vpop.f32.mrf.mxu0 }
 0x526   :  { %v868_v18 = vadd.f32 %v11245_v35, %v8851_v17 }
 0x527   :  { %v11247_v36 = vpop.f32.mrf.mxu0 }
 0x528   :  { %v867_v20 = vadd.f32 %v8851_v17, %v11247_v36 }
 0x529   :  { %v943_v37 = vpop.f32.mrf.mxu0 }
 0x52a   :  { %v1025_v38 = vmul.f32 0.25, %v943_v37 }
 0x52b   :  { %v10311_v40 = vpop.f32.mrf.mxu0 }
 0x52c   :  { %v1027_v41 = vsel %vm611_vm3, %v1025_v38, -inf }
 0x52d   :  { %1028 = vmax.xlane.f32.xlu0 %v1027_v41 }
 0x531   :  { %1043 = vadd.xlane.f32.xlu0 %v1042_v43  ;;  %v452_v43 = vld [vmem:[%s13159_s10 + $0x20] sm:$0xff] }
 0x5b6   :  { %v1029_v44 = vpop.xlane.xlu0 %1028 }
 0x5b7   :  { %v1033_v46 = vsub.f32 %v1025_v38, %v1029_v44 }
 0x5b9   :  { %v1035_v50 = vmul.f32 1.442695, %v1033_v46 }
 0x5ba   :  { %v1044_v51 = vpop.xlane.xlu0 %1043 }
 0x5bb   :  { %10844 = vpow2.f32 %v1035_v50 }
 0x5bc   :  { %10846 = vrcp.f32 %v1044_v51 }
 0x5c8   :  { %v10845_v53 = vpop.eup %10844 }
 0x5c9   :  { %v10847_v55 = vpop.eup %10846  ;;  %v1039_v56 = vsel %vm611_vm3, %v10845_v53, 0.0 }
 0x5ca   :  { %1040 = vadd.xlane.f32.xlu0 %v1039_v56  ;;  %v1048_v57 = vmul.f32 %v10847_v55, %v10843_v42  ;;  %v453_v42 = vld [vmem:[%s13159_s10 + $0x28] sm:$0xff] }
 0x5cc   :  { %10325 = vmatmul.mubr.msk.f32.vlgmr.msra.gmra.mxu1 %vm611_vm3, %v1048_v57 }
 0x5cd   :  { %10335 = vmatpush3.xpose.msk.msra.mxu1 %vm83_vm0, %v1289_v58  ;;  %10336 = vmatprep.mubr.msk.f32.mxu1 %vm10923_vm2, %v10922_v39 }
 0x5ce   :  { %10344 = vmatprep.subr.mxu1 %v10922_v39 }
 0x5e0   :  { %1050 = vrot.lane.b32.xlu0 %v11193_v54, %s10924_s25 }
 0x5e4   :  { %1286 = vrot.lane.b32.xlu0 %v11170_v47, %s10925_s29 }
 0x653   :  { %v1041_v59 = vpop.xlane.xlu0 %1040 }
 0x654   :  { %10848 = vrcp.f32 %v1041_v59 }
 0x657   :  { %v1051_v60 = vpop.permute.xlu0 %1050 }
 0x658   :  { %10318 = vmatpush3.msra.mxu0 %v1051_v60 }
 0x659   :  { %10327 = vmatprep.subr.mxu0 %v451_v2 }
 0x65b   :  { %v1287_v61 = vpop.permute.xlu0 %1286 }
 0x65c   :  { %10337 = vmatmul.mubr.msk.f32.vlgmr.msra.gmra.mxu1 %vm83_vm0, %v1287_v61 }
 0x65d   :  { %10346 = vmatprep.mubr.msk.f32.mxu1 %vm10923_vm2, %v10922_v39 }
 0x661   :  { %v10849_v62 = vpop.eup %10848 }
 0x662   :  { %v1046_v63 = vmul.f32 %v10849_v62, %v10845_v53 }
 0x664   :  { %10320 = vmatmul.mubr.msk.f32.vlgmr.msra.gmra.mxu0 %vm611_vm3, %v1046_v63 }
 0x665   :  { %10328 = vmatpush3.msra.mxu0 %v451_v2 }
 0x666   :  { %10329 = vmatprep.subr.mxu0 %v450_v3 }
 0x667   :  { %10330 = vmatpush3.msra.mxu0 %v450_v3 }
 0x668   :  { %10339 = vmatprep.subr.mxu0 %v10922_v39 }
 0x68c   :  { %v1199_v0 = vpop.f32.mrf.mxu1 }
 0x68e   :  { %v10326_v1 = vpop.f32.mrf.mxu1 }
 0x71c   :  { %v1360_v4 = vpop.f32.mrf.mxu1 }
 0x71d   :  { %v1442_v5 = vmul.f32 0.25, %v1360_v4 }
 0x71e   :  { %v10338_v6 = vpop.f32.mrf.mxu1 }
 0x71f   :  { %v1444_v7 = vsel %vm611_vm3, %v1442_v5, -inf }
 0x720   :  { %1445 = vmax.xlane.f32.xlu0 %v1444_v7 }
 0x724   :  { %v1122_v9 = vpop.f32.mrf.mxu0 }
 0x725   :  { %10331 = vmatprep.mubr.msk.f32.mxu0 %vm83_vm0, %v1122_v9 }
 0x726   :  { %v10321_v10 = vpop.f32.mrf.mxu0  ;;  %10332 = vmatmul.mubr.msk.f32.vlgmr.msra.gmra.mxu0 %vm83_vm0, %v1199_v0 }
 0x727   :  { %10340 = vmatpush3.xpose.msk.msra.mxu0 %vm83_vm0, %v1367_v8  ;;  %10341 = vmatprep.mubr.msk.f32.mxu0 %vm10923_vm2, %v10922_v39 }
 0x728   :  { %10349 = vmatprep.subr.mxu0 %v10922_v39 }
 0x72a   :  { %10342 = vmatmul.mubr.msk.f32.vlgmr.msra.gmra.mxu0 %vm83_vm0, %v1365_v11 }
 0x72b   :  { %10351 = vmatprep.mubr.msk.f32.mxu0 %vm10923_vm2, %v10922_v39 }
 0x7a9   :  { %v1446_v12 = vpop.xlane.xlu0 %1445 }
 0x7aa   :  { %v1450_v13 = vsub.f32 %v1442_v5, %v1446_v12 }
 0x7ac   :  { %v1452_v14 = vmul.f32 1.442695, %v1450_v13 }
 0x7ae   :  { %10850 = vpow2.f32 %v1452_v14 }
 0x7bb   :  { %v10851_v15 = vpop.eup %10850 }
 0x7bc   :  { %v1456_v16 = vsel %vm611_vm3, %v10851_v15, 0.0 }
 0x7bd   :  { %1457 = vadd.xlane.f32.xlu0 %v1456_v16 }
 0x7e6   :  { %v10333_v19 = vpop.f32.mrf.mxu0 }
 0x7e7   :  { %v11288_v21 = vadd.f32 %v10333_v19, %v868_v18 }
 0x7e8   :  { %v1275_v22 = vpop.f32.mrf.mxu0 }
 0x7e9   :  { %v11290_v23 = vadd.f32 %v1275_v22, %v867_v20 }
 0x7ea   :  { %v1438_v24 = vpop.f32.mrf.mxu0 }
 0x7eb   :  { %v1443_v25 = vmul.f32 0.25, %v1438_v24 }
 0x7ec   :  { %v10343_v26 = vpop.f32.mrf.mxu0 }
 0x7ed   :  { %v1447_v27 = vsel %vm611_vm3, %v1443_v25, -inf }
 0x7ee   :  { %1448 = vmax.xlane.f32.xlu1 %v1447_v27 }
 0x7ff   :  { %1542 = vrot.lane.b32.xlu1 %v11191_v52, %s10925_s29 }
 0x803   :  { %1703 = vrot.lane.b32.xlu1 %v11163_v45, %s13178_s26 }
 0x807   :  { %1781 = vrot.lane.b32.xlu1 %v11173_v48, %s13178_s26 }
 0x80b   :  { %1779 = vrot.lane.b32.xlu1 %v11181_v49, %s13178_s26 }
 0x846   :  { %v1458_v45 = vpop.xlane.xlu0 %1457 }
 0x877   :  { %v1449_v28 = vpop.xlane.xlu1 %1448 }
 0x878   :  { %v1451_v29 = vsub.f32 %v1443_v25, %v1449_v28 }
 0x87a   :  { %v1454_v32 = vmul.f32 1.442695, %v1451_v29 }
 0x87b   :  { %v1543_v33 = vpop.permute.xlu1 %1542 }
 0x87c   :  { %10852 = vpow2.f32 %v1454_v32  ;;  %10350 = vmatpush3.msra.mxu0 %v1543_v33 }
 0x87d   :  { %10361 = vmatprep.subr.mxu0 %v10922_v39  ;;  %10854 = vrcp.f32 %v1458_v45 }
 0x87f   :  { %v1704_v41 = vpop.permute.xlu1 %1703 }
 0x883   :  { %v1782_v50 = vpop.permute.xlu1 %1781 }
 0x887   :  { %v1780_v55 = vpop.permute.xlu1 %1779 }
 0x889   :  { %v10853_v34 = vpop.eup %10852 }
 0x88a   :  { %v1459_v35 = vsel %vm611_vm3, %v10853_v34, 0.0  ;;  %v10855_v49 = vpop.eup %10854 }
 0x88b   :  { %1460 = vadd.xlane.f32.xlu0 %v1459_v35  ;;  %v1463_v37 = vmul.f32 %v10855_v49, %v10851_v15 }
 0x8a1   :  { %1466 = vrot.lane.b32.xlu0 %v11193_v54, %s10925_s29 }
 0x8a5   :  { %1701 = vrot.lane.b32.xlu0 %v11170_v47, %s13178_s26 }
 0x914   :  { %v1461_v48 = vpop.xlane.xlu0 %1460 }
 0x915   :  { %10856 = vrcp.f32 %v1461_v48 }
 0x918   :  { %v1467_v36 = vpop.permute.xlu0 %1466 }
 0x919   :  { %10345 = vmatpush3.msra.mxu1 %v1467_v36 }
 0x91a   :  { %10347 = vmatmul.mubr.msk.f32.vlgmr.msra.gmra.mxu1 %vm611_vm3, %v1463_v37  ;;  %10354 = vmatprep.subr.mxu1 %v453_v42 }
 0x91b   :  { %10355 = vmatpush3.msra.mxu1 %v453_v42  ;;  %v2220_v42 = vld [vmem:[%s13161_s14 + $0x1c0] sm:$0xff] }
 0x91c   :  { %v1702_v47 = vpop.permute.xlu0 %1701  ;;  %10356 = vmatprep.subr.mxu1 %v452_v43 }
 0x91d   :  { %10357 = vmatpush3.msra.mxu1 %v452_v43  ;;  %v2213_v43 = vld [vmem:[%s13161_s14 + $0x188] sm:$0xff] }
 0x91e   :  { %10366 = vmatprep.subr.mxu1 %v10922_v39 }
 0x922   :  { %v10857_v38 = vpop.eup %10856 }
 0x923   :  { %v1465_v40 = vmul.f32 %v10857_v38, %v10853_v34 }
 0x925   :  { %10352 = vmatmul.mubr.msk.f32.vlgmr.msra.gmra.mxu0 %vm611_vm3, %v1465_v40 }
 0x926   :  { %10362 = vmatpush3.xpose.msk.msra.mxu0 %vm83_vm0, %v1704_v41  ;;  %10363 = vmatprep.mubr.msk.f32.mxu0 %vm10923_vm2, %v10922_v39 }
 0x927   :  { %10371 = vmatprep.subr.mxu0 %v10922_v39 }
 0x929   :  { %10364 = vmatmul.mubr.msk.f32.vlgmr.msra.gmra.mxu0 %vm83_vm0, %v1702_v47  ;;  %v2212_v47 = vld [vmem:[%s13161_s14 + $0x180] sm:$0xff] }
 0x92a   :  { %10373 = vmatprep.mubr.msk.f32.mxu0 %vm10923_vm2, %v10922_v39 }
 0x9da   :  { %v1538_v44 = vpop.f32.mrf.mxu1 }
 0x9db   :  { %10358 = vmatprep.mubr.msk.f32.mxu1 %vm83_vm0, %v1538_v44  ;;  %v8927_v44 = vcombine.high %v2212_v47, %v2220_v42 }
 0x9dc   :  { %v10348_v46 = vpop.f32.mrf.mxu1 }
 0x9dd   :  { %v2221_v46 = vld [vmem:[%s13161_s14 + $0x1c8] sm:$0xff] }
 0x9e5   :  { %v1614_v51 = vpop.f32.mrf.mxu0 }
 0x9e6   :  { %10359 = vmatmul.mubr.msk.f32.vlgmr.msra.gmra.mxu1 %vm83_vm0, %v1614_v51  ;;  %v8928_v51 = vcombine.low %v2213_v43, %v2221_v46 }
 0x9e7   :  { %10367 = vmatpush3.xpose.msk.msra.mxu1 %vm83_vm0, %v1782_v50  ;;  %v10353_v53 = vpop.f32.mrf.mxu0  ;;  %10368 = vmatprep.mubr.msk.f32.mxu1 %vm10923_vm2, %v10922_v39  ;;  %v8926_v50 = vcombine.low %v2212_v47, %v2220_v42  ;;  %v2183_v47 = vld [vmem:[%s13161_s14 + $0x98] sm:$0xff] }
 0x9e8   :  { %10376 = vmatprep.subr.mxu1 %v10922_v39  ;;  %v8929_v53 = vcombine.high %v2213_v43, %v2221_v46  ;;  %v2191_v42 = vld [vmem:[%s13161_s14 + $0xd8] sm:$0xff] }
 0x9e9   :  { %v1775_v56 = vpop.f32.mrf.mxu0 }
 0x9ea   :  { %v1857_v57 = vmul.f32 0.25, %v1775_v56  ;;  %10369 = vmatmul.mubr.msk.f32.vlgmr.msra.gmra.mxu1 %vm83_vm0, %v1780_v55  ;;  %v2196_v55 = vld [vmem:[%s13161_s14 + $0x100] sm:$0xff] }
 0x9eb   :  { %v10365_v58 = vpop.f32.mrf.mxu0  ;;  %10378 = vmatprep.mubr.msk.f32.mxu1 %vm10923_vm2, %v10922_v39  ;;  %v2204_v56 = vld [vmem:[%s13161_s14 + $0x140] sm:$0xff] }
 0x9ec   :  { %v1859_v59 = vsel %vm611_vm3, %v1857_v57, -inf  ;;  %v8911_v58 = vcombine.high %v2196_v55, %v2204_v56 }
 0x9ed   :  { %1860 = vmax.xlane.f32.xlu0 %v1859_v59  ;;  %v2205_v59 = vld [vmem:[%s13161_s14 + $0x148] sm:$0xff] }
 0xa76   :  { %v1861_v60 = vpop.xlane.xlu0 %1860 }
 0xa77   :  { %v1865_v61 = vsub.f32 %v1857_v57, %v1861_v60  ;;  %v2197_v57 = vld [vmem:[%s13161_s14 + $0x108] sm:$0xff]  ;;  %v8910_v60 = vcombine.low %v2196_v55, %v2204_v56  ;;  %v2174_v55 = vld [vmem:[%s13161_s14 + $0x50] sm:$0xff]  ;;  %v2167_v56 = vld [vmem:[%s13161_s14 + $0x18] sm:$0xff] }
 0xa79   :  { %v1867_v62 = vmul.f32 1.442695, %v1865_v61  ;;  %v8912_v61 = vcombine.low %v2197_v57, %v2205_v59 }
 0xa7b   :  { %10858 = vpow2.f32 %v1867_v62  ;;  %v8913_v62 = vcombine.high %v2197_v57, %v2205_v59  ;;  %v2175_v57 = vld [vmem:[%s13161_s14 + $0x58] sm:$0xff]  ;;  %v8901_v59 = vcombine.high %v2183_v47, %v2191_v42 }
 0xa88   :  { %v10859_v63 = vpop.eup %10858 }
 0xa89   :  { %v1871_v0 = vsel %vm611_vm3, %v10859_v63, 0.0 }
 0xa8a   :  { %1872 = vadd.xlane.f32.xlu0 %v1871_v0  ;;  %v2188_v0 = vld [vmem:[%s13161_s14 + $0xc0] sm:$0xff] }
 0xaa6   :  { %v10360_v1 = vpop.f32.mrf.mxu1 }
 0xaa7   :  { %v1700_v2 = vadd.f32 %v10360_v1, %v11288_v21  ;;  %v455_v21 = vld [vmem:[%s13159_s10 + $0x38] sm:$0xff]  ;;  %v2181_v1 = vld [vmem:[%s13161_s14 + $0x88] sm:$0xff] }
 0xaa8   :  { %v1690_v3 = vpop.f32.mrf.mxu1 }
 0xaa9   :  { %v1699_v4 = vadd.f32 %v1690_v3, %v11290_v23  ;;  %v2189_v3 = vld [vmem:[%s13161_s14 + $0xc8] sm:$0xff] }
 0xaaa   :  { %v1853_v5 = vpop.f32.mrf.mxu1 }
 0xaab   :  { %v1858_v6 = vmul.f32 0.25, %v1853_v5  ;;  %v8896_v5 = vcombine.low %v2181_v1, %v2189_v3 }
 0xaac   :  { %v10370_v7 = vpop.f32.mrf.mxu1 }
 0xaad   :  { %v1862_v8 = vsel %vm611_vm3, %v1858_v6, -inf  ;;  %v2164_v7 = vld [vmem:[%s13161_s14] sm:$0xff] }
 0xaae   :  { %1863 = vmax.xlane.f32.xlu1 %v1862_v8  ;;  %v2172_v8 = vld [vmem:[%s13161_s14 + $0x40] sm:$0xff] }
 0xabf   :  { %1957 = vrot.lane.b32.xlu1 %v11191_v52, %s13178_s26 }
 0xb13   :  { %v1873_v15 = vpop.xlane.xlu0 %1872 }
 0xb37   :  { %v1864_v9 = vpop.xlane.xlu1 %1863 }
 0xb38   :  { %v1866_v10 = vsub.f32 %v1858_v6, %v1864_v9  ;;  %v8897_v6 = vcombine.high %v2181_v1, %v2189_v3  ;;  %v2165_v9 = vld [vmem:[%s13161_s14 + $0x8] sm:$0xff]  ;;  %v8885_v3 = vcombine.high %v2167_v56, %v2175_v57 }
 0xb39   :  { %v2225_v1 = vld [vmem:[%s13161_s14 + $0x1e8] sm:$0xff] }
 0xb3a   :  { %v1869_v11 = vmul.f32 1.442695, %v1866_v10  ;;  %v8879_v10 = vcombine.high %v2164_v7, %v2172_v8 }
 0xb3b   :  { %v1958_v12 = vpop.permute.xlu1 %1957 }
 0xb3c   :  { %10860 = vpow2.f32 %v1869_v11  ;;  %10377 = vmatpush3.msra.mxu1 %v1958_v12  ;;  %v2173_v11 = vld [vmem:[%s13161_s14 + $0x48] sm:$0xff]  ;;  %v8878_v12 = vcombine.low %v2164_v7, %v2172_v8  ;;  %v2208_v7 = vld [vmem:[%s13161_s14 + $0x160] sm:$0xff] }
 0xb3d   :  { %10862 = vrcp.f32 %v1873_v15  ;;  %2643 = vmatprep.subr.bf16.mxu1 %v8927_v44  ;;  %v2214_v15 = vld [vmem:[%s13161_s14 + $0x190] sm:$0xff]  ;;  %v2201_v8 = vld [vmem:[%s13161_s14 + $0x128] sm:$0xff] }
 0xb49   :  { %v10861_v13 = vpop.eup %10860 }
 0xb4a   :  { %v1874_v14 = vsel %vm611_vm3, %v10861_v13, 0.0  ;;  %v10863_v17 = vpop.eup %10862 }
 0xb4b   :  { %1875 = vadd.xlane.f32.xlu0 %v1874_v14  ;;  %v1878_v52 = vmul.f32 %v10863_v17, %v10859_v63  ;;  %v2180_v63 = vld [vmem:[%s13161_s14 + $0x80] sm:$0xff]  ;;  %v8881_v14 = vcombine.high %v2165_v9, %v2173_v11  ;;  %v2215_v17 = vld [vmem:[%s13161_s14 + $0x198] sm:$0xff] }
 0xb61   :  { %1881 = vrot.lane.b32.xlu0 %v11193_v54, %s13178_s26  ;;  %v454_v54 = vld [vmem:[%s13159_s10 + $0x30] sm:$0xff] }
 0xbd4   :  { %v1876_v16 = vpop.xlane.xlu0 %1875 }
 0xbd5   :  { %10864 = vrcp.f32 %v1876_v16  ;;  %v2222_v16 = vld [vmem:[%s13161_s14 + $0x1d0] sm:$0xff] }
 0xbd8   :  { %v1882_v18 = vpop.permute.xlu0 %1881 }
 0xbd9   :  { %10372 = vmatpush3.msra.mxu0 %v1882_v18  ;;  %v10927_v18 = vmov 0  }
 0xbda   :  { %10374 = vmatmul.mubr.msk.f32.vlgmr.msra.gmra.mxu0 %vm611_vm3, %v1878_v52  ;;  %10381 = vmatprep.subr.mxu0 %v455_v21  ;;  %v8930_v52 = vcombine.low %v2214_v15, %v2222_v16 }
 0xbdb   :  { %10382 = vmatpush3.msra.mxu0 %v455_v21 }
 0xbdc   :  { %10383 = vmatprep.subr.mxu0 %v454_v54 }
 0xbdd   :  { %10384 = vmatpush3.msra.mxu0 %v454_v54 }
 0xbde   :  { %2686 = vmatprep.subr.bf16.mxu0 %v8929_v53  ;;  %v2166_v53 = vld [vmem:[%s13161_s14 + $0x10] sm:$0xff] }
 0xbe2   :  { %v10865_v19 = vpop.eup %10864 }
 0xbe3   :  { %v1880_v20 = vmul.f32 %v10865_v19, %v10861_v13  ;;  %v8880_v13 = vcombine.low %v2165_v9, %v2173_v11  ;;  %v8931_v19 = vcombine.high %v2214_v15, %v2222_v16  ;;  %v2209_v9 = vld [vmem:[%s13161_s14 + $0x168] sm:$0xff]  ;;  %v2192_v15 = vld [vmem:[%s13161_s14 + $0xe0] sm:$0xff] }
 0xbe4   :  { %v2185_v16 = vld [vmem:[%s13161_s14 + $0xa8] sm:$0xff] }
 0xbe5   :  { %10379 = vmatmul.mubr.msk.f32.vlgmr.msra.gmra.mxu1 %vm611_vm3, %v1880_v20  ;;  %v2223_v20 = vld [vmem:[%s13161_s14 + $0x1d8] sm:$0xff] }
 0xbe6   :  { %2644 = vmatpush1.bf16.msra.mxu1 %v8926_v50  ;;  %2667 = vmatprep.mubr.bf16.mxu1 %v10927_v18  ;;  %v8932_v21 = vcombine.low %v2215_v17, %v2223_v20  ;;  %v8933_v54 = vcombine.high %v2215_v17, %v2223_v20  ;;  %v2193_v17 = vld [vmem:[%s13161_s14 + $0xe8] sm:$0xff] }
 0xbe7   :  { %2645 = vmatprep.subr.bf16.mxu1 %v8911_v58 }
 0xbea   :  { %2646 = vmatpush1.bf16.msra.mxu1 %v8910_v60 }
 0xc9a   :  { %v1953_v22 = vpop.f32.mrf.mxu0 }
 0xc9b   :  { %10385 = vmatprep.mubr.msk.f32.mxu0 %vm83_vm0, %v1953_v22 }
 0xc9c   :  { %v10375_v23 = vpop.f32.mrf.mxu0 }
 0xca5   :  { %v2029_v24 = vpop.f32.mrf.mxu1 }
 0xca6   :  { %10386 = vmatmul.mubr.msk.f32.vlgmr.msra.gmra.mxu0 %vm83_vm0, %v2029_v24 }
 0xca7   :  { %v10380_v25 = vpop.f32.mrf.mxu1  ;;  %2687 = vmatpush1.bf16.msra.mxu0 %v8928_v51  ;;  %2710 = vmatprep.mubr.bf16.mxu0 %v10927_v18 }
 0xca8   :  { %2688 = vmatprep.subr.bf16.mxu0 %v8913_v62  ;;  %v2216_v62 = vld [vmem:[%s13161_s14 + $0x1a0] sm:$0xff] }
 0xcab   :  { %2689 = vmatpush1.bf16.msra.mxu0 %v8912_v61  ;;  %v8900_v61 = vcombine.low %v2183_v47, %v2191_v42 }
 0xcac   :  { %2690 = vmatprep.subr.bf16.mxu0 %v8897_v6  ;;  %v2200_v6 = vld [vmem:[%s13161_s14 + $0x120] sm:$0xff] }
 0xcad   :  { %v8918_v20 = vcombine.low %v2200_v6, %v2208_v7 }
 0xcaf   :  { %2691 = vmatpush1.bf16.msra.mxu0 %v8896_v5  ;;  %v8884_v5 = vcombine.low %v2167_v56, %v2175_v57 }
 0xcb0   :  { %2692 = vmatprep.subr.bf16.mxu0 %v8881_v14  ;;  %v2184_v14 = vld [vmem:[%s13161_s14 + $0xa0] sm:$0xff] }
 0xcb3   :  { %2693 = vmatpush1.bf16.msra.mxu0 %v8880_v13 }
 0xcb4   :  { %2772 = vmatprep.subr.bf16.mxu0 %v8933_v54  ;;  %v2168_v54 = vld [vmem:[%s13161_s14 + $0x20] sm:$0xff] }
 0xd66   :  { %v10387_v26 = vpop.f32.mrf.mxu0 }
 0xd67   :  { %v2115_v27 = vadd.f32 %v10387_v26, %v1700_v2  ;;  %v8895_v2 = vcombine.high %v2180_v63, %v2188_v0 }
 0xd68   :  { %v2105_v28 = vpop.f32.mrf.mxu0 }
 0xd69   :  { %v2114_v29 = vadd.f32 %v2105_v28, %v1699_v4  ;;  %v2117_v32 = vadd.f32 %v2115_v27, %v11119_v31  ;;  %v8894_v4 = vcombine.low %v2180_v63, %v2188_v0  ;;  %2647 = vmatprep.subr.bf16.mxu1 %v8895_v2  ;;  %v8876_v28 = vld [vmem:[%s13163_s12] ss:$0 sm:$0xff]  ;;  %v2217_v0 = vld [vmem:[%s13161_s14 + $0x1a8] sm:$0xff]  ;;  %v8883_v2 = vcombine.high %v2166_v53, %v2174_v55 }
 0xd6a   :  { %v2224_v63 = vld [vmem:[%s13161_s14 + $0x1e0] sm:$0xff]  ;;  %v8937_v11 = vcombine.high %v2217_v0, %v2225_v1  ;;  %v8936_v13 = vcombine.low %v2217_v0, %v2225_v1 }
 0xd6b   :  { %v2123_v33 = vsel %vm186_vm1, %v2117_v32, 0.0  ;;  %v2116_v34 = vadd.f32 %v2114_v29, %v11117_v30  ;;  %2648 = vmatpush1.bf16.msra.mxu1 %v8894_v4  ;;  %v8882_v4 = vcombine.low %v2166_v53, %v2174_v55  ;;  %v2195_v53 = vld [vmem:[%s13161_s14 + $0xf8] sm:$0xff] }
 0xd6c   :  { %2124 = vadd.xlane.f32.xlu0 %v2123_v33  ;;  %2649 = vmatprep.subr.bf16.mxu1 %v8879_v10  ;;  %v8935_v10 = vcombine.high %v2216_v62, %v2224_v63 }
 0xd6d   :  { %v2120_v35 = vsel %vm186_vm1, %v2116_v34, 0.0 }
 0xd6e   :  { %2121 = vadd.xlane.f32.xlu1 %v2120_v35 }
 0xd6f   :  { %2650 = vmatpush1.bf16.msra.mxu1 %v8878_v12  ;;  %v8934_v12 = vcombine.low %v2216_v62, %v2224_v63  ;;  %v2179_v62 = vld [vmem:[%s13161_s14 + $0x78] sm:$0xff] }
 0xd70   :  { %2729 = vmatprep.subr.bf16.mxu1 %v8931_v19  ;;  %v8921_v19 = vcombine.high %v2201_v8, %v2209_v9 }
 0xdf5   :  { %v2125_v45 = vpop.xlane.xlu0 %2124 }
 0xdf6   :  { %v2128_v48 = vmul.f32 0.015625, %v2125_v45 }
 0xdf7   :  { %v2122_v49 = vpop.xlane.xlu1 %2121 }
 0xdf8   :  { %v11356_v36 = vsub.f32 %v2117_v32, %v2128_v48  ;;  %v2127_v37 = vmul.f32 0.015625, %v2122_v49  ;;  %v2198_v48 = vld [vmem:[%s13161_s14 + $0x110] sm:$0xff] }
 0xdf9   :  { %v2206_v49 = vld [vmem:[%s13161_s14 + $0x150] sm:$0xff] }
 0xdfa   :  { %v11358_v38 = vsub.f32 %v2116_v34, %v2127_v37  ;;  %v2132_v40 = vmul.f32 %v11356_v36, %v11356_v36  ;;  %v8877_v34 = vld [vmem:[%s13164_s13] ss:$0 sm:$0xff]  ;;  %v2207_v37 = vld [vmem:[%s13161_s14 + $0x158] sm:$0xff]  ;;  %v8915_v44 = vcombine.high %v2198_v48, %v2206_v49  ;;  %v8914_v50 = vcombine.low %v2198_v48, %v2206_v49 }
 0xdfc   :  { %v2136_v31 = vsel %vm186_vm1, %v2132_v40, 0.0  ;;  %v2131_v30 = vmul.f32 %v11358_v38, %v11358_v38 }
 0xdfd   :  { %2137 = vadd.xlane.f32.xlu1 %v2136_v31 }
 0xdfe   :  { %v2133_v41 = vsel %vm186_vm1, %v2131_v30, 0.0  ;;  %v2182_v30 = vld [vmem:[%s13161_s14 + $0x90] sm:$0xff] }
 0xdff   :  { %2134 = vadd.xlane.f32.xlu0 %v2133_v41  ;;  %v2190_v41 = vld [vmem:[%s13161_s14 + $0xd0] sm:$0xff] }
 0xe00   :  { %v8899_v58 = vcombine.high %v2182_v30, %v2190_v41  ;;  %v8898_v60 = vcombine.low %v2182_v30, %v2190_v41  ;;  %v2211_v30 = vld [vmem:[%s13161_s14 + $0x178] sm:$0xff] }
 0xe86   :  { %v2138_v22 = vpop.xlane.xlu1 %2137 }
 0xe87   :  { %v2140_v23 = vmul.f32 0.015625, %v2138_v22  ;;  %v2176_v22 = vld [vmem:[%s13161_s14 + $0x60] sm:$0xff] }
 0xe88   :  { %v2135_v24 = vpop.xlane.xlu0 %2134  ;;  %v8886_v48 = vcombine.low %v2168_v54, %v2176_v22 }
 0xe89   :  { %v2142_v25 = vadd.f32 1e-05, %v2140_v23  ;;  %v2139_v26 = vmul.f32 0.015625, %v2135_v24  ;;  %v2169_v23 = vld [vmem:[%s13161_s14 + $0x28] sm:$0xff] }
 0xe8a   :  { %v2177_v24 = vld [vmem:[%s13161_s14 + $0x68] sm:$0xff] }
 0xe8b   :  { %10866 = vrsqrt.f32 %v2142_v25  ;;  %v2141_v27 = vadd.f32 1e-05, %v2139_v26  ;;  %v8903_v25 = vcombine.high %v2184_v14, %v2192_v15  ;;  %v8905_v26 = vcombine.high %v2185_v16, %v2193_v17 }
 0xe8c   :  { %v8888_v49 = vcombine.low %v2169_v23, %v2177_v24 }
 0xe8d   :  { %10868 = vrsqrt.f32 %v2141_v27  ;;  %v8902_v27 = vcombine.low %v2184_v14, %v2192_v15  ;;  %v10585_v14 = vld [vmem:[%s13162_s16 + $0xb0] sm:$0xff]   ;;  %v10586_v15 = vld [vmem:[%s13162_s16 + $0x68] sm:$0xff]  }
 0xe98   :  { %v10867_v29 = vpop.eup %10866 }
 0xe99   :  { %v2146_v32 = vmul.f32 %v10867_v29, %v11356_v36  ;;  %v2199_v36 = vld [vmem:[%s13161_s14 + $0x118] sm:$0xff]  ;;  %v2218_v29 = vld [vmem:[%s13161_s14 + $0x1b0] sm:$0xff] }
 0xe9a   :  { %v10869_v33 = vpop.eup %10868  ;;  %v8917_v46 = vcombine.high %v2199_v36, %v2207_v37  ;;  %v8916_v51 = vcombine.low %v2199_v36, %v2207_v37  ;;  %v2202_v36 = vld [vmem:[%s13161_s14 + $0x130] sm:$0xff] }
 0xe9b   :  { %v2154_v35 = vmul.f32 %v8876_v28, %v2146_v32  ;;  %v2145_v45 = vmul.f32 %v10869_v33, %v11358_v38  ;;  %v2226_v32 = vld [vmem:[%s13161_s14 + $0x1f0] sm:$0xff]  ;;  %v2219_v33 = vld [vmem:[%s13161_s14 + $0x1b8] sm:$0xff] }
 0xe9c   :  { %v2210_v37 = vld [vmem:[%s13161_s14 + $0x170] sm:$0xff]  ;;  %v8939_v41 = vcombine.high %v2218_v29, %v2226_v32  ;;  %v8938_v42 = vcombine.low %v2218_v29, %v2226_v32  ;;  %v10602_v29 = vld [vmem:[%s13162_s16 + $0x48] sm:$0xff]  }
 0xe9d   :  { %v2153_v40 = vmul.f32 %v8876_v28, %v2145_v45  ;;  %v11448_v31 = vadd.f32 %v8877_v34, %v2154_v35  ;;  %v8904_v28 = vcombine.low %v2185_v16, %v2193_v17  ;;  %v8887_v35 = vcombine.high %v2168_v54, %v2176_v22  ;;  %v10587_v16 = vld [vmem:[%s13162_s16 + $0xe8] sm:$0xff]   ;;  %v10594_v54 = vld [vmem:[%s13162_s16 + $0x58] sm:$0xff]  }
 0xe9e   :  { %v8889_v45 = vcombine.high %v2169_v23, %v2177_v24  ;;  %v8923_v55 = vcombine.high %v2202_v36, %v2210_v37  ;;  %v8922_v57 = vcombine.low %v2202_v36, %v2210_v37  ;;  %v10588_v17 = vld [vmem:[%s13162_s16 + $0x28] sm:$0xff]   ;;  %v10595_v22 = vld [vmem:[%s13162_s16 + $0xd8] sm:$0xff]  }
 0xe9f   :  { %v11450_v38 = vadd.f32 %v8877_v34, %v2153_v40  ;;  %v2227_v34 = vld [vmem:[%s13161_s14 + $0x1f8] sm:$0xff]  ;;  %v10603_v32 = vld [vmem:[%s13162_s16 + $0xc8] sm:$0xff]  }
 0xea0   :  { %v2203_v40 = vld [vmem:[%s13161_s14 + $0x138] sm:$0xff]  ;;  %v8941_v47 = vcombine.high %v2219_v33, %v2227_v34 }
 0xea1   :  { %v11466_v43 = vpack.c.bf16 %v11448_v31, %v11450_v38  ;;  %v8925_v56 = vcombine.high %v2203_v40, %v2211_v30  ;;  %v10596_v23 = vld [vmem:[%s13162_s16 + $0x18] sm:$0xff]  }
 0xea2   :  { %v10597_v24 = vld [vmem:[%s13162_s16 + $0x98] sm:$0xff]  }
 0xea3   :  { %8942 = vmatmul.mubr.msk.bf16.vlgmr.msra.gmra.mxu1 %vm186_vm1, %v11466_v43  ;;  %8943 = vmatmul.mubr.msk.bf16.vlgmr.msra.gmra.mxu0 %vm186_vm1, %v11466_v43  ;;  %v10610_v36 = vld [vmem:[%s13162_s16 + $0x178] sm:$0xff]  }
 0xea4   :  { %2730 = vmatpush1.bf16.msra.mxu1 %v8930_v52  ;;  %2773 = vmatpush1.bf16.msra.mxu0 %v8932_v21  ;;  %v8919_v52 = vcombine.high %v2200_v6, %v2208_v7  ;;  %v8920_v21 = vcombine.low %v2201_v8, %v2209_v9  ;;  %v10579_v6 = vld [vmem:[%s13162_s16 + $0xf8] sm:$0xff]  }
 0xea5   :  { %2731 = vmatprep.subr.bf16.mxu1 %v8915_v44  ;;  %2774 = vmatprep.subr.bf16.mxu0 %v8917_v46  ;;  %v8940_v44 = vcombine.low %v2219_v33, %v2227_v34  ;;  %v2186_v46 = vld [vmem:[%s13161_s14 + $0xb0] sm:$0xff]  ;;  %v10580_v9 = vld [vmem:[%s13162_s16 + $0x38] sm:$0xff]   ;;  %v10604_v33 = vld [vmem:[%s13162_s16 + $0x8] sm:$0xff]  }
 0xea6   :  { %2753 = vmatprep.mubr.bf16.mxu1 %v10927_v18  ;;  %2796 = vmatprep.mubr.bf16.mxu0 %v10927_v18  ;;  %v10605_v34 = vld [vmem:[%s13162_s16 + $0x88] sm:$0xff]   ;;  %v10611_v37 = vld [vmem:[%s13162_s16 + $0x1f8] sm:$0xff]  }
 0xea8   :  { %2732 = vmatpush1.bf16.msra.mxu1 %v8914_v50  ;;  %2775 = vmatpush1.bf16.msra.mxu0 %v8916_v51  ;;  %v2194_v50 = vld [vmem:[%s13161_s14 + $0xf0] sm:$0xff]  ;;  %v2187_v51 = vld [vmem:[%s13161_s14 + $0xb8] sm:$0xff] }
 0xea9   :  { %2733 = vmatprep.subr.bf16.mxu1 %v8899_v58  ;;  %2776 = vmatprep.subr.bf16.mxu0 %v8901_v59  ;;  %v8924_v58 = vcombine.low %v2203_v40, %v2211_v30  ;;  %v2170_v59 = vld [vmem:[%s13161_s14 + $0x30] sm:$0xff]  ;;  %v8907_v63 = vcombine.high %v2186_v46, %v2194_v50  ;;  %v8909_v0 = vcombine.high %v2187_v51, %v2195_v53  ;;  %v2232_v40 = vlaneseq }
 0xeaa   :  { %v8906_v1 = vcombine.low %v2186_v46, %v2194_v50  ;;  %v11717_v46 = vld [vmem:[%s13165_s15] sm:$0xff] }
 0xeab   :  { %v11700_v30 = vshrl.u32 %v2232_v40, 7  ;;  %v10623_v40 = vld [vmem:[%s13162_s16 + $0x1e0] sm:$0xff]  }
 0xeac   :  { %2734 = vmatpush1.bf16.msra.mxu1 %v8898_v60  ;;  %2777 = vmatpush1.bf16.msra.mxu0 %v8900_v61  ;;  %v2178_v60 = vld [vmem:[%s13161_s14 + $0x70] sm:$0xff]  ;;  %v2171_v61 = vld [vmem:[%s13161_s14 + $0x38] sm:$0xff] }
 0xead   :  { %2735 = vmatprep.subr.bf16.mxu1 %v8883_v2  ;;  %2778 = vmatprep.subr.bf16.mxu0 %v8885_v3  ;;  %v8908_v2 = vcombine.low %v2187_v51, %v2195_v53  ;;  %v8891_v3 = vcombine.high %v2170_v59, %v2178_v60  ;;  %v8890_v7 = vcombine.low %v2170_v59, %v2178_v60 }
 0xeae   :  { %v8892_v8 = vcombine.low %v2171_v61, %v2179_v62 }
 0xeb0   :  { %2736 = vmatpush1.bf16.msra.mxu1 %v8882_v4  ;;  %2779 = vmatpush1.bf16.msra.mxu0 %v8884_v5  ;;  %v8893_v4 = vcombine.high %v2171_v61, %v2179_v62  ;;  %v10578_v5 = vld [vmem:[%s13162_s16 + $0x78] sm:$0xff]  }
 0xeb1   :  { %2815 = vmatprep.subr.bf16.mxu1 %v8935_v10  ;;  %2858 = vmatprep.subr.bf16.mxu0 %v8937_v11  ;;  %v10581_v10 = vld [vmem:[%s13162_s16 + $0xb8] sm:$0xff]   ;;  %v10582_v11 = vld [vmem:[%s13162_s16 + $0x70] sm:$0xff]  }
 0xeb3   :  { %8944 = vmatmul.mubr.msk.bf16.vlgmr.msra.gmra.mxu1 %vm186_vm1, %v11466_v43  ;;  %8945 = vmatmul.mubr.msk.bf16.vlgmr.msra.gmra.mxu0 %vm186_vm1, %v11466_v43 }
 0xeb4   :  { %2816 = vmatpush1.bf16.msra.mxu1 %v8934_v12  ;;  %2859 = vmatpush1.bf16.msra.mxu0 %v8936_v13  ;;  %v10583_v12 = vld [vmem:[%s13162_s16 + $0xf0] sm:$0xff]  }
 0xeb5   :  { %2817 = vmatprep.subr.bf16.mxu1 %v8919_v52  ;;  %2860 = vmatprep.subr.bf16.mxu0 %v8921_v19  ;;  %v10584_v13 = vld [vmem:[%s13162_s16 + $0x30] sm:$0xff]   ;;  %v10590_v52 = vld [vmem:[%s13162_s16 + $0x60] sm:$0xff]  }
 0xeb6   :  { %2839 = vmatprep.mubr.bf16.mxu1 %v10927_v18  ;;  %2882 = vmatprep.mubr.bf16.mxu0 %v10927_v18  ;;  %v10591_v19 = vld [vmem:[%s13162_s16 + $0xe0] sm:$0xff]  }
 0xeb8   :  { %2818 = vmatpush1.bf16.msra.mxu1 %v8918_v20  ;;  %2861 = vmatpush1.bf16.msra.mxu0 %v8920_v21  ;;  %v10592_v20 = vld [vmem:[%s13162_s16 + $0x20] sm:$0xff]  }
 0xeb9   :  { %2819 = vmatprep.subr.bf16.mxu1 %v8903_v25  ;;  %2862 = vmatprep.subr.bf16.mxu0 %v8905_v26  ;;  %v10593_v21 = vld [vmem:[%s13162_s16 + $0xa0] sm:$0xff]   ;;  %v10598_v25 = vld [vmem:[%s13162_s16 + $0x50] sm:$0xff]  }
 0xeba   :  { %v10599_v26 = vld [vmem:[%s13162_s16 + $0xd0] sm:$0xff]  }
 0xebc   :  { %2820 = vmatpush1.bf16.msra.mxu1 %v8902_v27  ;;  %2863 = vmatpush1.bf16.msra.mxu0 %v8904_v28  ;;  %v10600_v27 = vld [vmem:[%s13162_s16 + $0x10] sm:$0xff]  }
 0xebd   :  { %2821 = vmatprep.subr.bf16.mxu1 %v8887_v35  ;;  %2864 = vmatprep.subr.bf16.mxu0 %v8889_v45  ;;  %v10601_v28 = vld [vmem:[%s13162_s16 + $0x90] sm:$0xff]   ;;  %v10606_v35 = vld [vmem:[%s13162_s16 + $0x40] sm:$0xff]  }
 0xebe   :  { %v10607_v45 = vld [vmem:[%s13162_s16 + $0xc0] sm:$0xff]  }
 0xec0   :  { %2822 = vmatpush1.bf16.msra.mxu1 %v8886_v48  ;;  %2865 = vmatpush1.bf16.msra.mxu0 %v8888_v49  ;;  %v10608_v48 = vld [vmem:[%s13162_s16] sm:$0xff]  }
 0xec1   :  { %2901 = vmatprep.subr.bf16.mxu1 %v8939_v41  ;;  %2944 = vmatprep.subr.bf16.mxu0 %v8941_v47  ;;  %v10609_v49 = vld [vmem:[%s13162_s16 + $0x80] sm:$0xff]   ;;  %v11703_v41 = vsub.s32 1, %v11700_v30  ;;  %v11706_v47 = vsub.s32 3, %v11700_v30 }
 0xec3   :  { %8946 = vmatmul.mubr.msk.bf16.vlgmr.msra.gmra.mxu1 %vm186_vm1, %v11466_v43  ;;  %8947 = vmatmul.mubr.msk.bf16.vlgmr.msra.gmra.mxu0 %vm186_vm1, %v11466_v43  ;;  %v2239_v53 = vrot.slane %v11717_v46, %v11703_v41 }
 0xec4   :  { %2902 = vmatpush1.bf16.msra.mxu1 %v8938_v42  ;;  %2945 = vmatpush1.bf16.msra.mxu0 %v8940_v44  ;;  %v11709_v42 = vsub.s32 0, %v11700_v30  ;;  %v11712_v44 = vsub.s32 2, %v11700_v30 }
 0xec5   :  { %2903 = vmatprep.subr.bf16.mxu1 %v8923_v55  ;;  %2946 = vmatprep.subr.bf16.mxu0 %v8925_v56  ;;  %v2247_v55 = vrot.slane %v11717_v46, %v11706_v47 }
 0xec6   :  { %2925 = vmatprep.mubr.bf16.mxu1 %v10927_v18  ;;  %2968 = vmatprep.mubr.bf16.mxu0 %v10927_v18  ;;  %v2235_v56 = vrot.slane %v11717_v46, %v11709_v42 }
 0xec8   :  { %2904 = vmatpush1.bf16.msra.mxu1 %v8922_v57  ;;  %2947 = vmatpush1.bf16.msra.mxu0 %v8924_v58  ;;  %v2243_v57 = vrot.slane %v11717_v46, %v11712_v44 }
 0xec9   :  { %2905 = vmatprep.subr.bf16.mxu1 %v8907_v63  ;;  %2948 = vmatprep.subr.bf16.mxu0 %v8909_v0 }
 0xecc   :  { %2906 = vmatpush1.bf16.msra.mxu1 %v8906_v1  ;;  %2949 = vmatpush1.bf16.msra.mxu0 %v8908_v2 }
 0xecd   :  { %2907 = vmatprep.subr.bf16.mxu1 %v8891_v3  ;;  %2950 = vmatprep.subr.bf16.mxu0 %v8893_v4 }
 0xed0   :  { %2908 = vmatpush1.bf16.msra.mxu1 %v8890_v7  ;;  %2951 = vmatpush1.bf16.msra.mxu0 %v8892_v8 }
 0xed1   :  { %9776 = vmatprep.subr.bf16.mxu1 %v10578_v5  ;;  %9798 = vmatprep.subr.bf16.mxu0 %v10579_v6 }
 0xed3   :  { %8948 = vmatmul.mubr.msk.bf16.vlgmr.msra.gmra.mxu1 %vm186_vm1, %v11466_v43  ;;  %8949 = vmatmul.mubr.msk.bf16.vlgmr.msra.gmra.mxu0 %vm186_vm1, %v11466_v43  ;;  %v10589_v43 = vld [vmem:[%s13162_s16 + $0xa8] sm:$0xff]  }
 0xed4   :  { %9777 = vmatpush3.bf16.msra.mxu1 %v10580_v9  ;;  %9799 = vmatpush3.bf16.msra.mxu0 %v10581_v10 }
 0xed5   :  { %9778 = vmatprep.subr.bf16.mxu1 %v10582_v11  ;;  %9800 = vmatprep.subr.bf16.mxu0 %v10583_v12 }
 0xed8   :  { %9779 = vmatpush3.bf16.msra.mxu1 %v10584_v13  ;;  %9801 = vmatpush3.bf16.msra.mxu0 %v10585_v14 }
 0xed9   :  { %9780 = vmatprep.subr.bf16.mxu1 %v10586_v15  ;;  %9802 = vmatprep.subr.bf16.mxu0 %v10587_v16 }
 0xedc   :  { %9781 = vmatpush3.bf16.msra.mxu1 %v10588_v17  ;;  %9803 = vmatpush3.bf16.msra.mxu0 %v10589_v43  ;;  %v10612_v43 = vld [vmem:[%s13162_s16 + $0x138] sm:$0xff]  }
 0xedd   :  { %9782 = vmatprep.subr.bf16.mxu1 %v10590_v52  ;;  %9804 = vmatprep.subr.bf16.mxu0 %v10591_v19  ;;  %v10613_v52 = vld [vmem:[%s13162_s16 + $0x1b8] sm:$0xff]  }
 0xee0   :  { %9783 = vmatpush3.bf16.msra.mxu1 %v10592_v20  ;;  %9805 = vmatpush3.bf16.msra.mxu0 %v10593_v21  ;;  %v10614_v21 = vld [vmem:[%s13162_s16 + $0x170] sm:$0xff]  }
 0xee1   :  { %9784 = vmatprep.subr.bf16.mxu1 %v10594_v54  ;;  %9806 = vmatprep.subr.bf16.mxu0 %v10595_v22  ;;  %v10615_v54 = vld [vmem:[%s13162_s16 + $0x1f0] sm:$0xff]   ;;  %v11740_v22 = vsub.s32 5, %v11700_v30 }
 0xee4   :  { %9785 = vmatpush3.bf16.msra.mxu1 %v10596_v23  ;;  %9807 = vmatpush3.bf16.msra.mxu0 %v10597_v24  ;;  %v11743_v23 = vsub.s32 7, %v11700_v30  ;;  %v10616_v24 = vld [vmem:[%s13162_s16 + $0x130] sm:$0xff]  }
 0xee5   :  { %9786 = vmatprep.subr.bf16.mxu1 %v10598_v25  ;;  %9808 = vmatprep.subr.bf16.mxu0 %v10599_v26  ;;  %v10617_v25 = vld [vmem:[%s13162_s16 + $0x1b0] sm:$0xff]  }
 0xee8   :  { %9787 = vmatpush3.bf16.msra.mxu1 %v10600_v27  ;;  %9809 = vmatpush3.bf16.msra.mxu0 %v10601_v28  ;;  %v10618_v28 = vld [vmem:[%s13162_s16 + $0x168] sm:$0xff]  }
 0xee9   :  { %9788 = vmatprep.subr.bf16.mxu1 %v10602_v29  ;;  %9810 = vmatprep.subr.bf16.mxu0 %v10603_v32  ;;  %v10619_v29 = vld [vmem:[%s13162_s16 + $0x1e8] sm:$0xff]   ;;  %v2255_v32 = vrot.slane %v11717_v46, %v11740_v22 }
 0xeec   :  { %9789 = vmatpush3.bf16.msra.mxu1 %v10604_v33  ;;  %9811 = vmatpush3.bf16.msra.mxu0 %v10605_v34  ;;  %v2263_v33 = vrot.slane %v11717_v46, %v11743_v23 }
 0xeed   :  { %9790 = vmatprep.subr.bf16.mxu1 %v10606_v35  ;;  %9812 = vmatprep.subr.bf16.mxu0 %v10607_v45  ;;  %v10620_v45 = vld [vmem:[%s13162_s16 + $0x128] sm:$0xff]  }
 0xef0   :  { %9791 = vmatpush3.bf16.msra.mxu1 %v10608_v48  ;;  %9813 = vmatpush3.bf16.msra.mxu0 %v10609_v49  ;;  %v10621_v48 = vld [vmem:[%s13162_s16 + $0x1a8] sm:$0xff]  }
 0xef1   :  { %9820 = vmatprep.subr.bf16.mxu1 %v10610_v36  ;;  %9842 = vmatprep.subr.bf16.mxu0 %v10611_v37  ;;  %v10622_v37 = vld [vmem:[%s13162_s16 + $0x160] sm:$0xff]  }
 0xf63   :  { %v2669_v50 = vpop.f32.mrf.mxu1  ;;  %v2712_v51 = vpop.f32.mrf.mxu0 }
 0xf64   :  { %v2670_v2 = vadd.f32 %v2669_v50, %v2235_v56  ;;  %v2713_v3 = vadd.f32 %v2712_v51, %v2243_v57 }
 0xf65   :  { %v2671_v58 = vpop.f32.mrf.mxu1  ;;  %v2714_v59 = vpop.f32.mrf.mxu0 }
 0xf66   :  { %v2672_v62 = vadd.f32 %v2671_v58, %v2239_v53  ;;  %v2715_v63 = vadd.f32 %v2714_v59, %v2247_v55  ;;  %v2979_v14 = vmax.f32 %v2670_v2, 0.0  ;;  %v2981_v15 = vmax.f32 %v2713_v3, 0.0  ;;  %v10624_v58 = vld [vmem:[%s13162_s16 + $0x120] sm:$0xff]  }
 0xf67   :  { %v2673_v60 = vpop.f32.mrf.mxu1  ;;  %v2716_v61 = vpop.f32.mrf.mxu0  ;;  %v10625_v59 = vld [vmem:[%s13162_s16 + $0x1a0] sm:$0xff]  }
 0xf68   :  { %v2674_v0 = vadd.f32 %v2673_v60, %v2235_v56  ;;  %v2717_v1 = vadd.f32 %v2716_v61, %v2243_v57  ;;  %v2980_v10 = vmax.f32 %v2672_v62, 0.0  ;;  %v2982_v11 = vmax.f32 %v2715_v63, 0.0  ;;  %v10626_v60 = vld [vmem:[%s13162_s16 + $0x158] sm:$0xff]  }
 0xf69   :  { %v2675_v4 = vpop.f32.mrf.mxu1  ;;  %v2718_v5 = vpop.f32.mrf.mxu0  ;;  %v10627_v61 = vld [vmem:[%s13162_s16 + $0x1d8] sm:$0xff]  }
 0xf6a   :  { %v2676_v6 = vadd.f32 %v2675_v4, %v2239_v53  ;;  %v2719_v7 = vadd.f32 %v2718_v5, %v2247_v55  ;;  %v2995_v8 = vmax.f32 %v2674_v0, 0.0  ;;  %v2997_v9 = vmax.f32 %v2717_v1, 0.0  ;;  %v10628_v4 = vld [vmem:[%s13162_s16 + $0x118] sm:$0xff]  }
 0xf6b   :  { %v10629_v5 = vld [vmem:[%s13162_s16 + $0x198] sm:$0xff]  }
 0xf6c   :  { %v2996_v12 = vmax.f32 %v2676_v6, 0.0  ;;  %v2998_v13 = vmax.f32 %v2719_v7, 0.0  ;;  %v3011_v19 = vpack.c.bf16 %v2995_v8, %v2979_v14  ;;  %v3013_v20 = vpack.c.bf16 %v2997_v9, %v2981_v15  ;;  %v10630_v6 = vld [vmem:[%s13162_s16 + $0x150] sm:$0xff]   ;;  %v10635_v14 = vld [vmem:[%s13162_s16 + $0x1c8] sm:$0xff]  }
 0xf6d   :  { %v10631_v7 = vld [vmem:[%s13162_s16 + $0x1d0] sm:$0xff]   ;;  %v11802_v8 = vsub.s32 4, %v11700_v30  ;;  %v11805_v9 = vsub.s32 6, %v11700_v30  ;;  %v10634_v30 = vld [vmem:[%s13162_s16 + $0x148] sm:$0xff]  }
 0xf6e   :  { %v3012_v16 = vpack.c.bf16 %v2996_v12, %v2980_v10  ;;  %v3014_v17 = vpack.c.bf16 %v2998_v13, %v2982_v11  ;;  %v10632_v10 = vld [vmem:[%s13162_s16 + $0x110] sm:$0xff]  }
 0xf6f   :  { %v10633_v11 = vld [vmem:[%s13162_s16 + $0x190] sm:$0xff]   ;;  %v2251_v15 = vrot.slane %v11717_v46, %v11802_v8 }
 0xf70   :  { %4090 = vmatprep.mubr.bf16.mxu1 %v3012_v16  ;;  %4131 = vmatprep.mubr.bf16.mxu0 %v3014_v17  ;;  %v2259_v16 = vrot.slane %v11717_v46, %v11805_v9  ;;  %v11830_v17 = vld [vmem:[%s13165_s15 + $0x8] sm:$0xff] }
 0xf71   :  { %4091 = vmatmul.mubr.bf16.vlgmr.msra.gmra.mxu1 %v3011_v19  ;;  %4132 = vmatmul.mubr.bf16.vlgmr.msra.gmra.mxu0 %v3013_v20  ;;  %v2271_v19 = vrot.slane %v11830_v17, %v11703_v41  ;;  %v10636_v20 = vld [vmem:[%s13162_s16 + $0x108] sm:$0xff]  }
 0xf72   :  { %9821 = vmatpush3.bf16.msra.mxu1 %v10612_v43  ;;  %9843 = vmatpush3.bf16.msra.mxu0 %v10613_v52  ;;  %v10637_v46 = vld [vmem:[%s13162_s16 + $0x188] sm:$0xff]  }
 0xf73   :  { %v11751_v26 = vpop.f32.mrf.mxu1  ;;  %v11753_v27 = vpop.f32.mrf.mxu0  ;;  %9822 = vmatprep.subr.bf16.mxu1 %v10614_v21  ;;  %9844 = vmatprep.subr.bf16.mxu0 %v10615_v54 }
 0xf75   :  { %v2757_v34 = vpop.f32.mrf.mxu1  ;;  %v2800_v35 = vpop.f32.mrf.mxu0 }
 0xf76   :  { %9823 = vmatpush3.bf16.msra.mxu1 %v10616_v24  ;;  %9845 = vmatpush3.bf16.msra.mxu0 %v10617_v25  ;;  %v2758_v50 = vadd.f32 %v2757_v34, %v2255_v32  ;;  %v2801_v51 = vadd.f32 %v2800_v35, %v2263_v33  ;;  %v2279_v24 = vrot.slane %v11830_v17, %v11706_v47 }
 0xf77   :  { %v2759_v49 = vpop.f32.mrf.mxu1  ;;  %v2802_v36 = vpop.f32.mrf.mxu0  ;;  %9824 = vmatprep.subr.bf16.mxu1 %v10618_v28  ;;  %9846 = vmatprep.subr.bf16.mxu0 %v10619_v29  ;;  %v10638_v29 = vld [vmem:[%s13162_s16 + $0x140] sm:$0xff]   ;;  %v2799_v34 = vadd.f32 %v11753_v27, %v2259_v16  ;;  %v10642_v27 = vld [vmem:[%s13162_s16 + $0x278] sm:$0xff]  }
 0xf78   :  { %v2984_v62 = vmax.f32 %v2758_v50, 0.0  ;;  %v2986_v63 = vmax.f32 %v2801_v51, 0.0  ;;  %v2760_v21 = vadd.f32 %v2759_v49, %v2251_v15  ;;  %v2803_v54 = vadd.f32 %v2802_v36, %v2259_v16 }
 0xf79   :  { %v2761_v53 = vpop.f32.mrf.mxu1  ;;  %v2804_v55 = vpop.f32.mrf.mxu0 }
 0xf7a   :  { %v2762_v56 = vadd.f32 %v2761_v53, %v2255_v32  ;;  %v2805_v57 = vadd.f32 %v2804_v55, %v2263_v33  ;;  %9825 = vmatpush3.bf16.msra.mxu1 %v10620_v45  ;;  %9847 = vmatpush3.bf16.msra.mxu0 %v10621_v48  ;;  %v10639_v32 = vld [vmem:[%s13162_s16 + $0x1c0] sm:$0xff]   ;;  %v2756_v33 = vadd.f32 %v11751_v26, %v2251_v15  ;;  %v2999_v50 = vmax.f32 %v2760_v21, 0.0  ;;  %v10643_v53 = vld [vmem:[%s13162_s16 + $0x2f8] sm:$0xff]  }
 0xf7b   :  { %9826 = vmatprep.subr.bf16.mxu1 %v10622_v37  ;;  %9848 = vmatprep.subr.bf16.mxu0 %v10623_v40  ;;  %v10640_v37 = vld [vmem:[%s13162_s16 + $0x100] sm:$0xff]   ;;  %v3001_v51 = vmax.f32 %v2803_v54, 0.0  ;;  %v10660_v54 = vld [vmem:[%s13162_s16 + $0x218] sm:$0xff]  }
 0xf7c   :  { %v3000_v0 = vmax.f32 %v2762_v56, 0.0  ;;  %v3002_v1 = vmax.f32 %v2805_v57, 0.0  ;;  %v10641_v40 = vld [vmem:[%s13162_s16 + $0x180] sm:$0xff]   ;;  %v2983_v56 = vmax.f32 %v2756_v33, 0.0  ;;  %v2985_v57 = vmax.f32 %v2799_v34, 0.0  ;;  %v10663_v33 = vld [vmem:[%s13162_s16 + $0x2d0] sm:$0xff]  }
 0xf7d   :  { %v10655_v15 = vld [vmem:[%s13162_s16 + $0x2e0] sm:$0xff]  }
 0xf7e   :  { %v3016_v2 = vpack.c.bf16 %v3000_v0, %v2984_v62  ;;  %v3018_v3 = vpack.c.bf16 %v3002_v1, %v2986_v63  ;;  %9827 = vmatpush3.bf16.msra.mxu1 %v10624_v58  ;;  %9849 = vmatpush3.bf16.msra.mxu0 %v10625_v59  ;;  %v3017_v62 = vpack.c.bf16 %v3001_v51, %v2985_v57  ;;  %v10645_v0 = vld [vmem:[%s13162_s16 + $0x2b8] sm:$0xff]   ;;  %v10668_v51 = vld [vmem:[%s13162_s16 + $0x208] sm:$0xff]  }
 0xf7f   :  { %9828 = vmatprep.subr.bf16.mxu1 %v10626_v60  ;;  %9850 = vmatprep.subr.bf16.mxu0 %v10627_v61  ;;  %v10644_v60 = vld [vmem:[%s13162_s16 + $0x238] sm:$0xff]   ;;  %v3015_v61 = vpack.c.bf16 %v2999_v50, %v2983_v56  ;;  %v10670_v56 = vld [vmem:[%s13162_s16 + $0x240] sm:$0xff]  }
 0xf80   :  { %4172 = vmatprep.mubr.bf16.mxu1 %v3016_v2  ;;  %4213 = vmatprep.mubr.bf16.mxu0 %v3018_v3  ;;  %v10646_v2 = vld [vmem:[%s13162_s16 + $0x270] sm:$0xff]  }
 0xf81   :  { %v10647_v3 = vld [vmem:[%s13162_s16 + $0x2f0] sm:$0xff]  }
 0xf82   :  { %9829 = vmatpush3.bf16.msra.mxu1 %v10628_v4  ;;  %9851 = vmatpush3.bf16.msra.mxu0 %v10629_v5  ;;  %v10648_v5 = vld [vmem:[%s13162_s16 + $0x230] sm:$0xff]  }
 0xf83   :  { %v11813_v12 = vpop.f32.mrf.mxu1  ;;  %v11815_v13 = vpop.f32.mrf.mxu0  ;;  %9830 = vmatprep.subr.bf16.mxu1 %v10630_v6  ;;  %9852 = vmatprep.subr.bf16.mxu0 %v10631_v7  ;;  %v10649_v6 = vld [vmem:[%s13162_s16 + $0x2b0] sm:$0xff]   ;;  %v10650_v7 = vld [vmem:[%s13162_s16 + $0x268] sm:$0xff]  }
 0xf85   :  { %v2843_v43 = vpop.f32.mrf.mxu1  ;;  %v2886_v52 = vpop.f32.mrf.mxu0 }
 0xf86   :  { %9831 = vmatpush3.bf16.msra.mxu1 %v10632_v10  ;;  %9853 = vmatpush3.bf16.msra.mxu0 %v10633_v11  ;;  %v2844_v48 = vadd.f32 %v2843_v43, %v2271_v19  ;;  %v2887_v26 = vadd.f32 %v2886_v52, %v2279_v24  ;;  %v10651_v10 = vld [vmem:[%s13162_s16 + $0x2e8] sm:$0xff]   ;;  %v10656_v43 = vld [vmem:[%s13162_s16 + $0x220] sm:$0xff]  }
 0xf87   :  { %v11842_v25 = vpop.f32.mrf.mxu1  ;;  %v11844_v28 = vpop.f32.mrf.mxu0  ;;  %9832 = vmatprep.subr.bf16.mxu1 %v10634_v30  ;;  %9854 = vmatprep.subr.bf16.mxu0 %v10635_v14  ;;  %v10652_v11 = vld [vmem:[%s13162_s16 + $0x228] sm:$0xff]   ;;  %v10654_v14 = vld [vmem:[%s13162_s16 + $0x260] sm:$0xff]  }
 0xf88   :  { %v2988_v59 = vmax.f32 %v2844_v48, 0.0  ;;  %v2990_v63 = vmax.f32 %v2887_v26, 0.0  ;;  %v10653_v30 = vld [vmem:[%s13162_s16 + $0x2a8] sm:$0xff]   ;;  %v10665_v48 = vld [vmem:[%s13162_s16 + $0x290] sm:$0xff]  }
 0xf89   :  { %v2847_v35 = vpop.f32.mrf.mxu1  ;;  %v2890_v45 = vpop.f32.mrf.mxu0 }
 0xf8a   :  { %v2848_v49 = vadd.f32 %v2847_v35, %v2271_v19  ;;  %v2891_v36 = vadd.f32 %v2890_v45, %v2279_v24  ;;  %9833 = vmatpush3.bf16.msra.mxu1 %v10636_v20  ;;  %9855 = vmatpush3.bf16.msra.mxu0 %v10637_v46  ;;  %v10657_v19 = vld [vmem:[%s13162_s16 + $0x2a0] sm:$0xff]   ;;  %v10658_v20 = vld [vmem:[%s13162_s16 + $0x258] sm:$0xff]   ;;  %v10664_v35 = vld [vmem:[%s13162_s16 + $0x210] sm:$0xff]  }
 0xf8b   :  { %9834 = vmatprep.subr.bf16.mxu1 %v10638_v29  ;;  %9856 = vmatprep.subr.bf16.mxu0 %v10639_v32  ;;  %v10659_v46 = vld [vmem:[%s13162_s16 + $0x2d8] sm:$0xff]   ;;  %v10662_v32 = vld [vmem:[%s13162_s16 + $0x250] sm:$0xff]  }
 0xf8c   :  { %v3004_v55 = vmax.f32 %v2848_v49, 0.0  ;;  %v3006_v58 = vmax.f32 %v2891_v36, 0.0  ;;  %v10661_v29 = vld [vmem:[%s13162_s16 + $0x298] sm:$0xff]   ;;  %v10666_v49 = vld [vmem:[%s13162_s16 + $0x248] sm:$0xff]  }
 0xf8d   :  { %v10667_v36 = vld [vmem:[%s13162_s16 + $0x2c8] sm:$0xff]  }
 0xf8e   :  { %9835 = vmatpush3.bf16.msra.mxu1 %v10640_v37  ;;  %9857 = vmatpush3.bf16.msra.mxu0 %v10641_v40  ;;  %v3020_v1 = vpack.c.bf16 %v3004_v55, %v2988_v59  ;;  %v3022_v4 = vpack.c.bf16 %v3006_v58, %v2990_v63  ;;  %v2267_v37 = vrot.slane %v11830_v17, %v11709_v42  ;;  %v10669_v55 = vld [vmem:[%s13162_s16 + $0x288] sm:$0xff]   ;;  %v10672_v63 = vld [vmem:[%s13162_s16 + $0x200] sm:$0xff]  }
 0xf8f   :  { %9864 = vmatprep.subr.bf16.mxu1 %v10642_v27  ;;  %9886 = vmatprep.subr.bf16.mxu0 %v10643_v53  ;;  %v2275_v40 = vrot.slane %v11830_v17, %v11712_v44  ;;  %v2287_v27 = vrot.slane %v11830_v17, %v11740_v22  ;;  %v2295_v58 = vrot.slane %v11830_v17, %v11743_v23 }
 0xf90   :  { %v2846_v26 = vadd.f32 %v11842_v25, %v2267_v37  ;;  %v10671_v25 = vld [vmem:[%s13162_s16 + $0x2c0] sm:$0xff]   ;;  %v2842_v59 = vadd.f32 %v11813_v12, %v2267_v37  ;;  %v10674_v12 = vld [vmem:[%s13162_s16 + $0x378] sm:$0xff]  }
 0xf91   :  { %4173 = vmatmul.mubr.bf16.vlgmr.msra.gmra.mxu1 %v3015_v61  ;;  %4214 = vmatmul.mubr.bf16.vlgmr.msra.gmra.mxu0 %v3017_v62  ;;  %v2889_v57 = vadd.f32 %v11844_v28, %v2275_v40  ;;  %v2885_v61 = vadd.f32 %v11815_v13, %v2275_v40  ;;  %v10689_v37 = vld [vmem:[%s13162_s16 + $0x3a0] sm:$0xff]   ;;  %v10690_v40 = vld [vmem:[%s13162_s16 + $0x358] sm:$0xff]  }
 0xf92   :  { %9865 = vmatpush3.bf16.msra.mxu1 %v10644_v60  ;;  %4254 = vmatprep.mubr.bf16.mxu1 %v3020_v1  ;;  %v3003_v28 = vmax.f32 %v2846_v26, 0.0  ;;  %v10673_v1 = vld [vmem:[%s13162_s16 + $0x280] sm:$0xff]   ;;  %v10693_v26 = vld [vmem:[%s13162_s16 + $0x398] sm:$0xff]  }
 0xf93   :  { %9887 = vmatpush3.bf16.msra.mxu0 %v10645_v0  ;;  %4295 = vmatprep.mubr.bf16.mxu0 %v3022_v4  ;;  %v11902_v16 = vpop.f32.mrf.mxu1  ;;  %v11907_v52 = vpop.f32.mrf.mxu0  ;;  %v2987_v4 = vmax.f32 %v2842_v59, 0.0  ;;  %v2291_v59 = vrot.slane %v11830_v17, %v11805_v9 }
 0xf94   :  { %9866 = vmatprep.subr.bf16.mxu1 %v10646_v2  ;;  %9888 = vmatprep.subr.bf16.mxu0 %v10647_v3  ;;  %v3005_v2 = vmax.f32 %v2889_v57, 0.0  ;;  %v10675_v3 = vld [vmem:[%s13162_s16 + $0x3f8] sm:$0xff]   ;;  %v10698_v57 = vld [vmem:[%s13162_s16 + $0x348] sm:$0xff]  }
 0xf95   :  { %v2929_v21 = vpop.f32.mrf.mxu1  ;;  %v2972_v24 = vpop.f32.mrf.mxu0 }
 0xf96   :  { %9867 = vmatpush3.bf16.msra.mxu1 %v10648_v5  ;;  %v2930_v0 = vadd.f32 %v2929_v21, %v2287_v27  ;;  %v2973_v13 = vadd.f32 %v2972_v24, %v2295_v58  ;;  %v10681_v24 = vld [vmem:[%s13162_s16 + $0x3b0] sm:$0xff]  }
 0xf97   :  { %9889 = vmatpush3.bf16.msra.mxu0 %v10649_v6  ;;  %9868 = vmatprep.subr.bf16.mxu1 %v10650_v7  ;;  %v11930_v34 = vpop.f32.mrf.mxu1  ;;  %v11935_v45 = vpop.f32.mrf.mxu0  ;;  %v2989_v6 = vmax.f32 %v2885_v61, 0.0 }
 0xf98   :  { %9890 = vmatprep.subr.bf16.mxu0 %v10651_v10  ;;  %v10676_v10 = vld [vmem:[%s13162_s16 + $0x338] sm:$0xff]  }
 0xf99   :  { %v2933_v50 = vpop.f32.mrf.mxu1  ;;  %v2976_v53 = vpop.f32.mrf.mxu0 }
 0xf9a   :  { %9869 = vmatpush3.bf16.msra.mxu1 %v10652_v11  ;;  %v2934_v60 = vadd.f32 %v2933_v50, %v2287_v27  ;;  %v2977_v62 = vadd.f32 %v2976_v53, %v2295_v58  ;;  %v3019_v11 = vpack.c.bf16 %v3003_v28, %v2987_v4  ;;  %v10691_v50 = vld [vmem:[%s13162_s16 + $0x3d8] sm:$0xff]   ;;  %v10694_v27 = vld [vmem:[%s13162_s16 + $0x350] sm:$0xff]   ;;  %v10699_v58 = vld [vmem:[%s13162_s16 + $0x3c8] sm:$0xff]   ;;  %v2975_v28 = vadd.f32 %v11935_v45, %v2291_v59 }
 0xf9b   :  { %9891 = vmatpush3.bf16.msra.mxu0 %v10653_v30  ;;  %9870 = vmatprep.subr.bf16.mxu1 %v10654_v14  ;;  %v2992_v30 = vmax.f32 %v2930_v0, 0.0  ;;  %v10677_v14 = vld [vmem:[%s13162_s16 + $0x3b8] sm:$0xff]   ;;  %v10695_v53 = vld [vmem:[%s13162_s16 + $0x3d0] sm:$0xff]   ;;  %v10705_v45 = vld [vmem:[%s13162_s16 + $0x380] sm:$0xff]  }
 0xf9c   :  { %9892 = vmatprep.subr.bf16.mxu0 %v10655_v15  ;;  %v3008_v5 = vmax.f32 %v2934_v60, 0.0  ;;  %v3010_v7 = vmax.f32 %v2977_v62, 0.0  ;;  %v3021_v15 = vpack.c.bf16 %v3005_v2, %v2989_v6  ;;  %v10700_v60 = vld [vmem:[%s13162_s16 + $0x308] sm:$0xff]   ;;  %v3009_v2 = vmax.f32 %v2975_v28, 0.0 }
 0xf9d   :  { %v10701_v62 = vld [vmem:[%s13162_s16 + $0x388] sm:$0xff]  }
 0xf9e   :  { %9871 = vmatpush3.bf16.msra.mxu1 %v10656_v43  ;;  %v2994_v43 = vmax.f32 %v2973_v13, 0.0 }
 0xf9f   :  { %9893 = vmatpush3.bf16.msra.mxu0 %v10657_v19  ;;  %9872 = vmatprep.subr.bf16.mxu1 %v10658_v20  ;;  %v10678_v19 = vld [vmem:[%s13162_s16 + $0x370] sm:$0xff]   ;;  %v3024_v20 = vpack.c.bf16 %v3008_v5, %v2992_v30 }
 0xfa0   :  { %9894 = vmatprep.subr.bf16.mxu0 %v10659_v46  ;;  %v10679_v46 = vld [vmem:[%s13162_s16 + $0x3f0] sm:$0xff]   ;;  %v3026_v21 = vpack.c.bf16 %v3010_v7, %v2994_v43 }
 0xfa2   :  { %9873 = vmatpush3.bf16.msra.mxu1 %v10660_v54  ;;  %v10680_v54 = vld [vmem:[%s13162_s16 + $0x330] sm:$0xff]  }
 0xfa3   :  { %9895 = vmatpush3.bf16.msra.mxu0 %v10661_v29  ;;  %9874 = vmatprep.subr.bf16.mxu1 %v10662_v32  ;;  %v10682_v29 = vld [vmem:[%s13162_s16 + $0x368] sm:$0xff]  }
 0xfa4   :  { %9896 = vmatprep.subr.bf16.mxu0 %v10663_v33  ;;  %v10683_v32 = vld [vmem:[%s13162_s16 + $0x3e8] sm:$0xff]  }
 0xfa5   :  { %v10684_v33 = vld [vmem:[%s13162_s16 + $0x328] sm:$0xff]  }
 0xfa6   :  { %9875 = vmatpush3.bf16.msra.mxu1 %v10664_v35  ;;  %v10685_v35 = vld [vmem:[%s13162_s16 + $0x3a8] sm:$0xff]  }
 0xfa7   :  { %9897 = vmatpush3.bf16.msra.mxu0 %v10665_v48  ;;  %9876 = vmatprep.subr.bf16.mxu1 %v10666_v49  ;;  %v10686_v48 = vld [vmem:[%s13162_s16 + $0x360] sm:$0xff]  }
 0xfa8   :  { %9898 = vmatprep.subr.bf16.mxu0 %v10667_v36  ;;  %v10687_v49 = vld [vmem:[%s13162_s16 + $0x3e0] sm:$0xff]  }
 0xfa9   :  { %v10688_v36 = vld [vmem:[%s13162_s16 + $0x320] sm:$0xff]  }
 0xfaa   :  { %9877 = vmatpush3.bf16.msra.mxu1 %v10668_v51  ;;  %v10692_v51 = vld [vmem:[%s13162_s16 + $0x318] sm:$0xff]  }
 0xfab   :  { %9899 = vmatpush3.bf16.msra.mxu0 %v10669_v55  ;;  %9878 = vmatprep.subr.bf16.mxu1 %v10670_v56  ;;  %v10696_v55 = vld [vmem:[%s13162_s16 + $0x310] sm:$0xff]  }
 0xfac   :  { %9900 = vmatprep.subr.bf16.mxu0 %v10671_v25  ;;  %v10697_v56 = vld [vmem:[%s13162_s16 + $0x390] sm:$0xff]   ;;  %v2283_v25 = vrot.slane %v11830_v17, %v11802_v8  ;;  %v10703_v17 = vld [vmem:[%s13162_s16 + $0x3c0] sm:$0xff]  }
 0xfae   :  { %9879 = vmatpush3.bf16.msra.mxu1 %v10672_v63  ;;  %v2932_v61 = vadd.f32 %v11930_v34, %v2283_v25  ;;  %v10702_v63 = vld [vmem:[%s13162_s16 + $0x340] sm:$0xff]   ;;  %v2928_v0 = vadd.f32 %v11902_v16, %v2283_v25  ;;  %v2971_v34 = vadd.f32 %v11907_v52, %v2291_v59 }
 0xfaf   :  { %9901 = vmatpush3.bf16.msra.mxu0 %v10673_v1  ;;  %9908 = vmatprep.subr.bf16.mxu1 %v10674_v12  ;;  %v10704_v1 = vld [vmem:[%s13162_s16 + $0x300] sm:$0xff]  }
 0xfb0   :  { %9930 = vmatprep.subr.bf16.mxu0 %v10675_v3  ;;  %v3007_v12 = vmax.f32 %v2932_v61, 0.0  ;;  %v2991_v13 = vmax.f32 %v2928_v0, 0.0  ;;  %v2993_v3 = vmax.f32 %v2971_v34, 0.0 }
 0xfb1   :  { %4255 = vmatmul.mubr.bf16.vlgmr.msra.gmra.mxu1 %v3019_v11 }
 0xfb2   :  { %4296 = vmatmul.mubr.bf16.vlgmr.msra.gmra.mxu0 %v3021_v15  ;;  %9909 = vmatpush3.bf16.msra.mxu1 %v10676_v10  ;;  %v3023_v16 = vpack.c.bf16 %v3007_v12, %v2991_v13  ;;  %v3025_v52 = vpack.c.bf16 %v3009_v2, %v2993_v3 }
 0xfb3   :  { %4336 = vmatprep.mubr.bf16.mxu1 %v3024_v20  ;;  %9931 = vmatpush3.bf16.msra.mxu0 %v10677_v14 }
 0xfb4   :  { %4377 = vmatprep.mubr.bf16.mxu0 %v3026_v21  ;;  %9910 = vmatprep.subr.bf16.mxu1 %v10678_v19 }
 0xfb5   :  { %9932 = vmatprep.subr.bf16.mxu0 %v10679_v46 }
 0xfb6   :  { %9911 = vmatpush3.bf16.msra.mxu1 %v10680_v54 }
 0xfb7   :  { %9933 = vmatpush3.bf16.msra.mxu0 %v10681_v24  ;;  %9912 = vmatprep.subr.bf16.mxu1 %v10682_v29  ;;  %v8950_v29 = vld [vmem:[%s13166_s17] ss:$0 sm:$0xff] }
 0xfb8   :  { %9934 = vmatprep.subr.bf16.mxu0 %v10683_v32 }
 0xfba   :  { %9913 = vmatpush3.bf16.msra.mxu1 %v10684_v33 }
 0xfbb   :  { %9935 = vmatpush3.bf16.msra.mxu0 %v10685_v35  ;;  %9914 = vmatprep.subr.bf16.mxu1 %v10686_v48 }
 0xfbc   :  { %9936 = vmatprep.subr.bf16.mxu0 %v10687_v49 }
 0xfbe   :  { %9915 = vmatpush3.bf16.msra.mxu1 %v10688_v36 }
 0xfbf   :  { %9937 = vmatpush3.bf16.msra.mxu0 %v10689_v37  ;;  %9916 = vmatprep.subr.bf16.mxu1 %v10690_v40 }
 0xfc0   :  { %9938 = vmatprep.subr.bf16.mxu0 %v10691_v50 }
 0xfc2   :  { %9917 = vmatpush3.bf16.msra.mxu1 %v10692_v51 }
 0xfc3   :  { %9939 = vmatpush3.bf16.msra.mxu0 %v10693_v26  ;;  %9918 = vmatprep.subr.bf16.mxu1 %v10694_v27 }
 0xfc4   :  { %9940 = vmatprep.subr.bf16.mxu0 %v10695_v53 }
 0xfc6   :  { %9919 = vmatpush3.bf16.msra.mxu1 %v10696_v55 }
 0xfc7   :  { %9941 = vmatpush3.bf16.msra.mxu0 %v10697_v56  ;;  %9920 = vmatprep.subr.bf16.mxu1 %v10698_v57 }
 0xfc8   :  { %9942 = vmatprep.subr.bf16.mxu0 %v10699_v58 }
 0xfca   :  { %9921 = vmatpush3.bf16.msra.mxu1 %v10700_v60 }
 0xfcb   :  { %9943 = vmatpush3.bf16.msra.mxu0 %v10701_v62  ;;  %9922 = vmatprep.subr.bf16.mxu1 %v10702_v63 }
 0xfcc   :  { %9944 = vmatprep.subr.bf16.mxu0 %v10703_v17 }
 0xfce   :  { %9923 = vmatpush3.bf16.msra.mxu1 %v10704_v1 }
 0xfcf   :  { %9945 = vmatpush3.bf16.msra.mxu0 %v10705_v45 }
 0xfd1   :  { %4337 = vmatmul.mubr.bf16.vlgmr.msra.gmra.mxu1 %v3023_v16 }
 0xfd2   :  { %4378 = vmatmul.mubr.bf16.vlgmr.msra.gmra.mxu0 %v3025_v52 }
0x1031   :  { %v9792_v4 = vpop.f32.mrf.mxu1  ;;  %v9814_v5 = vpop.f32.mrf.mxu0 }
0x1033   :  { %v9793_v6 = vpop.f32.mrf.mxu1  ;;  %v9815_v7 = vpop.f32.mrf.mxu0 }
0x1034   :  { %v9794_v24 = vadd.f32 %v9793_v6, %v9792_v4  ;;  %v9816_v37 = vadd.f32 %v9815_v7, %v9814_v5 }
0x1035   :  { %v9795_v10 = vpop.f32.mrf.mxu1  ;;  %v9817_v11 = vpop.f32.mrf.mxu0 }
0x1036   :  { %v4093_v35 = vadd.f32 %v9794_v24, %v8950_v29 }
0x1037   :  { %v9796_v30 = vpop.f32.mrf.mxu1  ;;  %v9818_v15 = vpop.f32.mrf.mxu0 }
0x1038   :  { %v9797_v48 = vadd.f32 %v9796_v30, %v9795_v10  ;;  %v4134_v50 = vadd.f32 %v9816_v37, %v4093_v35  ;;  %v9819_v53 = vadd.f32 %v9818_v15, %v9817_v11 }
0x103a   :  { %v4096_v51 = vadd.f32 %v9797_v48, %v8950_v29 }
0x103c   :  { %v4137_v57 = vadd.f32 %v9819_v53, %v4096_v51  ;;  %v9100_v51 = vld [vmem:[%s13190_s6 + $0x78] sm:$0xff]  ;;  %v9086_v53 = vld [vmem:[%s13189_s1 + $0x68] sm:$0xff] }
0x103d   :  { %10407 = vmatprep.subr.mxu0 %v9100_v51 }
0x103e   :  { %10408 = vmatpush3.msra.mxu0 %v9100_v51 }
0x1051   :  { %v9836_v14 = vpop.f32.mrf.mxu1  ;;  %v9858_v43 = vpop.f32.mrf.mxu0 }
0x1053   :  { %v9837_v19 = vpop.f32.mrf.mxu1  ;;  %v9859_v20 = vpop.f32.mrf.mxu0 }
0x1054   :  { %v9838_v40 = vadd.f32 %v9837_v19, %v9836_v14  ;;  %v9860_v58 = vadd.f32 %v9859_v20, %v9858_v43 }
0x1055   :  { %v9839_v46 = vpop.f32.mrf.mxu1  ;;  %v9861_v21 = vpop.f32.mrf.mxu0 }
0x1056   :  { %v4175_v55 = vadd.f32 %v9838_v40, %v4134_v50  ;;  %v9088_v50 = vld [vmem:[%s13189_s1 + $0x78] sm:$0xff] }
0x1057   :  { %v9840_v54 = vpop.f32.mrf.mxu1  ;;  %v9862_v33 = vpop.f32.mrf.mxu0  ;;  %10388 = vmatprep.subr.mxu1 %v9088_v50 }
0x1058   :  { %v9841_v56 = vadd.f32 %v9840_v54, %v9839_v46  ;;  %v4216_v61 = vadd.f32 %v9860_v58, %v4175_v55  ;;  %v9863_v63 = vadd.f32 %v9862_v33, %v9861_v21  ;;  %10389 = vmatpush3.msra.mxu1 %v9088_v50  ;;  %v9098_v55 = vld [vmem:[%s13190_s6 + $0x68] sm:$0xff]  ;;  %v9084_v58 = vld [vmem:[%s13189_s1 + $0x58] sm:$0xff] }
0x105a   :  { %v4178_v62 = vadd.f32 %v9841_v56, %v4137_v57  ;;  %v9085_v56 = vld [vmem:[%s13189_s1 + $0x60] sm:$0xff] }
0x105b   :  { %v9097_v57 = vld [vmem:[%s13190_s6 + $0x60] sm:$0xff] }
0x105c   :  { %v4219_v1 = vadd.f32 %v9863_v63, %v4178_v62  ;;  %v9094_v62 = vld [vmem:[%s13190_s6 + $0x48] sm:$0xff]  ;;  %v9081_v63 = vld [vmem:[%s13189_s1 + $0x40] sm:$0xff] }
0x1071   :  { %v9880_v32 = vpop.f32.mrf.mxu1 }
0x1072   :  { %v9902_v49 = vpop.f32.mrf.mxu0 }
0x1073   :  { %v9881_v36 = vpop.f32.mrf.mxu1 }
0x1074   :  { %v9903_v26 = vpop.f32.mrf.mxu0  ;;  %v9882_v25 = vadd.f32 %v9881_v36, %v9880_v32 }
0x1075   :  { %v9883_v27 = vpop.f32.mrf.mxu1  ;;  %v9904_v12 = vadd.f32 %v9903_v26, %v9902_v49  ;;  %v9087_v26 = vld [vmem:[%s13189_s1 + $0x70] sm:$0xff] }
0x1076   :  { %v9905_v59 = vpop.f32.mrf.mxu0  ;;  %v4257_v28 = vadd.f32 %v9882_v25, %v4216_v61  ;;  %10390 = vmatprep.subr.mxu1 %v9087_v26  ;;  %v9096_v25 = vld [vmem:[%s13190_s6 + $0x58] sm:$0xff]  ;;  %v9082_v61 = vld [vmem:[%s13189_s1 + $0x48] sm:$0xff] }
0x1077   :  { %v9884_v60 = vpop.f32.mrf.mxu1  ;;  %10391 = vmatpush3.msra.mxu1 %v9087_v26 }
0x1078   :  { %v9885_v17 = vadd.f32 %v9884_v60, %v9883_v27  ;;  %v9906_v0 = vpop.f32.mrf.mxu0  ;;  %v4298_v13 = vadd.f32 %v9904_v12, %v4257_v28  ;;  %v9099_v27 = vld [vmem:[%s13190_s6 + $0x70] sm:$0xff]  ;;  %10392 = vmatprep.subr.mxu1 %v9086_v53  ;;  %v9093_v28 = vld [vmem:[%s13190_s6 + $0x40] sm:$0xff] }
0x1079   :  { %v9907_v5 = vadd.f32 %v9906_v0, %v9905_v59  ;;  %10409 = vmatprep.subr.mxu0 %v9099_v27  ;;  %10393 = vmatpush3.msra.mxu1 %v9086_v53  ;;  %v9083_v59 = vld [vmem:[%s13189_s1 + $0x50] sm:$0xff] }
0x107a   :  { %v4260_v3 = vadd.f32 %v9885_v17, %v4219_v1  ;;  %10410 = vmatpush3.msra.mxu0 %v9099_v27  ;;  %10394 = vmatprep.subr.mxu1 %v9085_v56  ;;  %v9095_v60 = vld [vmem:[%s13190_s6 + $0x50] sm:$0xff]  ;;  %v9112_v17 = vld [vmem:[%s13191_s2 + $0x78] sm:$0xff] }
0x107b   :  { %10411 = vmatprep.subr.mxu0 %v9098_v55  ;;  %10395 = vmatpush3.msra.mxu1 %v9085_v56 }
0x107c   :  { %v4301_v30 = vadd.f32 %v9907_v5, %v4260_v3  ;;  %10412 = vmatpush3.msra.mxu0 %v9098_v55  ;;  %10396 = vmatprep.subr.mxu1 %v9084_v58  ;;  %v9079_v3 = vld [vmem:[%s13167_s18] ss:$0 sm:$0xff] }
0x107d   :  { %10413 = vmatprep.subr.mxu0 %v9097_v57  ;;  %10397 = vmatpush3.msra.mxu1 %v9084_v58 }
0x107e   :  { %10414 = vmatpush3.msra.mxu0 %v9097_v57  ;;  %10398 = vmatprep.subr.mxu1 %v9083_v59 }
0x107f   :  { %10415 = vmatprep.subr.mxu0 %v9096_v25  ;;  %10399 = vmatpush3.msra.mxu1 %v9083_v59 }
0x1080   :  { %10416 = vmatpush3.msra.mxu0 %v9096_v25  ;;  %10400 = vmatprep.subr.mxu1 %v9082_v61 }
0x1081   :  { %10417 = vmatprep.subr.mxu0 %v9095_v60  ;;  %10401 = vmatpush3.msra.mxu1 %v9082_v61 }
0x1082   :  { %10418 = vmatpush3.msra.mxu0 %v9095_v60  ;;  %10402 = vmatprep.subr.mxu1 %v9081_v63 }
0x1083   :  { %10419 = vmatprep.subr.mxu0 %v9094_v62  ;;  %10403 = vmatpush3.msra.mxu1 %v9081_v63 }
0x1084   :  { %10420 = vmatpush3.msra.mxu0 %v9094_v62  ;;  %10426 = vmatprep.subr.mxu1 %v9112_v17 }
0x1085   :  { %10421 = vmatprep.subr.mxu0 %v9093_v28 }
0x1086   :  { %10422 = vmatpush3.msra.mxu0 %v9093_v28 }
0x1087   :  { %10445 = vmatprep.subr.mxu0 %v10922_v39 }
0x1091   :  { %v9924_v34 = vpop.f32.mrf.mxu1 }
0x1092   :  { %v9946_v45 = vpop.f32.mrf.mxu0 }
0x1093   :  { %v9925_v2 = vpop.f32.mrf.mxu1 }
0x1094   :  { %v9926_v16 = vadd.f32 %v9925_v2, %v9924_v34  ;;  %v9947_v52 = vpop.f32.mrf.mxu0 }
0x1095   :  { %v9927_v4 = vpop.f32.mrf.mxu1  ;;  %v9948_v7 = vadd.f32 %v9947_v52, %v9946_v45  ;;  %v9080_v52 = vld [vmem:[%s13168_s19] ss:$0 sm:$0xff] }
0x1096   :  { %v4339_v6 = vadd.f32 %v9926_v16, %v4298_v13  ;;  %v9949_v10 = vpop.f32.mrf.mxu0 }
0x1097   :  { %v9928_v11 = vpop.f32.mrf.mxu1 }
0x1098   :  { %v4380_v14 = vadd.f32 %v9948_v7, %v4339_v6  ;;  %v9929_v15 = vadd.f32 %v9928_v11, %v9927_v4  ;;  %v9950_v43 = vpop.f32.mrf.mxu0 }
0x1099   :  { %v9951_v20 = vadd.f32 %v9950_v43, %v9949_v10  ;;  %v9108_v43 = vld [vmem:[%s13191_s2 + $0x58] sm:$0xff] }
0x109a   :  { %v4342_v19 = vadd.f32 %v9929_v15, %v4301_v30  ;;  %v4386_v46 = vadd.f32 %v4380_v14, %v11450_v38  ;;  %v9111_v30 = vld [vmem:[%s13191_s2 + $0x70] sm:$0xff]  ;;  %v9110_v14 = vld [vmem:[%s13191_s2 + $0x68] sm:$0xff]  ;;  %v9109_v15 = vld [vmem:[%s13191_s2 + $0x60] sm:$0xff] }
0x109c   :  { %v4383_v21 = vadd.f32 %v9951_v20, %v4342_v19  ;;  %v4390_v54 = vsel %vm186_vm1, %v4386_v46, 0.0  ;;  %v9107_v19 = vld [vmem:[%s13191_s2 + $0x50] sm:$0xff]  ;;  %v9106_v20 = vld [vmem:[%s13191_s2 + $0x48] sm:$0xff] }
0x109d   :  { %4391 = vadd.xlane.f32.xlu0 %v4390_v54 }
0x109e   :  { %v4387_v24 = vadd.f32 %v4383_v21, %v11448_v31 }
0x10a0   :  { %v4393_v29 = vsel %vm186_vm1, %v4387_v24, 0.0 }
0x10a1   :  { %4394 = vadd.xlane.f32.xlu1 %v4393_v29 }
0x1126   :  { %v4392_v32 = vpop.xlane.xlu0 %4391 }
0x1127   :  { %v4396_v33 = vmul.f32 0.015625, %v4392_v32 }
0x1129   :  { %v12087_v35 = vsub.f32 %v4386_v46, %v4396_v33  ;;  %v9105_v46 = vld [vmem:[%s13191_s2 + $0x40] sm:$0xff] }
0x112a   :  { %v4395_v48 = vpop.xlane.xlu1 %4394 }
0x112b   :  { %v4397_v49 = vmul.f32 0.015625, %v4395_v48  ;;  %v4400_v36 = vmul.f32 %v12087_v35, %v12087_v35 }
0x112d   :  { %v12091_v37 = vsub.f32 %v4387_v24, %v4397_v49  ;;  %v4402_v38 = vsel %vm186_vm1, %v4400_v36, 0.0  ;;  %v9102_v24 = vld [vmem:[%s13156_s7 + $0x1] ss:$0 sm:$0xff] }
0x112e   :  { %4403 = vadd.xlane.f32.xlu0 %v4402_v38 }
0x112f   :  { %v4401_v31 = vmul.f32 %v12091_v37, %v12091_v37 }
0x1131   :  { %v4405_v40 = vsel %vm186_vm1, %v4401_v31, 0.0 }
0x1132   :  { %4406 = vadd.xlane.f32.xlu1 %v4405_v40 }
0x11b7   :  { %v4404_v0 = vpop.xlane.xlu0 %4403 }
0x11b8   :  { %v4408_v34 = vmul.f32 0.015625, %v4404_v0 }
0x11ba   :  { %v4410_v1 = vadd.f32 1e-05, %v4408_v34 }
0x11bb   :  { %v4407_v12 = vpop.xlane.xlu1 %4406 }
0x11bc   :  { %10870 = vrsqrt.f32 %v4410_v1  ;;  %v4409_v45 = vmul.f32 0.015625, %v4407_v12 }
0x11be   :  { %v4411_v2 = vadd.f32 1e-05, %v4409_v45 }
0x11c0   :  { %10872 = vrsqrt.f32 %v4411_v2 }
0x11c9   :  { %v10871_v13 = vpop.eup %10870 }
0x11ca   :  { %v4414_v16 = vmul.f32 %v10871_v13, %v12087_v35  ;;  %v9090_v35 = vld [vmem:[%s13157_s5 + $0x1] ss:$0 sm:$0xff] }
0x11cc   :  { %v4422_v4 = vmul.f32 %v9079_v3, %v4414_v16 }
0x11cd   :  { %v10873_v5 = vpop.eup %10872 }
0x11ce   :  { %v4415_v6 = vmul.f32 %v10873_v5, %v12091_v37  ;;  %v12157_v7 = vadd.f32 %v9080_v52, %v4422_v4  ;;  %v9114_v37 = vld [vmem:[%s13158_s9 + $0x1] ss:$0 sm:$0xff]  ;;  %v9118_v5 = vld [vmem:[%s13159_s10 + $0x48] sm:$0xff] }
0x11d0   :  { %v4423_v10 = vmul.f32 %v9079_v3, %v4415_v6  ;;  %10404 = vmatprep.mubr.msk.f32.mxu1 %vm186_vm1, %v12157_v7  ;;  %10423 = vmatprep.mubr.msk.f32.mxu0 %vm186_vm1, %v12157_v7  ;;  %v9117_v6 = vld [vmem:[%s13159_s10 + $0x40] sm:$0xff] }
0x11d2   :  { %v12163_v11 = vadd.f32 %v9080_v52, %v4423_v10 }
0x11d4   :  { %10405 = vmatmul.mubr.msk.f32.vlgmr.msra.gmra.mxu1 %vm186_vm1, %v12163_v11  ;;  %10424 = vmatmul.mubr.msk.f32.vlgmr.msra.gmra.mxu0 %vm186_vm1, %v12163_v11 }
0x11d5   :  { %10427 = vmatpush3.msra.mxu1 %v9112_v17  ;;  %10442 = vmatprep.mubr.msk.f32.mxu1 %vm186_vm1, %v12157_v7 }
0x11d6   :  { %10428 = vmatprep.subr.mxu1 %v9111_v30  ;;  %10447 = vmatprep.mubr.msk.f32.mxu0 %vm10923_vm2, %v10922_v39 }
0x11d7   :  { %10429 = vmatpush3.msra.mxu1 %v9111_v30 }
0x11d8   :  { %10430 = vmatprep.subr.mxu1 %v9110_v14 }
0x11d9   :  { %10431 = vmatpush3.msra.mxu1 %v9110_v14 }
0x11da   :  { %10432 = vmatprep.subr.mxu1 %v9109_v15 }
0x11db   :  { %10433 = vmatpush3.msra.mxu1 %v9109_v15 }
0x11dc   :  { %10434 = vmatprep.subr.mxu1 %v9108_v43 }
0x11dd   :  { %10435 = vmatpush3.msra.mxu1 %v9108_v43 }
0x11de   :  { %10436 = vmatprep.subr.mxu1 %v9107_v19 }
0x11df   :  { %10437 = vmatpush3.msra.mxu1 %v9107_v19 }
0x11e0   :  { %10438 = vmatprep.subr.mxu1 %v9106_v20 }
0x11e1   :  { %10439 = vmatpush3.msra.mxu1 %v9106_v20 }
0x11e2   :  { %10440 = vmatprep.subr.mxu1 %v9105_v46 }
0x11e3   :  { %10441 = vmatpush3.msra.mxu1 %v9105_v46 }
0x11e4   :  { %10443 = vmatmul.mubr.msk.f32.vlgmr.msra.gmra.mxu1 %vm186_vm1, %v12163_v11  ;;  %10465 = vmatprep.subr.mxu1 %v9118_v5 }
0x11e5   :  { %10466 = vmatpush3.msra.mxu1 %v9118_v5 }
0x11e6   :  { %10467 = vmatprep.subr.mxu1 %v9117_v6 }
0x11e7   :  { %10468 = vmatpush3.msra.mxu1 %v9117_v6 }
0x11e8   :  { %10477 = vmatprep.subr.mxu1 %v10922_v39 }
0x1294   :  { %v10406_v21 = vpop.f32.mrf.mxu1  ;;  %v10425_v54 = vpop.f32.mrf.mxu0 }
0x1295   :  { %v12209_v49 = vadd.f32 %v10425_v54, %v9102_v24  ;;  %v12217_v36 = vadd.f32 %v10406_v21, %v9090_v35 }
0x1296   :  { %v4613_v29 = vpop.f32.mrf.mxu0  ;;  %v4521_v32 = vpop.f32.mrf.mxu1 }
0x1297   :  { %v12199_v33 = vadd.f32 %v9102_v24, %v4613_v29  ;;  %v12206_v48 = vadd.f32 %v9090_v35, %v4521_v32 }
0x1299   :  { %10446 = vmatpush3.xpose.msk.msra.mxu0 %vm83_vm0, %v12199_v33 }
0x129a   :  { %10450 = vmatprep.subr.mxu0 %v10922_v39 }
0x129c   :  { %10448 = vmatmul.mubr.msk.f32.vlgmr.msra.gmra.mxu0 %vm83_vm0, %v12206_v48 }
0x129d   :  { %10451 = vmatpush3.xpose.msk.msra.mxu0 %vm83_vm0, %v12209_v49  ;;  %10452 = vmatprep.mubr.msk.f32.mxu0 %vm10923_vm2, %v10922_v39 }
0x129e   :  { %10455 = vmatprep.subr.mxu0 %v10922_v39 }
0x12a0   :  { %10453 = vmatmul.mubr.msk.f32.vlgmr.msra.gmra.mxu0 %vm83_vm0, %v12217_v36 }
0x12a1   :  { %10457 = vmatprep.mubr.msk.f32.mxu0 %vm10923_vm2, %v10922_v39 }
0x12a4   :  { %v10444_v38 = vpop.f32.mrf.mxu1 }
0x12a5   :  { %v12227_v31 = vadd.f32 %v10444_v38, %v9114_v37 }
0x12a6   :  { %v4705_v40 = vpop.f32.mrf.mxu1 }
0x12a7   :  { %v12229_v50 = vadd.f32 %v9114_v37, %v4705_v40 }
0x12a9   :  { %10456 = vmatpush3.msra.mxu0 %v12229_v50 }
0x12aa   :  { %10460 = vmatprep.subr.mxu0 %v10922_v39 }
0x135c   :  { %v4797_v51 = vpop.f32.mrf.mxu0 }
0x135d   :  { %v4877_v26 = vmul.f32 0.25, %v4797_v51 }
0x135e   :  { %v10449_v27 = vpop.f32.mrf.mxu0 }
0x135f   :  { %v4879_v53 = vsel %vm611_vm3, %v4877_v26, -inf }
0x1360   :  { %4880 = vmax.xlane.f32.xlu0 %v4879_v53  ;;  %v4873_v55 = vpop.f32.mrf.mxu0 }
0x1361   :  { %v4878_v56 = vmul.f32 0.25, %v4873_v55 }
0x1362   :  { %v10454_v57 = vpop.f32.mrf.mxu0 }
0x1363   :  { %v4882_v58 = vsel %vm611_vm3, %v4878_v56, -inf }
0x1364   :  { %4883 = vmax.xlane.f32.xlu1 %v4882_v58 }
0x13e9   :  { %v4881_v25 = vpop.xlane.xlu0 %4880 }
0x13ea   :  { %v4885_v59 = vsub.f32 %v4877_v26, %v4881_v25 }
0x13ec   :  { %v4887_v60 = vmul.f32 1.442695, %v4885_v59 }
0x13ed   :  { %v4884_v61 = vpop.xlane.xlu1 %4883 }
0x13ee   :  { %10874 = vpow2.f32 %v4887_v60  ;;  %v4886_v62 = vsub.f32 %v4878_v56, %v4884_v61 }
0x13f0   :  { %v4889_v63 = vmul.f32 1.442695, %v4886_v62 }
0x13f2   :  { %10876 = vpow2.f32 %v4889_v63 }
0x13fb   :  { %v10875_v28 = vpop.eup %10874 }
0x13fc   :  { %v4891_v17 = vsel %vm611_vm3, %v10875_v28, 0.0 }
0x13fd   :  { %4892 = vadd.xlane.f32.xlu0 %v4891_v17 }
0x13ff   :  { %v10877_v0 = vpop.eup %10876 }
0x1400   :  { %v4894_v34 = vsel %vm611_vm3, %v10877_v0, 0.0 }
0x1401   :  { %4895 = vadd.xlane.f32.xlu1 %v4894_v34 }
0x1412   :  { %5216 = vrot.lane.b32.xlu1 %v12209_v49, %s10924_s25 }
0x1413   :  { %5138 = vrot.lane.b32.xlu0 %v12199_v33, %s10924_s25 }
0x1416   :  { %5136 = vrot.lane.b32.xlu1 %v12206_v48, %s10924_s25 }
0x141a   :  { %5214 = vrot.lane.b32.xlu1 %v12217_v36, %s10924_s25 }
0x1486   :  { %v4893_v1 = vpop.xlane.xlu0 %4892 }
0x1487   :  { %10878 = vrcp.f32 %v4893_v1  ;;  %v9120_v1 = vld [vmem:[%s13159_s10 + $0x58] sm:$0xff] }
0x148a   :  { %v4896_v12 = vpop.xlane.xlu1 %4895  ;;  %v5139_v52 = vpop.permute.xlu0 %5138 }
0x148b   :  { %10880 = vrcp.f32 %v4896_v12  ;;  %v9119_v12 = vld [vmem:[%s13159_s10 + $0x50] sm:$0xff] }
0x148e   :  { %v5217_v3 = vpop.permute.xlu1 %5216 }
0x1492   :  { %v5137_v4 = vpop.permute.xlu1 %5136 }
0x1494   :  { %v10879_v45 = vpop.eup %10878 }
0x1495   :  { %v4898_v2 = vmul.f32 %v10879_v45, %v10875_v28 }
0x1496   :  { %v5215_v43 = vpop.permute.xlu1 %5214 }
0x1497   :  { %10458 = vmatmul.mubr.msk.f32.vlgmr.msra.gmra.mxu0 %vm611_vm3, %v4898_v2 }
0x1498   :  { %v10881_v13 = vpop.eup %10880  ;;  %10461 = vmatpush3.msra.mxu0 %v12227_v31  ;;  %10462 = vmatprep.mubr.msk.f32.mxu0 %vm10923_vm2, %v10922_v39 }
0x1499   :  { %10472 = vmatprep.subr.mxu0 %v10922_v39  ;;  %v4900_v16 = vmul.f32 %v10881_v13, %v10877_v0 }
0x149b   :  { %10463 = vmatmul.mubr.msk.f32.vlgmr.msra.gmra.mxu0 %vm611_vm3, %v4900_v16 }
0x149c   :  { %10473 = vmatpush3.xpose.msk.msra.mxu0 %vm83_vm0, %v5139_v52  ;;  %10474 = vmatprep.mubr.msk.f32.mxu0 %vm10923_vm2, %v10922_v39 }
0x149d   :  { %10482 = vmatprep.subr.mxu0 %v10922_v39 }
0x149f   :  { %10475 = vmatmul.mubr.msk.f32.vlgmr.msra.gmra.mxu0 %vm83_vm0, %v5137_v4 }
0x14a0   :  { %10484 = vmatprep.mubr.msk.f32.mxu0 %vm10923_vm2, %v10922_v39 }
0x1557   :  { %v4970_v10 = vpop.f32.mrf.mxu0 }
0x1558   :  { %10469 = vmatprep.mubr.msk.f32.mxu1 %vm83_vm0, %v4970_v10 }
0x1559   :  { %v10459_v30 = vpop.f32.mrf.mxu0 }
0x155b   :  { %v5043_v14 = vpop.f32.mrf.mxu0 }
0x155c   :  { %10470 = vmatmul.mubr.msk.f32.vlgmr.msra.gmra.mxu1 %vm83_vm0, %v5043_v14 }
0x155d   :  { %10478 = vmatpush3.xpose.msk.msra.mxu1 %vm83_vm0, %v5217_v3  ;;  %v10464_v15 = vpop.f32.mrf.mxu0  ;;  %10479 = vmatprep.mubr.msk.f32.mxu1 %vm10923_vm2, %v10922_v39 }
0x155e   :  { %10487 = vmatprep.subr.mxu1 %v10922_v39 }
0x155f   :  { %v5210_v19 = vpop.f32.mrf.mxu0 }
0x1560   :  { %v5292_v20 = vmul.f32 0.25, %v5210_v19  ;;  %10480 = vmatmul.mubr.msk.f32.vlgmr.msra.gmra.mxu1 %vm83_vm0, %v5215_v43 }
0x1561   :  { %v10476_v46 = vpop.f32.mrf.mxu0  ;;  %10489 = vmatprep.mubr.msk.f32.mxu1 %vm10923_vm2, %v10922_v39 }
0x1562   :  { %v5294_v21 = vsel %vm611_vm3, %v5292_v20, -inf }
0x1563   :  { %5295 = vmax.xlane.f32.xlu0 %v5294_v21 }
0x15ec   :  { %v5296_v54 = vpop.xlane.xlu0 %5295 }
0x15ed   :  { %v5300_v24 = vsub.f32 %v5292_v20, %v5296_v54  ;;  %v9134_v20 = vld [vmem:[%s13160_s11 + $0x1] ss:$0 sm:$0xff]  ;;  %s13194_s11 = smov 80  }
0x15ef   :  { %v5302_v29 = vmul.f32 1.442695, %v5300_v24 }
0x15f1   :  { %10882 = vpow2.f32 %v5302_v29 }
0x15fe   :  { %v10883_v32 = vpop.eup %10882 }
0x15ff   :  { %v5306_v35 = vsel %vm611_vm3, %v10883_v32, 0.0 }
0x1600   :  { %5307 = vadd.xlane.f32.xlu0 %v5306_v35 }
0x161c   :  { %v12276_v37 = vpop.f32.mrf.mxu1 }
0x161d   :  { %v5135_v46 = vadd.f32 %v12276_v37, %v9134_v20 }
0x161e   :  { %v12278_v38 = vpop.f32.mrf.mxu1 }
0x161f   :  { %v5134_v54 = vadd.f32 %v9134_v20, %v12278_v38 }
0x1620   :  { %v5288_v40 = vpop.f32.mrf.mxu1 }
0x1621   :  { %v5293_v51 = vmul.f32 0.25, %v5288_v40 }
0x1622   :  { %v10481_v26 = vpop.f32.mrf.mxu1 }
0x1623   :  { %v5297_v27 = vsel %vm611_vm3, %v5293_v51, -inf }
0x1624   :  { %5298 = vmax.xlane.f32.xlu1 %v5297_v27 }
0x1635   :  { %5394 = vrot.lane.b32.xlu1 %v12227_v31, %s10924_s25 }
0x1639   :  { %5555 = vrot.lane.b32.xlu1 %v12199_v33, %s10925_s29 }
0x163d   :  { %5633 = vrot.lane.b32.xlu1 %v12209_v49, %s10925_s29 }
0x1641   :  { %5631 = vrot.lane.b32.xlu1 %v12217_v36, %s10925_s29 }
0x1689   :  { %v5308_v59 = vpop.xlane.xlu0 %5307 }
0x16ad   :  { %v5299_v53 = vpop.xlane.xlu1 %5298 }
0x16ae   :  { %v5301_v55 = vsub.f32 %v5293_v51, %v5299_v53 }
0x16b0   :  { %v5304_v56 = vmul.f32 1.442695, %v5301_v55 }
0x16b1   :  { %v5395_v57 = vpop.permute.xlu1 %5394 }
0x16b2   :  { %10884 = vpow2.f32 %v5304_v56  ;;  %10488 = vmatpush3.msra.mxu1 %v5395_v57 }
0x16b3   :  { %10499 = vmatprep.subr.mxu1 %v10922_v39  ;;  %10886 = vrcp.f32 %v5308_v59 }
0x16b5   :  { %v5556_v0 = vpop.permute.xlu1 %5555 }
0x16b9   :  { %v5634_v13 = vpop.permute.xlu1 %5633 }
0x16bd   :  { %v5632_v52 = vpop.permute.xlu1 %5631 }
0x16bf   :  { %v10885_v58 = vpop.eup %10884 }
0x16c0   :  { %v5309_v25 = vsel %vm611_vm3, %v10885_v58, 0.0  ;;  %v10887_v61 = vpop.eup %10886 }
0x16c1   :  { %5310 = vadd.xlane.f32.xlu0 %v5309_v25  ;;  %v5313_v63 = vmul.f32 %v10887_v61, %v10883_v32  ;;  %v9122_v61 = vld [vmem:[%s13159_s10 + $0x68] sm:$0xff] }
0x16d7   :  { %5317 = vrot.lane.b32.xlu0 %v12229_v50, %s10924_s25 }
0x16db   :  { %5553 = vrot.lane.b32.xlu0 %v12206_v48, %s10925_s29 }
0x174a   :  { %v5311_v60 = vpop.xlane.xlu0 %5310 }
0x174b   :  { %10888 = vrcp.f32 %v5311_v60 }
0x174e   :  { %v5318_v62 = vpop.permute.xlu0 %5317 }
0x174f   :  { %10483 = vmatpush3.msra.mxu0 %v5318_v62  ;;  %v9121_v62 = vld [vmem:[%s13159_s10 + $0x60] sm:$0xff] }
0x1750   :  { %10485 = vmatmul.mubr.msk.f32.vlgmr.msra.gmra.mxu0 %vm611_vm3, %v5313_v63  ;;  %10492 = vmatprep.subr.mxu0 %v9120_v1 }
0x1751   :  { %10493 = vmatpush3.msra.mxu0 %v9120_v1 }
0x1752   :  { %v5554_v34 = vpop.permute.xlu0 %5553  ;;  %10494 = vmatprep.subr.mxu0 %v9119_v12 }
0x1753   :  { %10495 = vmatpush3.msra.mxu0 %v9119_v12 }
0x1754   :  { %10504 = vmatprep.subr.mxu0 %v10922_v39 }
0x1758   :  { %v10889_v28 = vpop.eup %10888 }
0x1759   :  { %v5315_v17 = vmul.f32 %v10889_v28, %v10885_v58 }
0x175b   :  { %10490 = vmatmul.mubr.msk.f32.vlgmr.msra.gmra.mxu1 %vm611_vm3, %v5315_v17 }
0x175c   :  { %10500 = vmatpush3.xpose.msk.msra.mxu1 %vm83_vm0, %v5556_v0  ;;  %10501 = vmatprep.mubr.msk.f32.mxu1 %vm10923_vm2, %v10922_v39 }
0x175d   :  { %10509 = vmatprep.subr.mxu1 %v10922_v39 }
0x175f   :  { %10502 = vmatmul.mubr.msk.f32.vlgmr.msra.gmra.mxu1 %vm83_vm0, %v5554_v34 }
0x1760   :  { %10511 = vmatprep.mubr.msk.f32.mxu1 %vm10923_vm2, %v10922_v39 }
0x1810   :  { %v5389_v45 = vpop.f32.mrf.mxu0 }
0x1811   :  { %10496 = vmatprep.mubr.msk.f32.mxu0 %vm83_vm0, %v5389_v45 }
0x1812   :  { %v10486_v2 = vpop.f32.mrf.mxu0 }
0x181b   :  { %v5466_v3 = vpop.f32.mrf.mxu1 }
0x181c   :  { %10497 = vmatmul.mubr.msk.f32.vlgmr.msra.gmra.mxu0 %vm83_vm0, %v5466_v3 }
0x181d   :  { %10505 = vmatpush3.xpose.msk.msra.mxu0 %vm83_vm0, %v5634_v13  ;;  %v10491_v16 = vpop.f32.mrf.mxu1  ;;  %10506 = vmatprep.mubr.msk.f32.mxu0 %vm10923_vm2, %v10922_v39 }
0x181e   :  { %10514 = vmatprep.subr.mxu0 %v10922_v39 }
0x181f   :  { %v5627_v4 = vpop.f32.mrf.mxu1 }
0x1820   :  { %v5709_v5 = vmul.f32 0.25, %v5627_v4  ;;  %10507 = vmatmul.mubr.msk.f32.vlgmr.msra.gmra.mxu0 %vm83_vm0, %v5632_v52 }
0x1821   :  { %v10503_v6 = vpop.f32.mrf.mxu1  ;;  %10516 = vmatprep.mubr.msk.f32.mxu0 %vm10923_vm2, %v10922_v39 }
0x1822   :  { %v5711_v10 = vsel %vm611_vm3, %v5709_v5, -inf }
0x1823   :  { %5712 = vmax.xlane.f32.xlu0 %v5711_v10 }
0x18ac   :  { %v5713_v30 = vpop.xlane.xlu0 %5712 }
0x18ad   :  { %v5717_v14 = vsub.f32 %v5709_v5, %v5713_v30 }
0x18af   :  { %v5719_v15 = vmul.f32 1.442695, %v5717_v14 }
0x18b1   :  { %10890 = vpow2.f32 %v5719_v15 }
0x18be   :  { %v10891_v43 = vpop.eup %10890 }
0x18bf   :  { %v5723_v19 = vsel %vm611_vm3, %v10891_v43, 0.0 }
0x18c0   :  { %5724 = vadd.xlane.f32.xlu0 %v5723_v19 }
0x18dc   :  { %v10498_v21 = vpop.f32.mrf.mxu0 }
0x18dd   :  { %v12327_v24 = vadd.f32 %v10498_v21, %v5135_v46 }
0x18de   :  { %v5542_v29 = vpop.f32.mrf.mxu0 }
0x18df   :  { %v12329_v32 = vadd.f32 %v5542_v29, %v5134_v54 }
0x18e0   :  { %v5705_v35 = vpop.f32.mrf.mxu0 }
0x18e1   :  { %v5710_v40 = vmul.f32 0.25, %v5705_v35 }
0x18e2   :  { %v10508_v51 = vpop.f32.mrf.mxu0 }
0x18e3   :  { %v5714_v26 = vsel %vm611_vm3, %v5710_v40, -inf }
0x18e4   :  { %5715 = vmax.xlane.f32.xlu1 %v5714_v26 }
0x18f5   :  { %5809 = vrot.lane.b32.xlu1 %v12227_v31, %s10925_s29 }
0x18f9   :  { %5970 = vrot.lane.b32.xlu1 %v12199_v33, %s13194_s11 }
0x18fd   :  { %6048 = vrot.lane.b32.xlu1 %v12209_v49, %s13194_s11 }
0x1901   :  { %6046 = vrot.lane.b32.xlu1 %v12217_v36, %s13194_s11 }
0x1949   :  { %v5725_v33 = vpop.xlane.xlu0 %5724 }
0x196d   :  { %v5716_v37 = vpop.xlane.xlu1 %5715 }
0x196e   :  { %v5718_v38 = vsub.f32 %v5710_v40, %v5716_v37 }
0x1970   :  { %v5721_v27 = vmul.f32 1.442695, %v5718_v38  ;;  %v9123_v38 = vld [vmem:[%s13159_s10 + $0x70] sm:$0xff] }
0x1971   :  { %v5810_v53 = vpop.permute.xlu1 %5809 }
0x1972   :  { %10892 = vpow2.f32 %v5721_v27  ;;  %10515 = vmatpush3.msra.mxu0 %v5810_v53 }
0x1973   :  { %10526 = vmatprep.subr.mxu0 %v10922_v39  ;;  %10894 = vrcp.f32 %v5725_v33 }
0x1975   :  { %v5971_v60 = vpop.permute.xlu1 %5970 }
0x1979   :  { %v6049_v17 = vpop.permute.xlu1 %6048 }
0x197d   :  { %v6047_v1 = vpop.permute.xlu1 %6046 }
0x197f   :  { %v10893_v55 = vpop.eup %10892 }
0x1980   :  { %v5726_v56 = vsel %vm611_vm3, %v10893_v55, 0.0  ;;  %v10895_v36 = vpop.eup %10894 }
0x1981   :  { %5727 = vadd.xlane.f32.xlu0 %v5726_v56  ;;  %v5730_v58 = vmul.f32 %v10895_v36, %v10891_v43 }
0x1997   :  { %5733 = vrot.lane.b32.xlu0 %v12229_v50, %s10925_s29 }
0x199b   :  { %5968 = vrot.lane.b32.xlu0 %v12206_v48, %s13194_s11 }
0x1a0a   :  { %v5728_v49 = vpop.xlane.xlu0 %5727 }
0x1a0b   :  { %10896 = vrcp.f32 %v5728_v49 }
0x1a0e   :  { %v5734_v57 = vpop.permute.xlu0 %5733 }
0x1a0f   :  { %10510 = vmatpush3.msra.mxu1 %v5734_v57 }
0x1a10   :  { %10512 = vmatmul.mubr.msk.f32.vlgmr.msra.gmra.mxu1 %vm611_vm3, %v5730_v58  ;;  %10519 = vmatprep.subr.mxu1 %v9122_v61 }
0x1a11   :  { %10520 = vmatpush3.msra.mxu1 %v9122_v61 }
0x1a12   :  { %v5969_v48 = vpop.permute.xlu0 %5968  ;;  %10521 = vmatprep.subr.mxu1 %v9121_v62 }
0x1a13   :  { %10522 = vmatpush3.msra.mxu1 %v9121_v62 }
0x1a14   :  { %10531 = vmatprep.subr.mxu1 %v10922_v39 }
0x1a18   :  { %v10897_v25 = vpop.eup %10896 }
0x1a19   :  { %v5732_v59 = vmul.f32 %v10897_v25, %v10893_v55 }
0x1a1b   :  { %10517 = vmatmul.mubr.msk.f32.vlgmr.msra.gmra.mxu0 %vm611_vm3, %v5732_v59 }
0x1a1c   :  { %10527 = vmatpush3.xpose.msk.msra.mxu0 %vm83_vm0, %v5971_v60  ;;  %10528 = vmatprep.mubr.msk.f32.mxu0 %vm10923_vm2, %v10922_v39 }
0x1a1d   :  { %10536 = vmatprep.subr.mxu0 %v10922_v39 }
0x1a1f   :  { %10529 = vmatmul.mubr.msk.f32.vlgmr.msra.gmra.mxu0 %vm83_vm0, %v5969_v48 }
0x1a20   :  { %10538 = vmatprep.mubr.msk.f32.mxu0 %vm10923_vm2, %v10922_v39 }
0x1ad0   :  { %v5805_v63 = vpop.f32.mrf.mxu1 }
0x1ad1   :  { %10523 = vmatprep.mubr.msk.f32.mxu1 %vm83_vm0, %v5805_v63 }
0x1ad2   :  { %v10513_v28 = vpop.f32.mrf.mxu1 }
0x1adb   :  { %v5881_v0 = vpop.f32.mrf.mxu0 }
0x1adc   :  { %10524 = vmatmul.mubr.msk.f32.vlgmr.msra.gmra.mxu1 %vm83_vm0, %v5881_v0 }
0x1add   :  { %10532 = vmatpush3.xpose.msk.msra.mxu1 %vm83_vm0, %v6049_v17  ;;  %v10518_v34 = vpop.f32.mrf.mxu0  ;;  %10533 = vmatprep.mubr.msk.f32.mxu1 %vm10923_vm2, %v10922_v39 }
0x1ade   :  { %10541 = vmatprep.subr.mxu1 %v10922_v39 }
0x1adf   :  { %v6042_v12 = vpop.f32.mrf.mxu0 }
0x1ae0   :  { %v6124_v45 = vmul.f32 0.25, %v6042_v12  ;;  %10534 = vmatmul.mubr.msk.f32.vlgmr.msra.gmra.mxu1 %vm83_vm0, %v6047_v1  ;;  %v9211_v1 = vld [vmem:[%s13161_s14 + $0x380] sm:$0xff] }
0x1ae1   :  { %v10530_v2 = vpop.f32.mrf.mxu0  ;;  %10543 = vmatprep.mubr.msk.f32.mxu1 %vm10923_vm2, %v10922_v39  ;;  %v9219_v12 = vld [vmem:[%s13161_s14 + $0x3c0] sm:$0xff] }
0x1ae2   :  { %v6126_v13 = vsel %vm611_vm3, %v6124_v45, -inf  ;;  %v9278_v2 = vcombine.high %v9211_v1, %v9219_v12 }
0x1ae3   :  { %6127 = vmax.xlane.f32.xlu0 %v6126_v13  ;;  %v9220_v13 = vld [vmem:[%s13161_s14 + $0x3c8] sm:$0xff] }
0x1b6c   :  { %v6128_v3 = vpop.xlane.xlu0 %6127 }
0x1b6d   :  { %v6132_v16 = vsub.f32 %v6124_v45, %v6128_v3  ;;  %v9212_v45 = vld [vmem:[%s13161_s14 + $0x388] sm:$0xff]  ;;  %v9277_v3 = vcombine.low %v9211_v1, %v9219_v12  ;;  %v9197_v12 = vld [vmem:[%s13161_s14 + $0x310] sm:$0xff] }
0x1b6f   :  { %v6134_v52 = vmul.f32 1.442695, %v6132_v16  ;;  %v9279_v16 = vcombine.low %v9212_v45, %v9220_v13 }
0x1b71   :  { %10898 = vpow2.f32 %v6134_v52  ;;  %v9280_v52 = vcombine.high %v9212_v45, %v9220_v13  ;;  %v9205_v45 = vld [vmem:[%s13161_s14 + $0x350] sm:$0xff] }
0x1b7e   :  { %v10899_v4 = vpop.eup %10898 }
0x1b7f   :  { %v6138_v5 = vsel %vm611_vm3, %v10899_v4, 0.0 }
0x1b80   :  { %6139 = vadd.xlane.f32.xlu0 %v6138_v5  ;;  %v9203_v5 = vld [vmem:[%s13161_s14 + $0x340] sm:$0xff] }
0x1b9c   :  { %v10525_v6 = vpop.f32.mrf.mxu1 }
0x1b9d   :  { %v5967_v10 = vadd.f32 %v10525_v6, %v12327_v24  ;;  %v9196_v6 = vld [vmem:[%s13161_s14 + $0x308] sm:$0xff] }
0x1b9e   :  { %v5957_v30 = vpop.f32.mrf.mxu1 }
0x1b9f   :  { %v5966_v14 = vadd.f32 %v5957_v30, %v12329_v32  ;;  %v9204_v30 = vld [vmem:[%s13161_s14 + $0x348] sm:$0xff] }
0x1ba0   :  { %v6120_v15 = vpop.f32.mrf.mxu1 }
0x1ba1   :  { %v6125_v43 = vmul.f32 0.25, %v6120_v15  ;;  %v9263_v15 = vcombine.low %v9196_v6, %v9204_v30 }
0x1ba2   :  { %v10535_v39 = vpop.f32.mrf.mxu1 }
0x1ba3   :  { %v6129_v19 = vsel %vm611_vm3, %v6125_v43, -inf  ;;  %v9179_v39 = vld [vmem:[%s13161_s14 + $0x280] sm:$0xff] }
0x1ba4   :  { %6130 = vmax.xlane.f32.xlu1 %v6129_v19  ;;  %v9187_v19 = vld [vmem:[%s13161_s14 + $0x2c0] sm:$0xff] }
0x1bb5   :  { %6224 = vrot.lane.b32.xlu1 %v12227_v31, %s13194_s11 }
0x1c09   :  { %v6140_v32 = vpop.xlane.xlu0 %6139 }
0x1c2d   :  { %v6131_v20 = vpop.xlane.xlu1 %6130 }
0x1c2e   :  { %v6133_v46 = vsub.f32 %v6125_v43, %v6131_v20  ;;  %v9264_v43 = vcombine.high %v9196_v6, %v9204_v30  ;;  %v9180_v20 = vld [vmem:[%s13161_s14 + $0x288] sm:$0xff]  ;;  %v9182_v6 = vld [vmem:[%s13161_s14 + $0x298] sm:$0xff]  ;;  %v9265_v30 = vcombine.low %v9197_v12, %v9205_v45 }
0x1c30   :  { %v6136_v21 = vmul.f32 1.442695, %v6133_v46  ;;  %v9246_v46 = vcombine.high %v9179_v39, %v9187_v19 }
0x1c31   :  { %v6225_v54 = vpop.permute.xlu1 %6224 }
0x1c32   :  { %10900 = vpow2.f32 %v6136_v21  ;;  %10542 = vmatpush3.msra.mxu1 %v6225_v54  ;;  %v9188_v21 = vld [vmem:[%s13161_s14 + $0x2c8] sm:$0xff]  ;;  %v9245_v54 = vcombine.low %v9179_v39, %v9187_v19  ;;  %v9165_v39 = vld [vmem:[%s13161_s14 + $0x210] sm:$0xff] }
0x1c33   :  { %10902 = vrcp.f32 %v6140_v32  ;;  %6913 = vmatprep.subr.bf16.mxu1 %v9278_v2  ;;  %v9163_v32 = vld [vmem:[%s13161_s14 + $0x200] sm:$0xff]  ;;  %v9173_v19 = vld [vmem:[%s13161_s14 + $0x250] sm:$0xff] }
0x1c3f   :  { %v10901_v29 = vpop.eup %10900 }
0x1c40   :  { %v6141_v24 = vsel %vm611_vm3, %v10901_v29, 0.0  ;;  %v10903_v40 = vpop.eup %10902 }
0x1c41   :  { %6142 = vadd.xlane.f32.xlu0 %v6141_v24  ;;  %v6145_v31 = vmul.f32 %v10903_v40, %v10899_v4  ;;  %v9195_v4 = vld [vmem:[%s13161_s14 + $0x300] sm:$0xff]  ;;  %v9248_v24 = vcombine.high %v9180_v20, %v9188_v21  ;;  %v9164_v40 = vld [vmem:[%s13161_s14 + $0x208] sm:$0xff] }
0x1c57   :  { %6148 = vrot.lane.b32.xlu0 %v12229_v50, %s13194_s11  ;;  %v9124_v50 = vld [vmem:[%s13159_s10 + $0x78] sm:$0xff] }
0x1cca   :  { %v6143_v35 = vpop.xlane.xlu0 %6142 }
0x1ccb   :  { %10904 = vrcp.f32 %v6143_v35  ;;  %v9171_v35 = vld [vmem:[%s13161_s14 + $0x240] sm:$0xff] }
0x1cce   :  { %v6149_v51 = vpop.permute.xlu0 %6148 }
0x1ccf   :  { %10537 = vmatpush3.msra.mxu0 %v6149_v51  ;;  %v9230_v51 = vcombine.high %v9163_v32, %v9171_v35 }
0x1cd0   :  { %10539 = vmatmul.mubr.msk.f32.vlgmr.msra.gmra.mxu0 %vm611_vm3, %v6145_v31  ;;  %10546 = vmatprep.subr.mxu0 %v9124_v50  ;;  %v9172_v31 = vld [vmem:[%s13161_s14 + $0x248] sm:$0xff] }
0x1cd1   :  { %10547 = vmatpush3.msra.mxu0 %v9124_v50  ;;  %v9232_v50 = vcombine.high %v9164_v40, %v9172_v31 }
0x1cd2   :  { %10548 = vmatprep.subr.mxu0 %v9123_v38 }
0x1cd3   :  { %10549 = vmatpush3.msra.mxu0 %v9123_v38  ;;  %v9213_v38 = vld [vmem:[%s13161_s14 + $0x390] sm:$0xff] }
0x1cd4   :  { %6956 = vmatprep.subr.bf16.mxu0 %v9280_v52 }
0x1cd8   :  { %v10905_v26 = vpop.eup %10904 }
0x1cd9   :  { %v6147_v37 = vmul.f32 %v10905_v26, %v10901_v29  ;;  %v9247_v29 = vcombine.low %v9180_v20, %v9188_v21  ;;  %v9229_v26 = vcombine.low %v9163_v32, %v9171_v35  ;;  %v9166_v20 = vld [vmem:[%s13161_s14 + $0x218] sm:$0xff]  ;;  %v9215_v32 = vld [vmem:[%s13161_s14 + $0x3a0] sm:$0xff] }
0x1cda   :  { %v9223_v35 = vld [vmem:[%s13161_s14 + $0x3e0] sm:$0xff] }
0x1cdb   :  { %10544 = vmatmul.mubr.msk.f32.vlgmr.msra.gmra.mxu1 %vm611_vm3, %v6147_v37  ;;  %v9231_v37 = vcombine.low %v9164_v40, %v9172_v31  ;;  %v9216_v40 = vld [vmem:[%s13161_s14 + $0x3a8] sm:$0xff]  ;;  %v9233_v31 = vcombine.low %v9165_v39, %v9173_v19 }
0x1cdc   :  { %6937 = vmatprep.mubr.bf16.mxu1 %v10927_v18  ;;  %6914 = vmatpush1.bf16.msra.mxu1 %v9277_v3 }
0x1d90   :  { %v6220_v27 = vpop.f32.mrf.mxu0 }
0x1d91   :  { %10550 = vmatprep.mubr.msk.f32.mxu0 %vm83_vm0, %v6220_v27  ;;  %v9221_v27 = vld [vmem:[%s13161_s14 + $0x3d0] sm:$0xff] }
0x1d92   :  { %v10540_v53 = vpop.f32.mrf.mxu0 }
0x1d93   :  { %v9214_v53 = vld [vmem:[%s13161_s14 + $0x398] sm:$0xff] }
0x1d9b   :  { %v6296_v55 = vpop.f32.mrf.mxu1 }
0x1d9c   :  { %10551 = vmatmul.mubr.msk.f32.vlgmr.msra.gmra.mxu0 %vm83_vm0, %v6296_v55  ;;  %v9281_v55 = vcombine.low %v9213_v38, %v9221_v27 }
0x1d9d   :  { %v10545_v56 = vpop.f32.mrf.mxu1  ;;  %6980 = vmatprep.mubr.bf16.mxu0 %v10927_v18  ;;  %6957 = vmatpush1.bf16.msra.mxu0 %v9279_v16  ;;  %v9266_v16 = vcombine.high %v9197_v12, %v9205_v45 }
0x1d9e   :  { %6958 = vmatprep.subr.bf16.mxu0 %v9264_v43  ;;  %v9282_v56 = vcombine.high %v9213_v38, %v9221_v27  ;;  %v9199_v38 = vld [vmem:[%s13161_s14 + $0x320] sm:$0xff] }
0x1d9f   :  { %v9207_v27 = vld [vmem:[%s13161_s14 + $0x360] sm:$0xff] }
0x1da1   :  { %6959 = vmatpush1.bf16.msra.mxu0 %v9263_v15 }
0x1da2   :  { %6960 = vmatprep.subr.bf16.mxu0 %v9248_v24 }
0x1da5   :  { %6961 = vmatpush1.bf16.msra.mxu0 %v9247_v29  ;;  %v9234_v29 = vcombine.high %v9165_v39, %v9173_v19 }
0x1da6   :  { %6962 = vmatprep.subr.bf16.mxu0 %v9232_v50 }
0x1da9   :  { %6963 = vmatpush1.bf16.msra.mxu0 %v9231_v37  ;;  %v9286_v37 = vcombine.high %v9215_v32, %v9223_v35 }
0x1e5c   :  { %v10552_v33 = vpop.f32.mrf.mxu0 }
0x1e5d   :  { %v6382_v49 = vadd.f32 %v10552_v33, %v5967_v10  ;;  %v9262_v10 = vcombine.high %v9195_v4, %v9203_v5  ;;  %v9222_v33 = vld [vmem:[%s13161_s14 + $0x3d8] sm:$0xff] }
0x1e5e   :  { %v6372_v36 = vpop.f32.mrf.mxu0 }
0x1e5f   :  { %v6381_v57 = vadd.f32 %v6372_v36, %v5966_v14  ;;  %v6384_v58 = vadd.f32 %v6382_v49, %v12163_v11  ;;  %v9261_v14 = vcombine.low %v9195_v4, %v9203_v5  ;;  %6915 = vmatprep.subr.bf16.mxu1 %v9262_v10  ;;  %v9283_v49 = vcombine.low %v9214_v53, %v9222_v33  ;;  %v9181_v4 = vld [vmem:[%s13161_s14 + $0x290] sm:$0xff]  ;;  %v9190_v10 = vld [vmem:[%s13161_s14 + $0x2d8] sm:$0xff] }
0x1e60   :  { %v9284_v36 = vcombine.high %v9214_v53, %v9222_v33  ;;  %v9189_v5 = vld [vmem:[%s13161_s14 + $0x2d0] sm:$0xff]  ;;  %v9252_v43 = vcombine.high %v9182_v6, %v9190_v10  ;;  %v9200_v53 = vld [vmem:[%s13161_s14 + $0x328] sm:$0xff] }
0x1e61   :  { %v6392_v25 = vsel %vm186_vm1, %v6384_v58, 0.0  ;;  %v6383_v59 = vadd.f32 %v6381_v57, %v12157_v7  ;;  %6916 = vmatpush1.bf16.msra.mxu1 %v9261_v14  ;;  %v9250_v15 = vcombine.high %v9181_v4, %v9189_v5  ;;  %v9249_v21 = vcombine.low %v9181_v4, %v9189_v5 }
0x1e62   :  { %6393 = vadd.xlane.f32.xlu0 %v6392_v25  ;;  %6917 = vmatprep.subr.bf16.mxu1 %v9246_v46  ;;  %v9174_v46 = vld [vmem:[%s13161_s14 + $0x258] sm:$0xff] }
0x1e63   :  { %v6389_v60 = vsel %vm186_vm1, %v6383_v59, 0.0  ;;  %7042 = vmatprep.subr.bf16.mxu0 %v9284_v36  ;;  %v9236_v24 = vcombine.high %v9166_v20, %v9174_v46 }
0x1e64   :  { %6390 = vadd.xlane.f32.xlu1 %v6389_v60 }
0x1e65   :  { %6918 = vmatpush1.bf16.msra.mxu1 %v9245_v54  ;;  %v9251_v54 = vcombine.low %v9182_v6, %v9190_v10 }
0x1e66   :  { %6919 = vmatprep.subr.bf16.mxu1 %v9230_v51  ;;  %v9224_v51 = vld [vmem:[%s13161_s14 + $0x3e8] sm:$0xff] }
0x1e67   :  { %v9288_v50 = vcombine.high %v9216_v40, %v9224_v51  ;;  %v9287_v33 = vcombine.low %v9216_v40, %v9224_v51 }
0x1e69   :  { %6920 = vmatpush1.bf16.msra.mxu1 %v9229_v26  ;;  %v9235_v26 = vcombine.low %v9166_v20, %v9174_v46 }
0x1e6a   :  { %6999 = vmatprep.subr.bf16.mxu1 %v9282_v56  ;;  %v9285_v56 = vcombine.low %v9215_v32, %v9223_v35 }
0x1eeb   :  { %v6394_v48 = vpop.xlane.xlu0 %6393 }
0x1eec   :  { %v6396_v61 = vmul.f32 0.015625, %v6394_v48 }
0x1eed   :  { %v6391_v62 = vpop.xlane.xlu1 %6390 }
0x1eee   :  { %v12397_v63 = vsub.f32 %v6384_v58, %v6396_v61  ;;  %v6395_v28 = vmul.f32 0.015625, %v6391_v62  ;;  %v9161_v62 = vld [vmem:[%s13163_s12 + $0x1] ss:$0 sm:$0xff] }
0x1ef0   :  { %v12399_v17 = vsub.f32 %v6383_v59, %v6395_v28  ;;  %v6400_v0 = vmul.f32 %v12397_v63, %v12397_v63 }
0x1ef2   :  { %v6404_v11 = vsel %vm186_vm1, %v6400_v0, 0.0  ;;  %v6399_v7 = vmul.f32 %v12399_v17, %v12399_v17 }
0x1ef3   :  { %6405 = vadd.xlane.f32.xlu1 %v6404_v11 }
0x1ef4   :  { %v6401_v34 = vsel %vm186_vm1, %v6399_v7, 0.0 }
0x1ef5   :  { %6402 = vadd.xlane.f32.xlu0 %v6401_v34  ;;  %v9162_v34 = vld [vmem:[%s13164_s13 + $0x1] ss:$0 sm:$0xff] }
0x1f7c   :  { %v6406_v57 = vpop.xlane.xlu1 %6405 }
0x1f7d   :  { %v6408_v58 = vmul.f32 0.015625, %v6406_v57  ;;  %v9183_v57 = vld [vmem:[%s13161_s14 + $0x2a0] sm:$0xff] }
0x1f7e   :  { %v6403_v25 = vpop.xlane.xlu0 %6402 }
0x1f7f   :  { %v6410_v59 = vadd.f32 1e-05, %v6408_v58  ;;  %v6407_v60 = vmul.f32 0.015625, %v6403_v25  ;;  %v9191_v58 = vld [vmem:[%s13161_s14 + $0x2e0] sm:$0xff]  ;;  %v9184_v25 = vld [vmem:[%s13161_s14 + $0x2a8] sm:$0xff] }
0x1f81   :  { %10906 = vrsqrt.f32 %v6410_v59  ;;  %v6409_v48 = vadd.f32 1e-05, %v6407_v60  ;;  %v9192_v59 = vld [vmem:[%s13161_s14 + $0x2e8] sm:$0xff]  ;;  %v9269_v60 = vcombine.low %v9199_v38, %v9207_v27 }
0x1f83   :  { %10908 = vrsqrt.f32 %v6409_v48 }
0x1f8e   :  { %v10907_v61 = vpop.eup %10906 }
0x1f8f   :  { %v6414_v28 = vmul.f32 %v10907_v61, %v12397_v63  ;;  %v9198_v63 = vld [vmem:[%s13161_s14 + $0x318] sm:$0xff]  ;;  %v9254_v61 = vcombine.high %v9183_v57, %v9191_v58 }
0x1f90   :  { %v10909_v0 = vpop.eup %10908 }
0x1f91   :  { %v6422_v11 = vmul.f32 %v9161_v62, %v6414_v28  ;;  %v6413_v7 = vmul.f32 %v10909_v0, %v12399_v17  ;;  %v9206_v17 = vld [vmem:[%s13161_s14 + $0x358] sm:$0xff]  ;;  %v9167_v28 = vld [vmem:[%s13161_s14 + $0x220] sm:$0xff] }
0x1f92   :  { %v9268_v52 = vcombine.high %v9198_v63, %v9206_v17  ;;  %v9267_v14 = vcombine.low %v9198_v63, %v9206_v17  ;;  %v9175_v0 = vld [vmem:[%s13161_s14 + $0x260] sm:$0xff]  ;;  %v9217_v63 = vld [vmem:[%s13161_s14 + $0x3b0] sm:$0xff] }
0x1f93   :  { %v6421_v1 = vmul.f32 %v9161_v62, %v6413_v7  ;;  %v12487_v2 = vadd.f32 %v9162_v34, %v6422_v11  ;;  %v9256_v62 = vcombine.high %v9184_v25, %v9192_v59  ;;  %v9168_v11 = vld [vmem:[%s13161_s14 + $0x228] sm:$0xff]  ;;  %v9238_v12 = vcombine.high %v9167_v28, %v9175_v0  ;;  %v9225_v17 = vld [vmem:[%s13161_s14 + $0x3f0] sm:$0xff] }
0x1f94   :  { %v9176_v7 = vld [vmem:[%s13161_s14 + $0x268] sm:$0xff]  ;;  %v9237_v4 = vcombine.low %v9167_v28, %v9175_v0  ;;  %v9290_v6 = vcombine.high %v9217_v63, %v9225_v17  ;;  %v9289_v39 = vcombine.low %v9217_v63, %v9225_v17  ;;  %v10718_v28 = vld [vmem:[%s13162_s16 + $0x460] sm:$0xff]   ;;  %v10726_v63 = vld [vmem:[%s13162_s16 + $0x450] sm:$0xff]  }
0x1f95   :  { %v12489_v13 = vadd.f32 %v9162_v34, %v6421_v1  ;;  %v9253_v34 = vcombine.low %v9183_v57, %v9191_v58  ;;  %v9255_v1 = vcombine.low %v9184_v25, %v9192_v59  ;;  %v9240_v45 = vcombine.high %v9168_v11, %v9176_v7  ;;  %v10709_v57 = vld [vmem:[%s13162_s16 + $0x4b8] sm:$0xff]   ;;  %v10710_v58 = vld [vmem:[%s13162_s16 + $0x470] sm:$0xff]   ;;  %v10719_v0 = vld [vmem:[%s13162_s16 + $0x4e0] sm:$0xff]  }
0x1f96   :  { %v9239_v5 = vcombine.low %v9168_v11, %v9176_v7  ;;  %v10711_v25 = vld [vmem:[%s13162_s16 + $0x4f0] sm:$0xff]   ;;  %v10720_v11 = vld [vmem:[%s13162_s16 + $0x420] sm:$0xff]  }
0x1f97   :  { %v12493_v3 = vpack.c.bf16 %v12487_v2, %v12489_v13  ;;  %v10712_v59 = vld [vmem:[%s13162_s16 + $0x430] sm:$0xff]   ;;  %v10721_v7 = vld [vmem:[%s13162_s16 + $0x4a0] sm:$0xff]  }
0x1f98   :  { %v10727_v17 = vld [vmem:[%s13162_s16 + $0x4d0] sm:$0xff]  }
0x1f99   :  { %9293 = vmatmul.mubr.msk.bf16.vlgmr.msra.gmra.mxu1 %vm186_vm1, %v12493_v3  ;;  %9294 = vmatmul.mubr.msk.bf16.vlgmr.msra.gmra.mxu0 %vm186_vm1, %v12493_v3 }
0x1f9a   :  { %7000 = vmatpush1.bf16.msra.mxu1 %v9281_v55  ;;  %7043 = vmatpush1.bf16.msra.mxu0 %v9283_v49  ;;  %v9208_v55 = vld [vmem:[%s13161_s14 + $0x368] sm:$0xff]  ;;  %v9270_v49 = vcombine.high %v9199_v38, %v9207_v27 }
0x1f9b   :  { %7001 = vmatprep.subr.bf16.mxu1 %v9266_v16  ;;  %7044 = vmatprep.subr.bf16.mxu0 %v9268_v52  ;;  %v9272_v36 = vcombine.high %v9200_v53, %v9208_v55  ;;  %v9271_v48 = vcombine.low %v9200_v53, %v9208_v55  ;;  %v9218_v16 = vld [vmem:[%s13161_s14 + $0x3b8] sm:$0xff] }
0x1f9c   :  { %7023 = vmatprep.mubr.bf16.mxu1 %v10927_v18  ;;  %7066 = vmatprep.mubr.bf16.mxu0 %v10927_v18  ;;  %v9226_v52 = vld [vmem:[%s13161_s14 + $0x3f8] sm:$0xff] }
0x1f9d   :  { %v9292_v10 = vcombine.high %v9218_v16, %v9226_v52  ;;  %v9291_v19 = vcombine.low %v9218_v16, %v9226_v52  ;;  %v10728_v16 = vld [vmem:[%s13162_s16 + $0x410] sm:$0xff]  }
0x1f9e   :  { %7002 = vmatpush1.bf16.msra.mxu1 %v9265_v30  ;;  %7045 = vmatpush1.bf16.msra.mxu0 %v9267_v14  ;;  %v9201_v30 = vld [vmem:[%s13161_s14 + $0x330] sm:$0xff] }
0x1f9f   :  { %7003 = vmatprep.subr.bf16.mxu1 %v9250_v15  ;;  %7046 = vmatprep.subr.bf16.mxu0 %v9252_v43  ;;  %v9209_v14 = vld [vmem:[%s13161_s14 + $0x370] sm:$0xff]  ;;  %v9202_v15 = vld [vmem:[%s13161_s14 + $0x338] sm:$0xff] }
0x1fa0   :  { %v9210_v43 = vld [vmem:[%s13161_s14 + $0x378] sm:$0xff]  ;;  %v9274_v20 = vcombine.high %v9201_v30, %v9209_v14  ;;  %v9273_v32 = vcombine.low %v9201_v30, %v9209_v14  ;;  %v10729_v52 = vld [vmem:[%s13162_s16 + $0x490] sm:$0xff]   ;;  %v10734_v30 = vld [vmem:[%s13162_s16 + $0x440] sm:$0xff]  }
0x1fa1   :  { %v9276_v46 = vcombine.high %v9202_v15, %v9210_v43  ;;  %v9275_v35 = vcombine.low %v9202_v15, %v9210_v43  ;;  %v10735_v14 = vld [vmem:[%s13162_s16 + $0x4c0] sm:$0xff]  }
0x1fa2   :  { %7004 = vmatpush1.bf16.msra.mxu1 %v9249_v21  ;;  %7047 = vmatpush1.bf16.msra.mxu0 %v9251_v54  ;;  %v9185_v21 = vld [vmem:[%s13161_s14 + $0x2b0] sm:$0xff]  ;;  %v10736_v15 = vld [vmem:[%s13162_s16 + $0x400] sm:$0xff]  }
0x1fa3   :  { %7005 = vmatprep.subr.bf16.mxu1 %v9234_v29  ;;  %7048 = vmatprep.subr.bf16.mxu0 %v9236_v24  ;;  %v9193_v54 = vld [vmem:[%s13161_s14 + $0x2f0] sm:$0xff]  ;;  %v9186_v29 = vld [vmem:[%s13161_s14 + $0x2b8] sm:$0xff]  ;;  %v10737_v43 = vld [vmem:[%s13162_s16 + $0x480] sm:$0xff]  }
0x1fa4   :  { %v9194_v24 = vld [vmem:[%s13161_s14 + $0x2f8] sm:$0xff]  ;;  %v9258_v40 = vcombine.high %v9185_v21, %v9193_v54  ;;  %v9257_v38 = vcombine.low %v9185_v21, %v9193_v54 }
0x1fa5   :  { %v9260_v51 = vcombine.high %v9186_v29, %v9194_v24  ;;  %v9259_v27 = vcombine.low %v9186_v29, %v9194_v24 }
0x1fa6   :  { %7006 = vmatpush1.bf16.msra.mxu1 %v9233_v31  ;;  %7049 = vmatpush1.bf16.msra.mxu0 %v9235_v26  ;;  %v9169_v31 = vld [vmem:[%s13161_s14 + $0x230] sm:$0xff] }
0x1fa7   :  { %7085 = vmatprep.subr.bf16.mxu1 %v9286_v37  ;;  %7128 = vmatprep.subr.bf16.mxu0 %v9288_v50  ;;  %v9177_v26 = vld [vmem:[%s13161_s14 + $0x270] sm:$0xff]  ;;  %v9170_v37 = vld [vmem:[%s13161_s14 + $0x238] sm:$0xff] }
0x1fa8   :  { %v9178_v50 = vld [vmem:[%s13161_s14 + $0x278] sm:$0xff]  ;;  %v9242_v53 = vcombine.high %v9169_v31, %v9177_v26 }
0x1fa9   :  { %9295 = vmatmul.mubr.msk.bf16.vlgmr.msra.gmra.mxu1 %vm186_vm1, %v12493_v3  ;;  %9296 = vmatmul.mubr.msk.bf16.vlgmr.msra.gmra.mxu0 %vm186_vm1, %v12493_v3  ;;  %v9244_v55 = vcombine.high %v9170_v37, %v9178_v50 }
0x1faa   :  { %7086 = vmatpush1.bf16.msra.mxu1 %v9285_v56  ;;  %7129 = vmatpush1.bf16.msra.mxu0 %v9287_v33  ;;  %v9241_v56 = vcombine.low %v9169_v31, %v9177_v26  ;;  %v9243_v33 = vcombine.low %v9170_v37, %v9178_v50 }
0x1fab   :  { %7087 = vmatprep.subr.bf16.mxu1 %v9270_v49  ;;  %7130 = vmatprep.subr.bf16.mxu0 %v9272_v36  ;;  %v10706_v49 = vld [vmem:[%s13162_s16 + $0x478] sm:$0xff]  }
0x1fac   :  { %7109 = vmatprep.mubr.bf16.mxu1 %v10927_v18  ;;  %7152 = vmatprep.mubr.bf16.mxu0 %v10927_v18  ;;  %v10708_v36 = vld [vmem:[%s13162_s16 + $0x438] sm:$0xff]  }
0x1fae   :  { %7088 = vmatpush1.bf16.msra.mxu1 %v9269_v60  ;;  %7131 = vmatpush1.bf16.msra.mxu0 %v9271_v48  ;;  %v10713_v60 = vld [vmem:[%s13162_s16 + $0x4b0] sm:$0xff]   ;;  %v10714_v48 = vld [vmem:[%s13162_s16 + $0x468] sm:$0xff]  }
0x1faf   :  { %7089 = vmatprep.subr.bf16.mxu1 %v9254_v61  ;;  %7132 = vmatprep.subr.bf16.mxu0 %v9256_v62  ;;  %v10716_v61 = vld [vmem:[%s13162_s16 + $0x428] sm:$0xff]  }
0x1fb0   :  { %v10717_v62 = vld [vmem:[%s13162_s16 + $0x4a8] sm:$0xff]  }
0x1fb2   :  { %7090 = vmatpush1.bf16.msra.mxu1 %v9253_v34  ;;  %7133 = vmatpush1.bf16.msra.mxu0 %v9255_v1  ;;  %v10722_v34 = vld [vmem:[%s13162_s16 + $0x458] sm:$0xff]  }
0x1fb3   :  { %7091 = vmatprep.subr.bf16.mxu1 %v9238_v12  ;;  %7134 = vmatprep.subr.bf16.mxu0 %v9240_v45  ;;  %v10723_v1 = vld [vmem:[%s13162_s16 + $0x4d8] sm:$0xff]  }
0x1fb4   :  { %v10724_v12 = vld [vmem:[%s13162_s16 + $0x418] sm:$0xff]  }
0x1fb5   :  { %v10725_v45 = vld [vmem:[%s13162_s16 + $0x498] sm:$0xff]  }
0x1fb6   :  { %7092 = vmatpush1.bf16.msra.mxu1 %v9237_v4  ;;  %7135 = vmatpush1.bf16.msra.mxu0 %v9239_v5  ;;  %v10730_v4 = vld [vmem:[%s13162_s16 + $0x448] sm:$0xff]  }
0x1fb7   :  { %7171 = vmatprep.subr.bf16.mxu1 %v9290_v6  ;;  %7214 = vmatprep.subr.bf16.mxu0 %v9292_v10  ;;  %v10731_v5 = vld [vmem:[%s13162_s16 + $0x4c8] sm:$0xff]  }
0x1fb8   :  { %v10732_v6 = vld [vmem:[%s13162_s16 + $0x408] sm:$0xff]  }
0x1fb9   :  { %9297 = vmatmul.mubr.msk.bf16.vlgmr.msra.gmra.mxu1 %vm186_vm1, %v12493_v3  ;;  %9298 = vmatmul.mubr.msk.bf16.vlgmr.msra.gmra.mxu0 %vm186_vm1, %v12493_v3  ;;  %v10733_v10 = vld [vmem:[%s13162_s16 + $0x488] sm:$0xff]  }
0x1fba   :  { %7172 = vmatpush1.bf16.msra.mxu1 %v9289_v39  ;;  %7215 = vmatpush1.bf16.msra.mxu0 %v9291_v19  ;;  %v10738_v39 = vld [vmem:[%s13162_s16 + $0x578] sm:$0xff]  }
0x1fbb   :  { %7173 = vmatprep.subr.bf16.mxu1 %v9274_v20  ;;  %7216 = vmatprep.subr.bf16.mxu0 %v9276_v46  ;;  %v10739_v19 = vld [vmem:[%s13162_s16 + $0x5f8] sm:$0xff]   ;;  %v12742_v20 = vld [vmem:[%s13165_s15 + $0x10] sm:$0xff] }
0x1fbc   :  { %7195 = vmatprep.mubr.bf16.mxu1 %v10927_v18  ;;  %7238 = vmatprep.mubr.bf16.mxu0 %v10927_v18  ;;  %v10707_v18 = vld [vmem:[%s13162_s16 + $0x4f8] sm:$0xff]   ;;  %v6509_v54 = vrot.slane %v12742_v20, %v11703_v41  ;;  %v6517_v29 = vrot.slane %v12742_v20, %v11706_v47  ;;  %v6505_v24 = vrot.slane %v12742_v20, %v11709_v42 }
0x1fbe   :  { %7174 = vmatpush1.bf16.msra.mxu1 %v9273_v32  ;;  %7217 = vmatpush1.bf16.msra.mxu0 %v9275_v35  ;;  %v6513_v32 = vrot.slane %v12742_v20, %v11712_v44 }
0x1fbf   :  { %7175 = vmatprep.subr.bf16.mxu1 %v9258_v40  ;;  %7218 = vmatprep.subr.bf16.mxu0 %v9260_v51 }
0x1fc2   :  { %7176 = vmatpush1.bf16.msra.mxu1 %v9257_v38  ;;  %7219 = vmatpush1.bf16.msra.mxu0 %v9259_v27 }
0x1fc3   :  { %7177 = vmatprep.subr.bf16.mxu1 %v9242_v53  ;;  %7220 = vmatprep.subr.bf16.mxu0 %v9244_v55 }
0x1fc6   :  { %7178 = vmatpush1.bf16.msra.mxu1 %v9241_v56  ;;  %7221 = vmatpush1.bf16.msra.mxu0 %v9243_v33 }
0x1fc7   :  { %10030 = vmatprep.subr.bf16.mxu1 %v10706_v49  ;;  %10052 = vmatprep.subr.bf16.mxu0 %v10707_v18 }
0x1fc9   :  { %9299 = vmatmul.mubr.msk.bf16.vlgmr.msra.gmra.mxu1 %vm186_vm1, %v12493_v3  ;;  %9300 = vmatmul.mubr.msk.bf16.vlgmr.msra.gmra.mxu0 %vm186_vm1, %v12493_v3  ;;  %v10715_v3 = vld [vmem:[%s13162_s16 + $0x4e8] sm:$0xff]  }
0x1fca   :  { %10031 = vmatpush3.bf16.msra.mxu1 %v10708_v36  ;;  %10053 = vmatpush3.bf16.msra.mxu0 %v10709_v57 }
0x1fcb   :  { %10032 = vmatprep.subr.bf16.mxu1 %v10710_v58  ;;  %10054 = vmatprep.subr.bf16.mxu0 %v10711_v25 }
0x1fce   :  { %10033 = vmatpush3.bf16.msra.mxu1 %v10712_v59  ;;  %10055 = vmatpush3.bf16.msra.mxu0 %v10713_v60 }
0x1fcf   :  { %10034 = vmatprep.subr.bf16.mxu1 %v10714_v48  ;;  %10056 = vmatprep.subr.bf16.mxu0 %v10715_v3 }
0x1fd2   :  { %10035 = vmatpush3.bf16.msra.mxu1 %v10716_v61  ;;  %10057 = vmatpush3.bf16.msra.mxu0 %v10717_v62  ;;  %v10740_v62 = vld [vmem:[%s13162_s16 + $0x538] sm:$0xff]  }
0x1fd3   :  { %10036 = vmatprep.subr.bf16.mxu1 %v10718_v28  ;;  %10058 = vmatprep.subr.bf16.mxu0 %v10719_v0  ;;  %v10741_v28 = vld [vmem:[%s13162_s16 + $0x5b8] sm:$0xff]  }
0x1fd6   :  { %10037 = vmatpush3.bf16.msra.mxu1 %v10720_v11  ;;  %10059 = vmatpush3.bf16.msra.mxu0 %v10721_v7  ;;  %v10742_v7 = vld [vmem:[%s13162_s16 + $0x570] sm:$0xff]  }
0x1fd7   :  { %10038 = vmatprep.subr.bf16.mxu1 %v10722_v34  ;;  %10060 = vmatprep.subr.bf16.mxu0 %v10723_v1  ;;  %v10743_v34 = vld [vmem:[%s13162_s16 + $0x5f0] sm:$0xff]  }
0x1fd8   :  { %v10744_v1 = vld [vmem:[%s13162_s16 + $0x530] sm:$0xff]  }
0x1fda   :  { %10039 = vmatpush3.bf16.msra.mxu1 %v10724_v12  ;;  %10061 = vmatpush3.bf16.msra.mxu0 %v10725_v45  ;;  %v10745_v12 = vld [vmem:[%s13162_s16 + $0x5b0] sm:$0xff]  }
0x1fdb   :  { %10040 = vmatprep.subr.bf16.mxu1 %v10726_v63  ;;  %10062 = vmatprep.subr.bf16.mxu0 %v10727_v17  ;;  %v10746_v17 = vld [vmem:[%s13162_s16 + $0x568] sm:$0xff]  }
0x1fde   :  { %10041 = vmatpush3.bf16.msra.mxu1 %v10728_v16  ;;  %10063 = vmatpush3.bf16.msra.mxu0 %v10729_v52  ;;  %v10747_v16 = vld [vmem:[%s13162_s16 + $0x5e8] sm:$0xff]   ;;  %v6525_v52 = vrot.slane %v12742_v20, %v11740_v22 }
0x1fdf   :  { %10042 = vmatprep.subr.bf16.mxu1 %v10730_v4  ;;  %10064 = vmatprep.subr.bf16.mxu0 %v10731_v5  ;;  %v6533_v4 = vrot.slane %v12742_v20, %v11743_v23 }
0x1fe2   :  { %10043 = vmatpush3.bf16.msra.mxu1 %v10732_v6  ;;  %10065 = vmatpush3.bf16.msra.mxu0 %v10733_v10  ;;  %v10748_v10 = vld [vmem:[%s13162_s16 + $0x528] sm:$0xff]  }
0x1fe3   :  { %10044 = vmatprep.subr.bf16.mxu1 %v10734_v30  ;;  %10066 = vmatprep.subr.bf16.mxu0 %v10735_v14  ;;  %v10749_v30 = vld [vmem:[%s13162_s16 + $0x5a8] sm:$0xff]  }
0x1fe6   :  { %10045 = vmatpush3.bf16.msra.mxu1 %v10736_v15  ;;  %10067 = vmatpush3.bf16.msra.mxu0 %v10737_v43  ;;  %v10750_v43 = vld [vmem:[%s13162_s16 + $0x560] sm:$0xff]  }
0x1fe7   :  { %10074 = vmatprep.subr.bf16.mxu1 %v10738_v39  ;;  %10096 = vmatprep.subr.bf16.mxu0 %v10739_v19  ;;  %v10751_v39 = vld [vmem:[%s13162_s16 + $0x5e0] sm:$0xff]  }
0x2059   :  { %v6939_v46 = vpop.f32.mrf.mxu1  ;;  %v6982_v21 = vpop.f32.mrf.mxu0 }
0x205a   :  { %v6940_v27 = vadd.f32 %v6939_v46, %v6505_v24  ;;  %v6983_v53 = vadd.f32 %v6982_v21, %v6513_v32 }
0x205b   :  { %v6941_v35 = vpop.f32.mrf.mxu1  ;;  %v6984_v40 = vpop.f32.mrf.mxu0 }
0x205c   :  { %v6942_v26 = vadd.f32 %v6941_v35, %v6509_v54  ;;  %v6985_v37 = vadd.f32 %v6984_v40, %v6517_v29  ;;  %v7249_v60 = vmax.f32 %v6940_v27, 0.0  ;;  %v7251_v48 = vmax.f32 %v6983_v53, 0.0  ;;  %v10753_v35 = vld [vmem:[%s13162_s16 + $0x5a0] sm:$0xff]   ;;  %v10754_v40 = vld [vmem:[%s13162_s16 + $0x558] sm:$0xff]  }
0x205d   :  { %v6943_v51 = vpop.f32.mrf.mxu1  ;;  %v6986_v31 = vpop.f32.mrf.mxu0  ;;  %v10756_v53 = vld [vmem:[%s13162_s16 + $0x518] sm:$0xff]  }
0x205e   :  { %v6944_v50 = vadd.f32 %v6943_v51, %v6505_v24  ;;  %v6987_v38 = vadd.f32 %v6986_v31, %v6513_v32  ;;  %v7250_v57 = vmax.f32 %v6942_v26, 0.0  ;;  %v7252_v58 = vmax.f32 %v6985_v37, 0.0  ;;  %v10752_v32 = vld [vmem:[%s13162_s16 + $0x520] sm:$0xff]   ;;  %v10755_v51 = vld [vmem:[%s13162_s16 + $0x5d8] sm:$0xff]  }
0x205f   :  { %v6945_v55 = vpop.f32.mrf.mxu1  ;;  %v6988_v56 = vpop.f32.mrf.mxu0 }
0x2060   :  { %v6946_v33 = vadd.f32 %v6945_v55, %v6509_v54  ;;  %v6989_v49 = vadd.f32 %v6988_v56, %v6517_v29  ;;  %v7265_v18 = vmax.f32 %v6944_v50, 0.0  ;;  %v7267_v36 = vmax.f32 %v6987_v38, 0.0  ;;  %v10757_v55 = vld [vmem:[%s13162_s16 + $0x598] sm:$0xff]   ;;  %v10758_v56 = vld [vmem:[%s13162_s16 + $0x550] sm:$0xff]  }
0x2062   :  { %v7266_v25 = vmax.f32 %v6946_v33, 0.0  ;;  %v7268_v59 = vmax.f32 %v6989_v49, 0.0  ;;  %v7281_v0 = vpack.c.bf16 %v7265_v18, %v7249_v60  ;;  %v7283_v11 = vpack.c.bf16 %v7267_v36, %v7251_v48  ;;  %v10759_v33 = vld [vmem:[%s13162_s16 + $0x5d0] sm:$0xff]   ;;  %v12843_v48 = vld [vmem:[%s13165_s15 + $0x18] sm:$0xff] }
0x2063   :  { %v10760_v49 = vld [vmem:[%s13162_s16 + $0x510] sm:$0xff]   ;;  %v6529_v60 = vrot.slane %v12742_v20, %v11805_v9 }
0x2064   :  { %v7282_v3 = vpack.c.bf16 %v7266_v25, %v7250_v57  ;;  %v7284_v61 = vpack.c.bf16 %v7268_v59, %v7252_v58  ;;  %v10761_v18 = vld [vmem:[%s13162_s16 + $0x590] sm:$0xff]   ;;  %v10762_v58 = vld [vmem:[%s13162_s16 + $0x548] sm:$0xff]   ;;  %v6521_v59 = vrot.slane %v12742_v20, %v11802_v8 }
0x2065   :  { %v10763_v25 = vld [vmem:[%s13162_s16 + $0x5c8] sm:$0xff]  }
0x2066   :  { %8362 = vmatprep.mubr.bf16.mxu1 %v7282_v3  ;;  %8403 = vmatprep.mubr.bf16.mxu0 %v7284_v61  ;;  %v10765_v20 = vld [vmem:[%s13162_s16 + $0x588] sm:$0xff]  }
0x2067   :  { %8363 = vmatmul.mubr.bf16.vlgmr.msra.gmra.mxu1 %v7281_v0  ;;  %8404 = vmatmul.mubr.bf16.vlgmr.msra.gmra.mxu0 %v7283_v11 }
0x2068   :  { %10075 = vmatpush3.bf16.msra.mxu1 %v10740_v62  ;;  %10097 = vmatpush3.bf16.msra.mxu0 %v10741_v28  ;;  %v6541_v62 = vrot.slane %v12843_v48, %v11703_v41  ;;  %v10764_v28 = vld [vmem:[%s13162_s16 + $0x508] sm:$0xff]   ;;  %v10766_v41 = vld [vmem:[%s13162_s16 + $0x540] sm:$0xff]  }
0x2069   :  { %v12770_v45 = vpop.f32.mrf.mxu1  ;;  %v12772_v63 = vpop.f32.mrf.mxu0  ;;  %10076 = vmatprep.subr.bf16.mxu1 %v10742_v7  ;;  %10098 = vmatprep.subr.bf16.mxu0 %v10743_v34  ;;  %v6549_v7 = vrot.slane %v12843_v48, %v11706_v47 }
0x206b   :  { %v7027_v5 = vpop.f32.mrf.mxu1  ;;  %v7070_v6 = vpop.f32.mrf.mxu0 }
0x206c   :  { %10077 = vmatpush3.bf16.msra.mxu1 %v10744_v1  ;;  %10099 = vmatpush3.bf16.msra.mxu0 %v10745_v12  ;;  %v7028_v19 = vadd.f32 %v7027_v5, %v6525_v52  ;;  %v7071_v46 = vadd.f32 %v7070_v6, %v6533_v4  ;;  %v10767_v12 = vld [vmem:[%s13162_s16 + $0x5c0] sm:$0xff]  }
0x206d   :  { %v7029_v14 = vpop.f32.mrf.mxu1  ;;  %v7072_v15 = vpop.f32.mrf.mxu0  ;;  %10078 = vmatprep.subr.bf16.mxu1 %v10746_v17  ;;  %10100 = vmatprep.subr.bf16.mxu0 %v10747_v16  ;;  %v7026_v17 = vadd.f32 %v12770_v45, %v6521_v59  ;;  %v7069_v16 = vadd.f32 %v12772_v63, %v6529_v60  ;;  %v10770_v63 = vld [vmem:[%s13162_s16 + $0x678] sm:$0xff]  }
0x206e   :  { %v7254_v31 = vmax.f32 %v7028_v19, 0.0  ;;  %v7256_v26 = vmax.f32 %v7071_v46, 0.0  ;;  %v7030_v0 = vadd.f32 %v7029_v14, %v6521_v59  ;;  %v7073_v11 = vadd.f32 %v7072_v15, %v6529_v60  ;;  %v10785_v59 = vld [vmem:[%s13162_s16 + $0x6a0] sm:$0xff]   ;;  %v10786_v60 = vld [vmem:[%s13162_s16 + $0x658] sm:$0xff]  }
0x206f   :  { %v7031_v21 = vpop.f32.mrf.mxu1  ;;  %v7074_v54 = vpop.f32.mrf.mxu0  ;;  %v7253_v19 = vmax.f32 %v7026_v17, 0.0  ;;  %v7255_v46 = vmax.f32 %v7069_v16, 0.0  ;;  %v10793_v17 = vld [vmem:[%s13162_s16 + $0x690] sm:$0xff]   ;;  %v10794_v16 = vld [vmem:[%s13162_s16 + $0x648] sm:$0xff]  }
0x2070   :  { %v7032_v29 = vadd.f32 %v7031_v21, %v6525_v52  ;;  %v7075_v24 = vadd.f32 %v7074_v54, %v6533_v4  ;;  %10079 = vmatpush3.bf16.msra.mxu1 %v10748_v10  ;;  %10101 = vmatpush3.bf16.msra.mxu0 %v10749_v30  ;;  %v10768_v10 = vld [vmem:[%s13162_s16 + $0x500] sm:$0xff]   ;;  %v7269_v14 = vmax.f32 %v7030_v0, 0.0  ;;  %v7271_v15 = vmax.f32 %v7073_v11, 0.0  ;;  %v10790_v0 = vld [vmem:[%s13162_s16 + $0x650] sm:$0xff]  }
0x2071   :  { %10080 = vmatprep.subr.bf16.mxu1 %v10750_v43  ;;  %10102 = vmatprep.subr.bf16.mxu0 %v10751_v39  ;;  %v10769_v30 = vld [vmem:[%s13162_s16 + $0x580] sm:$0xff]   ;;  %v10771_v43 = vld [vmem:[%s13162_s16 + $0x6f8] sm:$0xff]   ;;  %v10791_v11 = vld [vmem:[%s13162_s16 + $0x6d0] sm:$0xff]  }
0x2072   :  { %v7270_v37 = vmax.f32 %v7032_v29, 0.0  ;;  %v7272_v50 = vmax.f32 %v7075_v24, 0.0  ;;  %v10772_v29 = vld [vmem:[%s13162_s16 + $0x638] sm:$0xff]   ;;  %v7285_v24 = vpack.c.bf16 %v7269_v14, %v7253_v19  ;;  %v10800_v19 = vld [vmem:[%s13162_s16 + $0x600] sm:$0xff]  }
0x2074   :  { %v7286_v38 = vpack.c.bf16 %v7270_v37, %v7254_v31  ;;  %v7288_v27 = vpack.c.bf16 %v7272_v50, %v7256_v26  ;;  %10081 = vmatpush3.bf16.msra.mxu1 %v10752_v32  ;;  %10103 = vmatpush3.bf16.msra.mxu0 %v10753_v35  ;;  %v7287_v32 = vpack.c.bf16 %v7271_v15, %v7255_v46  ;;  %v10774_v31 = vld [vmem:[%s13162_s16 + $0x670] sm:$0xff]  }
0x2075   :  { %10082 = vmatprep.subr.bf16.mxu1 %v10754_v40  ;;  %10104 = vmatprep.subr.bf16.mxu0 %v10755_v51  ;;  %v10773_v40 = vld [vmem:[%s13162_s16 + $0x6b8] sm:$0xff]   ;;  %v10775_v26 = vld [vmem:[%s13162_s16 + $0x6f0] sm:$0xff]  }
0x2076   :  { %8444 = vmatprep.mubr.bf16.mxu1 %v7286_v38  ;;  %8485 = vmatprep.mubr.bf16.mxu0 %v7288_v27  ;;  %v10776_v50 = vld [vmem:[%s13162_s16 + $0x630] sm:$0xff]   ;;  %v10778_v27 = vld [vmem:[%s13162_s16 + $0x668] sm:$0xff]  }
0x2077   :  { %v10777_v38 = vld [vmem:[%s13162_s16 + $0x6b0] sm:$0xff]  }
0x2078   :  { %10083 = vmatpush3.bf16.msra.mxu1 %v10756_v53  ;;  %10105 = vmatpush3.bf16.msra.mxu0 %v10757_v55  ;;  %v10779_v53 = vld [vmem:[%s13162_s16 + $0x6e8] sm:$0xff]  }
0x2079   :  { %v12826_v36 = vpop.f32.mrf.mxu1  ;;  %v12828_v57 = vpop.f32.mrf.mxu0  ;;  %10084 = vmatprep.subr.bf16.mxu1 %v10758_v56  ;;  %10106 = vmatprep.subr.bf16.mxu0 %v10759_v33  ;;  %v10780_v55 = vld [vmem:[%s13162_s16 + $0x628] sm:$0xff]   ;;  %v10782_v33 = vld [vmem:[%s13162_s16 + $0x660] sm:$0xff]  }
0x207a   :  { %v10781_v56 = vld [vmem:[%s13162_s16 + $0x6a8] sm:$0xff]  }
0x207b   :  { %v7113_v3 = vpop.f32.mrf.mxu1  ;;  %v7156_v61 = vpop.f32.mrf.mxu0 }
0x207c   :  { %10085 = vmatpush3.bf16.msra.mxu1 %v10760_v49  ;;  %10107 = vmatpush3.bf16.msra.mxu0 %v10761_v18  ;;  %v7114_v4 = vadd.f32 %v7113_v3, %v6541_v62  ;;  %v7157_v45 = vadd.f32 %v7156_v61, %v6549_v7  ;;  %v10783_v49 = vld [vmem:[%s13162_s16 + $0x6e0] sm:$0xff]   ;;  %v10787_v3 = vld [vmem:[%s13162_s16 + $0x6d8] sm:$0xff]  }
0x207d   :  { %v12855_v34 = vpop.f32.mrf.mxu1  ;;  %v12857_v1 = vpop.f32.mrf.mxu0  ;;  %10086 = vmatprep.subr.bf16.mxu1 %v10762_v58  ;;  %10108 = vmatprep.subr.bf16.mxu0 %v10763_v25  ;;  %v10784_v58 = vld [vmem:[%s13162_s16 + $0x620] sm:$0xff]  }
0x207e   :  { %v7258_v54 = vmax.f32 %v7114_v4, 0.0  ;;  %v7260_v35 = vmax.f32 %v7157_v45, 0.0  ;;  %v6545_v4 = vrot.slane %v12843_v48, %v11712_v44  ;;  %v10798_v44 = vld [vmem:[%s13162_s16 + $0x640] sm:$0xff]   ;;  %v6565_v45 = vrot.slane %v12843_v48, %v11743_v23 }
0x207f   :  { %v7117_v52 = vpop.f32.mrf.mxu1  ;;  %v7160_v47 = vpop.f32.mrf.mxu0  ;;  %v10801_v23 = vld [vmem:[%s13162_s16 + $0x680] sm:$0xff]  }
0x2080   :  { %v7118_v5 = vadd.f32 %v7117_v52, %v6541_v62  ;;  %v7161_v6 = vadd.f32 %v7160_v47, %v6549_v7  ;;  %10087 = vmatpush3.bf16.msra.mxu1 %v10764_v28  ;;  %10109 = vmatpush3.bf16.msra.mxu0 %v10765_v20  ;;  %v10788_v62 = vld [vmem:[%s13162_s16 + $0x618] sm:$0xff]   ;;  %v10795_v52 = vld [vmem:[%s13162_s16 + $0x6c8] sm:$0xff]   ;;  %v6537_v47 = vrot.slane %v12843_v48, %v11709_v42 }
0x2081   :  { %10088 = vmatprep.subr.bf16.mxu1 %v10766_v41  ;;  %10110 = vmatprep.subr.bf16.mxu0 %v10767_v12  ;;  %v10789_v20 = vld [vmem:[%s13162_s16 + $0x698] sm:$0xff]   ;;  %v10792_v41 = vld [vmem:[%s13162_s16 + $0x610] sm:$0xff]   ;;  %v10797_v42 = vld [vmem:[%s13162_s16 + $0x688] sm:$0xff]   ;;  %v7159_v15 = vadd.f32 %v12857_v1, %v6545_v4 }
0x2082   :  { %v7274_v39 = vmax.f32 %v7118_v5, 0.0  ;;  %v7276_v21 = vmax.f32 %v7161_v6, 0.0  ;;  %v10796_v6 = vld [vmem:[%s13162_s16 + $0x608] sm:$0xff]  }
0x2084   :  { %10089 = vmatpush3.bf16.msra.mxu1 %v10768_v10  ;;  %10111 = vmatpush3.bf16.msra.mxu0 %v10769_v30  ;;  %v7290_v51 = vpack.c.bf16 %v7274_v39, %v7258_v54  ;;  %v7292_v37 = vpack.c.bf16 %v7276_v21, %v7260_v35  ;;  %v7116_v10 = vadd.f32 %v12855_v34, %v6537_v47  ;;  %v7275_v21 = vmax.f32 %v7159_v15, 0.0  ;;  %v10803_v54 = vld [vmem:[%s13162_s16 + $0x7f8] sm:$0xff]   ;;  %v10832_v15 = vld [vmem:[%s13162_s16 + $0x700] sm:$0xff]  }
0x2085   :  { %10118 = vmatprep.subr.bf16.mxu1 %v10770_v63  ;;  %10140 = vmatprep.subr.bf16.mxu0 %v10771_v43  ;;  %v6557_v30 = vrot.slane %v12843_v48, %v11740_v22  ;;  %v10799_v22 = vld [vmem:[%s13162_s16 + $0x6c0] sm:$0xff]   ;;  %v7112_v34 = vadd.f32 %v12826_v36, %v6537_v47  ;;  %v7155_v43 = vadd.f32 %v12828_v57, %v6545_v4  ;;  %v10802_v36 = vld [vmem:[%s13162_s16 + $0x778] sm:$0xff]   ;;  %v10825_v47 = vld [vmem:[%s13162_s16 + $0x790] sm:$0xff]  }
0x2086   :  { %v7273_v1 = vmax.f32 %v7116_v10, 0.0  ;;  %v10826_v4 = vld [vmem:[%s13162_s16 + $0x748] sm:$0xff]   ;;  %v6561_v10 = vrot.slane %v12843_v48, %v11805_v9  ;;  %v10831_v9 = vld [vmem:[%s13162_s16 + $0x7c0] sm:$0xff]  }
0x2087   :  { %8445 = vmatmul.mubr.bf16.vlgmr.msra.gmra.mxu1 %v7285_v24  ;;  %8486 = vmatmul.mubr.bf16.vlgmr.msra.gmra.mxu0 %v7287_v32  ;;  %v7259_v32 = vmax.f32 %v7155_v43, 0.0 }
0x2088   :  { %10119 = vmatpush3.bf16.msra.mxu1 %v10772_v29  ;;  %8526 = vmatprep.mubr.bf16.mxu1 %v7290_v51  ;;  %v7257_v29 = vmax.f32 %v7112_v34, 0.0 }
0x2089   :  { %10141 = vmatpush3.bf16.msra.mxu0 %v10773_v40  ;;  %8567 = vmatprep.mubr.bf16.mxu0 %v7292_v37  ;;  %v12915_v18 = vpop.f32.mrf.mxu1  ;;  %v12920_v25 = vpop.f32.mrf.mxu0  ;;  %v10804_v40 = vld [vmem:[%s13162_s16 + $0x738] sm:$0xff]   ;;  %v7291_v37 = vpack.c.bf16 %v7275_v21, %v7259_v32 }
0x208a   :  { %10120 = vmatprep.subr.bf16.mxu1 %v10774_v31  ;;  %10142 = vmatprep.subr.bf16.mxu0 %v10775_v26  ;;  %v7289_v51 = vpack.c.bf16 %v7273_v1, %v7257_v29  ;;  %v10805_v26 = vld [vmem:[%s13162_s16 + $0x7b8] sm:$0xff]  }
0x208b   :  { %v7199_v61 = vpop.f32.mrf.mxu1  ;;  %v7242_v28 = vpop.f32.mrf.mxu0 }
0x208c   :  { %10121 = vmatpush3.bf16.msra.mxu1 %v10776_v50  ;;  %v7200_v46 = vadd.f32 %v7199_v61, %v6557_v30  ;;  %v7243_v57 = vadd.f32 %v7242_v28, %v6565_v45  ;;  %v10815_v61 = vld [vmem:[%s13162_s16 + $0x7e0] sm:$0xff]  }
0x208d   :  { %10143 = vmatpush3.bf16.msra.mxu0 %v10777_v38  ;;  %10122 = vmatprep.subr.bf16.mxu1 %v10778_v27  ;;  %v12943_v7 = vpop.f32.mrf.mxu1  ;;  %v12948_v12 = vpop.f32.mrf.mxu0  ;;  %v10806_v38 = vld [vmem:[%s13162_s16 + $0x770] sm:$0xff]   ;;  %v10817_v28 = vld [vmem:[%s13162_s16 + $0x7a0] sm:$0xff]  }
0x208e   :  { %10144 = vmatprep.subr.bf16.mxu0 %v10779_v53  ;;  %v7262_v31 = vmax.f32 %v7200_v46, 0.0  ;;  %v7264_v50 = vmax.f32 %v7243_v57, 0.0  ;;  %v10807_v53 = vld [vmem:[%s13162_s16 + $0x7f0] sm:$0xff]  }
0x208f   :  { %v7203_v5 = vpop.f32.mrf.mxu1  ;;  %v7246_v14 = vpop.f32.mrf.mxu0 }
0x2090   :  { %10123 = vmatpush3.bf16.msra.mxu1 %v10780_v55  ;;  %v7204_v63 = vadd.f32 %v7203_v5, %v6557_v30  ;;  %v7247_v39 = vadd.f32 %v7246_v14, %v6565_v45  ;;  %v10827_v5 = vld [vmem:[%s13162_s16 + $0x7c8] sm:$0xff]  }
0x2091   :  { %10145 = vmatpush3.bf16.msra.mxu0 %v10781_v56  ;;  %10124 = vmatprep.subr.bf16.mxu1 %v10782_v33  ;;  %v10808_v56 = vld [vmem:[%s13162_s16 + $0x730] sm:$0xff]   ;;  %v10828_v30 = vld [vmem:[%s13162_s16 + $0x708] sm:$0xff]  }
0x2092   :  { %10146 = vmatprep.subr.bf16.mxu0 %v10783_v49  ;;  %v7278_v24 = vmax.f32 %v7204_v63, 0.0  ;;  %v7280_v35 = vmax.f32 %v7247_v39, 0.0  ;;  %v10809_v33 = vld [vmem:[%s13162_s16 + $0x7b0] sm:$0xff]   ;;  %v10810_v49 = vld [vmem:[%s13162_s16 + $0x768] sm:$0xff]  }
0x2094   :  { %10125 = vmatpush3.bf16.msra.mxu1 %v10784_v58  ;;  %v7294_v27 = vpack.c.bf16 %v7278_v24, %v7262_v31  ;;  %v7296_v55 = vpack.c.bf16 %v7280_v35, %v7264_v50  ;;  %v10811_v58 = vld [vmem:[%s13162_s16 + $0x7e8] sm:$0xff]   ;;  %v9558_v31 = vld [vmem:[%s13166_s17 + $0x1] ss:$0 sm:$0xff] }
0x2095   :  { %10147 = vmatpush3.bf16.msra.mxu0 %v10785_v59  ;;  %10126 = vmatprep.subr.bf16.mxu1 %v10786_v60  ;;  %v10812_v59 = vld [vmem:[%s13162_s16 + $0x728] sm:$0xff]  }
0x2096   :  { %10148 = vmatprep.subr.bf16.mxu0 %v10787_v3  ;;  %v10813_v60 = vld [vmem:[%s13162_s16 + $0x7a8] sm:$0xff]   ;;  %v10814_v3 = vld [vmem:[%s13162_s16 + $0x760] sm:$0xff]  }
0x2098   :  { %10127 = vmatpush3.bf16.msra.mxu1 %v10788_v62  ;;  %v10816_v62 = vld [vmem:[%s13162_s16 + $0x720] sm:$0xff]  }
0x2099   :  { %10149 = vmatpush3.bf16.msra.mxu0 %v10789_v20  ;;  %10128 = vmatprep.subr.bf16.mxu1 %v10790_v0  ;;  %v10818_v20 = vld [vmem:[%s13162_s16 + $0x758] sm:$0xff]  }
0x209a   :  { %10150 = vmatprep.subr.bf16.mxu0 %v10791_v11  ;;  %v10819_v0 = vld [vmem:[%s13162_s16 + $0x7d8] sm:$0xff]  }
0x209b   :  { %v10820_v11 = vld [vmem:[%s13162_s16 + $0x718] sm:$0xff]  }
0x209c   :  { %10129 = vmatpush3.bf16.msra.mxu1 %v10792_v41  ;;  %v10821_v41 = vld [vmem:[%s13162_s16 + $0x798] sm:$0xff]  }
0x209d   :  { %10151 = vmatpush3.bf16.msra.mxu0 %v10793_v17  ;;  %10130 = vmatprep.subr.bf16.mxu1 %v10794_v16  ;;  %v10822_v17 = vld [vmem:[%s13162_s16 + $0x750] sm:$0xff]  }
0x209e   :  { %10152 = vmatprep.subr.bf16.mxu0 %v10795_v52  ;;  %v10823_v16 = vld [vmem:[%s13162_s16 + $0x7d0] sm:$0xff]  }
0x209f   :  { %v10824_v52 = vld [vmem:[%s13162_s16 + $0x710] sm:$0xff]  }
0x20a0   :  { %10131 = vmatpush3.bf16.msra.mxu1 %v10796_v6  ;;  %v6553_v6 = vrot.slane %v12843_v48, %v11802_v8  ;;  %v10830_v8 = vld [vmem:[%s13162_s16 + $0x740] sm:$0xff]  }
0x20a1   :  { %10153 = vmatpush3.bf16.msra.mxu0 %v10797_v42  ;;  %10132 = vmatprep.subr.bf16.mxu1 %v10798_v44  ;;  %v10829_v42 = vld [vmem:[%s13162_s16 + $0x788] sm:$0xff]   ;;  %v7245_v44 = vadd.f32 %v12948_v12, %v6561_v10  ;;  %v10833_v12 = vld [vmem:[%s13162_s16 + $0x780] sm:$0xff]  }
0x20a2   :  { %10154 = vmatprep.subr.bf16.mxu0 %v10799_v22  ;;  %v7202_v14 = vadd.f32 %v12943_v7, %v6553_v6  ;;  %v7198_v48 = vadd.f32 %v12915_v18, %v6553_v6  ;;  %v7241_v7 = vadd.f32 %v12920_v25, %v6561_v10 }
0x20a3   :  { %v7279_v22 = vmax.f32 %v7245_v44, 0.0 }
0x20a4   :  { %10133 = vmatpush3.bf16.msra.mxu1 %v10800_v19  ;;  %v7277_v45 = vmax.f32 %v7202_v14, 0.0  ;;  %v7261_v34 = vmax.f32 %v7198_v48, 0.0  ;;  %v7263_v63 = vmax.f32 %v7241_v7, 0.0 }
0x20a5   :  { %10155 = vmatpush3.bf16.msra.mxu0 %v10801_v23  ;;  %10162 = vmatprep.subr.bf16.mxu1 %v10802_v36 }
0x20a6   :  { %10184 = vmatprep.subr.bf16.mxu0 %v10803_v54  ;;  %v7293_v18 = vpack.c.bf16 %v7277_v45, %v7261_v34  ;;  %v7295_v25 = vpack.c.bf16 %v7279_v22, %v7263_v63 }
0x20a7   :  { %8527 = vmatmul.mubr.bf16.vlgmr.msra.gmra.mxu1 %v7289_v51 }
0x20a8   :  { %8568 = vmatmul.mubr.bf16.vlgmr.msra.gmra.mxu0 %v7291_v37  ;;  %10163 = vmatpush3.bf16.msra.mxu1 %v10804_v40 }
0x20a9   :  { %8608 = vmatprep.mubr.bf16.mxu1 %v7294_v27  ;;  %10185 = vmatpush3.bf16.msra.mxu0 %v10805_v26 }
0x20aa   :  { %8649 = vmatprep.mubr.bf16.mxu0 %v7296_v55  ;;  %10164 = vmatprep.subr.bf16.mxu1 %v10806_v38 }
0x20ab   :  { %10186 = vmatprep.subr.bf16.mxu0 %v10807_v53 }
0x20ac   :  { %10165 = vmatpush3.bf16.msra.mxu1 %v10808_v56 }
0x20ad   :  { %10187 = vmatpush3.bf16.msra.mxu0 %v10809_v33  ;;  %10166 = vmatprep.subr.bf16.mxu1 %v10810_v49 }
0x20ae   :  { %10188 = vmatprep.subr.bf16.mxu0 %v10811_v58 }
0x20b0   :  { %10167 = vmatpush3.bf16.msra.mxu1 %v10812_v59 }
0x20b1   :  { %10189 = vmatpush3.bf16.msra.mxu0 %v10813_v60  ;;  %10168 = vmatprep.subr.bf16.mxu1 %v10814_v3 }
0x20b2   :  { %10190 = vmatprep.subr.bf16.mxu0 %v10815_v61 }
0x20b4   :  { %10169 = vmatpush3.bf16.msra.mxu1 %v10816_v62 }
0x20b5   :  { %10191 = vmatpush3.bf16.msra.mxu0 %v10817_v28  ;;  %10170 = vmatprep.subr.bf16.mxu1 %v10818_v20 }
0x20b6   :  { %10192 = vmatprep.subr.bf16.mxu0 %v10819_v0 }
0x20b8   :  { %10171 = vmatpush3.bf16.msra.mxu1 %v10820_v11 }
0x20b9   :  { %10193 = vmatpush3.bf16.msra.mxu0 %v10821_v41  ;;  %10172 = vmatprep.subr.bf16.mxu1 %v10822_v17 }
0x20ba   :  { %10194 = vmatprep.subr.bf16.mxu0 %v10823_v16 }
0x20bc   :  { %10173 = vmatpush3.bf16.msra.mxu1 %v10824_v52 }
0x20bd   :  { %10195 = vmatpush3.bf16.msra.mxu0 %v10825_v47  ;;  %10174 = vmatprep.subr.bf16.mxu1 %v10826_v4 }
0x20be   :  { %10196 = vmatprep.subr.bf16.mxu0 %v10827_v5 }
0x20c0   :  { %10175 = vmatpush3.bf16.msra.mxu1 %v10828_v30 }
0x20c1   :  { %10197 = vmatpush3.bf16.msra.mxu0 %v10829_v42  ;;  %10176 = vmatprep.subr.bf16.mxu1 %v10830_v8 }
0x20c2   :  { %10198 = vmatprep.subr.bf16.mxu0 %v10831_v9 }
0x20c4   :  { %10177 = vmatpush3.bf16.msra.mxu1 %v10832_v15 }
0x20c5   :  { %10199 = vmatpush3.bf16.msra.mxu0 %v10833_v12 }
0x20c7   :  { %8609 = vmatmul.mubr.bf16.vlgmr.msra.gmra.mxu1 %v7293_v18 }
0x20c8   :  { %8650 = vmatmul.mubr.bf16.vlgmr.msra.gmra.mxu0 %v7295_v25 }
0x2127   :  { %v10046_v43 = vpop.f32.mrf.mxu1  ;;  %v10068_v39 = vpop.f32.mrf.mxu0 }
0x2129   :  { %v10047_v19 = vpop.f32.mrf.mxu1  ;;  %v10069_v1 = vpop.f32.mrf.mxu0 }
0x212a   :  { %v10048_v51 = vadd.f32 %v10047_v19, %v10046_v43  ;;  %v10070_v55 = vadd.f32 %v10069_v1, %v10068_v39 }
0x212b   :  { %v10049_v46 = vpop.f32.mrf.mxu1  ;;  %v10071_v23 = vpop.f32.mrf.mxu0 }
0x212c   :  { %v8365_v50 = vadd.f32 %v10048_v51, %v9558_v31 }
0x212d   :  { %v10050_v36 = vpop.f32.mrf.mxu1  ;;  %v10072_v57 = vpop.f32.mrf.mxu0 }
0x212e   :  { %v10051_v38 = vadd.f32 %v10050_v36, %v10049_v46  ;;  %v8406_v33 = vadd.f32 %v10070_v55, %v8365_v50  ;;  %v10073_v60 = vadd.f32 %v10072_v57, %v10071_v23  ;;  %v8709_v50 = vld [vmem:[%s13169_s20 + $0x18] sm:$0xff] }
0x2130   :  { %v8368_v49 = vadd.f32 %v10051_v38, %v9558_v31  ;;  %v8712_v31 = vld [vmem:[%s13169_s20 + $0x30] sm:$0xff] }
0x2131   :  { %v8708_v38 = vld [vmem:[%s13169_s20 + $0x10] sm:$0xff] }
0x2132   :  { %v8409_v62 = vadd.f32 %v10073_v60, %v8368_v49 }
0x2147   :  { %v10090_v21 = vpop.f32.mrf.mxu1  ;;  %v10112_v54 = vpop.f32.mrf.mxu0 }
0x2149   :  { %v10091_v29 = vpop.f32.mrf.mxu1  ;;  %v10113_v24 = vpop.f32.mrf.mxu0 }
0x214a   :  { %v10092_v56 = vadd.f32 %v10091_v29, %v10090_v21  ;;  %v10114_v28 = vadd.f32 %v10113_v24, %v10112_v54 }
0x214b   :  { %v10093_v32 = vpop.f32.mrf.mxu1  ;;  %v10115_v35 = vpop.f32.mrf.mxu0 }
0x214c   :  { %v8447_v3 = vadd.f32 %v10092_v56, %v8406_v33 }
0x214d   :  { %v10094_v40 = vpop.f32.mrf.mxu1  ;;  %v10116_v37 = vpop.f32.mrf.mxu0 }
0x214e   :  { %v10095_v61 = vadd.f32 %v10094_v40, %v10093_v32  ;;  %v8488_v41 = vadd.f32 %v10114_v28, %v8447_v3  ;;  %v10117_v16 = vadd.f32 %v10116_v37, %v10115_v35  ;;  %v8710_v37 = vld [vmem:[%s13169_s20 + $0x20] sm:$0xff] }
0x214f   :  { %v9689_v3 = vld [vmem:[%s13167_s18 + $0x1] ss:$0 sm:$0xff] }
0x2150   :  { %v8450_v17 = vadd.f32 %v10095_v61, %v8409_v62  ;;  %v9690_v62 = vld [vmem:[%s13168_s19 + $0x1] ss:$0 sm:$0xff] }
0x2152   :  { %v8491_v6 = vadd.f32 %v10117_v16, %v8450_v17  ;;  %v9691_v16 = vld [vmem:[%s13170_s21] ss:$0 sm:$0xff] }
0x2167   :  { %v10134_v26 = vpop.f32.mrf.mxu1 }
0x2168   :  { %v10156_v27 = vpop.f32.mrf.mxu0 }
0x2169   :  { %v10135_v53 = vpop.f32.mrf.mxu1 }
0x216a   :  { %v10157_v58 = vpop.f32.mrf.mxu0  ;;  %v10136_v20 = vadd.f32 %v10135_v53, %v10134_v26  ;;  %v8711_v26 = vld [vmem:[%s13169_s20 + $0x28] sm:$0xff]  ;;  %v8706_v53 = vld [vmem:[%s13169_s20] sm:$0xff] }
0x216b   :  { %v10137_v59 = vpop.f32.mrf.mxu1  ;;  %v10158_v10 = vadd.f32 %v10157_v58, %v10156_v27  ;;  %v8707_v27 = vld [vmem:[%s13169_s20 + $0x8] sm:$0xff] }
0x216c   :  { %v10159_v0 = vpop.f32.mrf.mxu0  ;;  %v8529_v52 = vadd.f32 %v10136_v20, %v8488_v41 }
0x216d   :  { %v10138_v11 = vpop.f32.mrf.mxu1 }
0x216e   :  { %v10139_v47 = vadd.f32 %v10138_v11, %v10137_v59  ;;  %v10160_v4 = vpop.f32.mrf.mxu0  ;;  %v8570_v42 = vadd.f32 %v10158_v10, %v8529_v52 }
0x216f   :  { %v10161_v7 = vadd.f32 %v10160_v4, %v10159_v0 }
0x2170   :  { %v8532_v8 = vadd.f32 %v10139_v47, %v8491_v6 }
0x2172   :  { %v8573_v34 = vadd.f32 %v10161_v7, %v8532_v8 }
0x2187   :  { %v10178_v5 = vpop.f32.mrf.mxu1 }
0x2188   :  { %v10200_v30 = vpop.f32.mrf.mxu0 }
0x2189   :  { %v10179_v14 = vpop.f32.mrf.mxu1 }
0x218a   :  { %v10180_v44 = vadd.f32 %v10179_v14, %v10178_v5  ;;  %v10201_v9 = vpop.f32.mrf.mxu0 }
0x218b   :  { %v10181_v48 = vpop.f32.mrf.mxu1  ;;  %v10202_v45 = vadd.f32 %v10201_v9, %v10200_v30 }
0x218c   :  { %v8611_v15 = vadd.f32 %v10180_v44, %v8570_v42  ;;  %v10203_v12 = vpop.f32.mrf.mxu0 }
0x218d   :  { %v10182_v22 = vpop.f32.mrf.mxu1 }
0x218e   :  { %v8652_v63 = vadd.f32 %v10202_v45, %v8611_v15  ;;  %v10183_v18 = vadd.f32 %v10182_v22, %v10181_v48  ;;  %v10204_v25 = vpop.f32.mrf.mxu0 }
0x218f   :  { %v10205_v39 = vadd.f32 %v10204_v25, %v10203_v12 }
0x2190   :  { %v8614_v43 = vadd.f32 %v10183_v18, %v8573_v34  ;;  %v8658_v19 = vadd.f32 %v8652_v63, %v12489_v13 }
0x2192   :  { %v8655_v1 = vadd.f32 %v10205_v39, %v8614_v43  ;;  %v8664_v46 = vsel %vm186_vm1, %v8658_v19, 0.0 }
0x2193   :  { %8665 = vadd.xlane.f32.xlu0 %v8664_v46 }
0x2194   :  { %v8659_v23 = vadd.f32 %v8655_v1, %v12487_v2  ;;  %v8713_v2 = vld [vmem:[%s13169_s20 + $0x38] sm:$0xff] }
0x2195   :  { %10553 = vmatprep.subr.mxu1 %v8713_v2 }
0x2196   :  { %v8667_v36 = vsel %vm186_vm1, %v8659_v23, 0.0  ;;  %10554 = vmatpush3.msra.mxu1 %v8713_v2 }
0x2197   :  { %8668 = vadd.xlane.f32.xlu1 %v8667_v36  ;;  %10555 = vmatprep.subr.mxu1 %v8712_v31 }
0x2198   :  { %10556 = vmatpush3.msra.mxu1 %v8712_v31 }
0x2199   :  { %10557 = vmatprep.subr.mxu1 %v8711_v26 }
0x219a   :  { %10558 = vmatpush3.msra.mxu1 %v8711_v26 }
0x219b   :  { %10559 = vmatprep.subr.mxu1 %v8710_v37 }
0x219c   :  { %10560 = vmatpush3.msra.mxu1 %v8710_v37 }
0x219d   :  { %10561 = vmatprep.subr.mxu1 %v8709_v50 }
0x219e   :  { %10562 = vmatpush3.msra.mxu1 %v8709_v50 }
0x219f   :  { %10563 = vmatprep.subr.mxu1 %v8708_v38 }
0x21a0   :  { %10564 = vmatpush3.msra.mxu1 %v8708_v38 }
0x21a1   :  { %10565 = vmatprep.subr.mxu1 %v8707_v27 }
0x21a2   :  { %10566 = vmatpush3.msra.mxu1 %v8707_v27 }
0x21a3   :  { %10567 = vmatprep.subr.mxu1 %v8706_v53 }
0x21a4   :  { %10568 = vmatpush3.msra.mxu1 %v8706_v53 }
0x221c   :  { %v8666_v21 = vpop.xlane.xlu0 %8665 }
0x221d   :  { %v8670_v57 = vmul.f32 0.015625, %v8666_v21 }
0x221f   :  { %v8672_v54 = vsub.f32 %v8658_v19, %v8670_v57 }
0x2220   :  { %v8669_v29 = vpop.xlane.xlu1 %8668 }
0x2221   :  { %v8671_v24 = vmul.f32 0.015625, %v8669_v29  ;;  %v8674_v32 = vmul.f32 %v8672_v54, %v8672_v54 }
0x2223   :  { %v8673_v35 = vsub.f32 %v8659_v23, %v8671_v24  ;;  %v8676_v40 = vsel %vm186_vm1, %v8674_v32, 0.0 }
0x2224   :  { %8677 = vadd.xlane.f32.xlu0 %v8676_v40 }
0x2225   :  { %v8675_v13 = vmul.f32 %v8673_v35, %v8673_v35 }
0x2227   :  { %v8679_v51 = vsel %vm186_vm1, %v8675_v13, 0.0 }
0x2228   :  { %8680 = vadd.xlane.f32.xlu1 %v8679_v51 }
0x22ad   :  { %v8678_v55 = vpop.xlane.xlu0 %8677 }
0x22ae   :  { %v8682_v56 = vmul.f32 0.015625, %v8678_v55 }
0x22b0   :  { %v8684_v33 = vadd.f32 1e-05, %v8682_v56 }
0x22b1   :  { %v8681_v49 = vpop.xlane.xlu1 %8680 }
0x22b2   :  { %10910 = vrsqrt.f32 %v8684_v33  ;;  %v8683_v58 = vmul.f32 0.015625, %v8681_v49 }
0x22b4   :  { %v8685_v59 = vadd.f32 1e-05, %v8683_v58 }
0x22b6   :  { %10912 = vrsqrt.f32 %v8685_v59 }
0x22bf   :  { %v10911_v60 = vpop.eup %10910 }
0x22c0   :  { %v8688_v61 = vmul.f32 %v10911_v60, %v8672_v54 }
0x22c2   :  { %v8696_v28 = vmul.f32 %v9689_v3, %v8688_v61 }
0x22c3   :  { %v10913_v20 = vpop.eup %10912 }
0x22c4   :  { %v8689_v0 = vmul.f32 %v10913_v20, %v8673_v35  ;;  %v8704_v11 = vadd.f32 %v9690_v62, %v8696_v28 }
0x22c6   :  { %v8697_v41 = vmul.f32 %v9689_v3, %v8689_v0  ;;  %10569 = vmatprep.mubr.msk.f32.mxu1 %vm186_vm1, %v8704_v11 }
0x22c8   :  { %v8705_v17 = vadd.f32 %v9690_v62, %v8697_v41 }
0x22ca   :  { %10570 = vmatmul.mubr.msk.f32.vlgmr.msra.gmra.mxu1 %vm186_vm1, %v8705_v17 }
0x238a   :  { %v10571_v52 = vpop.f32.mrf.mxu1 }
0x238b   :  { %v8799_v47 = vadd.f32 %v10571_v52, %v9691_v16 }
0x238c   :  { %v8793_v4 = vpop.f32.mrf.mxu1 }
0x238d   :  { %v8794_v5 = vadd.f32 %v9691_v16, %v8793_v4  ;;  %v8806_v6 = vsel %vm8802_vm4, %v8799_v47, -inf }
0x238e   :  { %8807 = vmax.xlane.f32.xlu1 %v8806_v6 }
0x238f   :  { %v8803_v10 = vsel %vm8802_vm4, %v8794_v5, -inf }
0x2390   :  { %8804 = vmax.xlane.f32.xlu0 %v8803_v10 }
0x2417   :  { %v8808_v30 = vpop.xlane.xlu1 %8807 }
0x2418   :  { %v8810_v14 = vsub.f32 %v8799_v47, %v8808_v30 }
0x2419   :  { %v8805_v42 = vpop.xlane.xlu0 %8804 }
0x241a   :  { %v8813_v8 = vmul.f32 1.442695, %v8810_v14  ;;  %v8809_v44 = vsub.f32 %v8794_v5, %v8805_v42 }
0x241c   :  { %10914 = vpow2.f32 %v8813_v8  ;;  %v8811_v9 = vmul.f32 1.442695, %v8809_v44 }
0x241e   :  { %10916 = vpow2.f32 %v8811_v9 }
0x2429   :  { %v10915_v48 = vpop.eup %10914 }
0x242a   :  { %v8818_v7 = vsel %vm8802_vm4, %v10915_v48, 0.0 }
0x242b   :  { %v10917_v15 = vpop.eup %10916  ;;  %8819 = vadd.xlane.f32.xlu1 %v8818_v7 }
0x242c   :  { %v8815_v45 = vsel %vm8802_vm4, %v10917_v15, 0.0 }
0x242d   :  { %8816 = vadd.xlane.f32.xlu0 %v8815_v45 }
0x24b4   :  { %v8820_v12 = vpop.xlane.xlu1 %8819 }
0x24b5   :  { %10918 = vrcp.f32 %v8820_v12 }
0x24b6   :  { %v8817_v22 = vpop.xlane.xlu0 %8816 }
0x24b7   :  { %10920 = vrcp.f32 %v8817_v22 }
0x24c2   :  { %v10919_v34 = vpop.eup %10918 }
0x24c3   :  { %v8824_v63 = vmul.f32 %v10919_v34, %v10915_v48 }
0x24c4   :  { %v10921_v18 = vpop.eup %10920 }
0x24c5   :  { %8826 = vst.msk [vmem:[%s13171_s22 + $0x8] sm:$0xff] %vm8802_vm4, %v8824_v63  ;;  %v8822_v25 = vmul.f32 %v10921_v18, %v10917_v15 }
0x24c7   :  { %8825 = vst.msk [vmem:[%s13171_s22] sm:$0xff] %vm8802_vm4, %v8822_v25 }

</bundles_post_ra>
